<compile_context>
chip_gen: v7x
topology: tpu7x:2x2x1
jax: 0.10.0
libtpu: 0.0.40
codegen_flags: <defaults>
</compile_context>

<pallas_src>
import functools

import jax
import jax.numpy as jnp
from jax.experimental import pallas as pl
from jax.experimental.pallas import tpu as pltpu  # noqa: F401  (TPU backend)


# ----------------------------- fused model kernel ----------------------------
def _fused_kernel(x_ref,                     # (T, B, D)    time-major input
                  wih0_ref,                  # (D, 3*GW)    layer-0 input weights (gate-padded)
                  bgi0_ref, bhn0_ref,        # (1, 3*GW), (1, GW)
                  wstair_ref,                # (2*GW, 9*GW) block-stacked recurrent weights
                  bgi1_ref, bhn1_ref,        # (1, 3*GW), (1, GW)
                  w1_ref, b1_ref, w2_ref, b2_ref,   # MLP head
                  o_ref,                     # (B, 1)
                  *, T, B, GW):
    GW3 = 3 * GW

    bgi0 = bgi0_ref[...]
    bhn0 = bhn0_ref[...]
    bgi1 = bgi1_ref[...]
    bhn1 = bhn1_ref[...]

    def cell(gi, gh, h_prev, bhn):
        # Every slice below is GW(=128)-lane aligned: no XLU lane rotates.
        rz = jax.nn.sigmoid(gi[:, :2 * GW] + gh[:, :2 * GW])   # merged r/z sigmoid
        r = rz[:, :GW]
        z = rz[:, GW:2 * GW]
        n = jnp.tanh(gi[:, 2 * GW:] + r * (gh[:, 2 * GW:] + bhn))
        return (1.0 - z) * n + z * h_prev

    def gi0_at(t):
        # Layer-0 input projection: depends only on x -> off the serial chain.
        return jnp.dot(x_ref[t], wih0_ref[...],
                       preferred_element_type=jnp.float32) + bgi0

    h0 = jnp.zeros((B, GW), jnp.float32)
    h1 = jnp.zeros((B, GW), jnp.float32)

    # Wavefront: wave s -> layer-0 step s and layer-1 step s-1 (T+1 waves total).
    # T is small & static -> fully unrolled.
    for s in range(T + 1):
        if s == 0:
            # h0[-1] = 0 -> gh0 = 0; no recurrent matmul needed on wave 0.
            h0 = cell(gi0_at(0), jnp.zeros((B, GW3), jnp.float32), h0, bhn0)
            continue

        # ONE recurrent matmul per wave:
        #   [h0[s-1] | h1[s-2]] @ [[Whh0, Wih1, 0], [0, 0, Whh1]]
        hcat = jnp.concatenate([h0, h1], axis=1)              # (B, 2*GW), lane-aligned
        big = jnp.dot(hcat, wstair_ref[...],
                      preferred_element_type=jnp.float32)     # (B, 9*GW)
        gh0 = big[:, :GW3]
        gi1 = big[:, GW3:2 * GW3] + bgi1
        gh1 = big[:, 2 * GW3:]

        h0_new = cell(gi0_at(s), gh0, h0, bhn0) if s < T else h0   # layer-0 step s
        h1 = cell(gi1, gh1, h1, bhn1)                              # layer-1 step s-1
        h0 = h0_new

    # Head: PyTorch applies ReLU->fc1->ReLU->fc2 per step then takes the last,
    # which is equivalent to applying it to the last hidden state only.
    hr = jnp.maximum(h1, 0.0)
    y = jnp.maximum(jnp.dot(hr, w1_ref[...], preferred_element_type=jnp.float32)
                    + b1_ref[...], 0.0)
    o_ref[...] = (jnp.dot(y, w2_ref[...], preferred_element_type=jnp.float32)
                  + b2_ref[...])


# ------------------------------- full forward --------------------------------
def _pad_gates(w, H, GW):
    """(K, 3H) gate-ordered [r,z,n] -> (K, 3*GW): each gate in its own GW-lane block."""
    K = w.shape[0]
    out = jnp.zeros((K, 3 * GW), jnp.float32)
    for g in range(3):
        out = out.at[:, g * GW: g * GW + H].set(w[:, g * H:(g + 1) * H])
    return out


@jax.jit
def gru_model_forward(x, params):
    """x: (B, C, F, T) float32 -> (B, 1) float32. Matches the PyTorch GRU module (eval)."""
    B, C, F, T = x.shape
    D = C * F
    H = params["w_hh_l0"].shape[0]
    GW = ((H + 127) // 128) * 128     # per-gate lane width, vreg(128)-aligned

    # permute(0,3,1,2).reshape(B,T,C*F) fed time-major as (T, B, D).
    # TODO(synk): store/feed the input time-major upstream once B*T grows; at
    # this size the transpose is negligible layout plumbing.
    x_tbd = jnp.transpose(x, (3, 0, 1, 2)).reshape(T, B, D)

    def fold_bias(b_ih, b_hh):
        # Pre-fold the r/z halves of b_hh into b_ih; keep b_hh_n separate
        # (it must stay inside r * (gh_n + b_hn) to match PyTorch semantics).
        b_gi = b_ih + jnp.concatenate(
            [b_hh[:, :2 * H], jnp.zeros((1, H), jnp.float32)], axis=1)
        b_hn = jnp.zeros((1, GW), jnp.float32).at[:, :H].set(b_hh[:, 2 * H:])
        return _pad_gates(b_gi, H, GW), b_hn

    bgi0, bhn0 = fold_bias(params["b_ih_l0"], params["b_hh_l0"])
    bgi1, bhn1 = fold_bias(params["b_ih_l1"], params["b_hh_l1"])

    wih0 = _pad_gates(params["w_ih_l0"], H, GW)     # (D, 3*GW)
    whh0 = _pad_gates(params["w_hh_l0"], H, GW)     # (H, 3*GW)
    wih1 = _pad_gates(params["w_ih_l1"], H, GW)     # (H, 3*GW)
    whh1 = _pad_gates(params["w_hh_l1"], H, GW)     # (H, 3*GW)

    # Block-stacked staircase weight for [h0 | h1] (B, 2*GW) @ (2*GW, 9*GW):
    #   cols 0:3GW   = h0 @ Whh0  (gh0, layer-0 step s)
    #   cols 3GW:6GW = h0 @ Wih1  (gi1, layer-1 step s-1; layer-1 input is h0)
    #   cols 6GW:9GW = h1 @ Whh1  (gh1, layer-1 step s-1)
    # Rows H:GW and GW+H:2GW are zero (padded h lanes are zero and harmless).
    w_stair = jnp.zeros((2 * GW, 9 * GW), jnp.float32)
    w_stair = w_stair.at[:H, 0:3 * GW].set(whh0)
    w_stair = w_stair.at[:H, 3 * GW:6 * GW].set(wih1)
    w_stair = w_stair.at[GW:GW + H, 6 * GW:9 * GW].set(whh1)

    # Head: pad fc1 rows so it consumes the GW-lane padded hidden state directly.
    fc1_w = (jnp.zeros((GW, params["fc1_w"].shape[1]), jnp.float32)
             .at[:H].set(params["fc1_w"]))

    kernel = functools.partial(_fused_kernel, T=T, B=B, GW=GW)
    return pl.pallas_call(
        kernel,
        out_shape=jax.ShapeDtypeStruct((B, 1), jnp.float32),
    )(x_tbd, wih0, bgi0, bhn0, w_stair, bgi1, bhn1,
      fc1_w, params["fc1_b"], params["fc2_w"], params["fc2_b"])


# ------------------------------ param init -----------------------------------
def init_params(key, input_dim, hidden_dim):
    H = hidden_dim
    ks = jax.random.split(key, 12)
    k_gru = 1.0 / jnp.sqrt(jnp.float32(H))

    def u(k, shape, bound):
        return jax.random.uniform(k, shape, jnp.float32, -bound, bound)

    params = {
        # layer 0: input_dim -> H ; stored pre-transposed (in, 3H), gate order [r, z, n]
        "w_ih_l0": u(ks[0], (input_dim, 3 * H), k_gru),
        "w_hh_l0": u(ks[1], (H, 3 * H), k_gru),
        "b_ih_l0": u(ks[2], (1, 3 * H), k_gru),
        "b_hh_l0": u(ks[3], (1, 3 * H), k_gru),
        # layer 1: H -> H
        "w_ih_l1": u(ks[4], (H, 3 * H), k_gru),
        "w_hh_l1": u(ks[5], (H, 3 * H), k_gru),
        "b_ih_l1": u(ks[6], (1, 3 * H), k_gru),
        "b_hh_l1": u(ks[7], (1, 3 * H), k_gru),
    }
    k_fc1 = 1.0 / jnp.sqrt(jnp.float32(H))
    k_fc2 = 1.0 / jnp.sqrt(jnp.float32(H // 2))
    params.update({
        "fc1_w": u(ks[8], (H, H // 2), k_fc1),
        "fc1_b": u(ks[9], (1, H // 2), k_fc1),
        "fc2_w": u(ks[10], (H // 2, 1), k_fc2),
        "fc2_b": u(ks[11], (1, 1), k_fc2),
    })
    return params


# --------------------------- pure-JAX reference -------------------------------
def _ref_forward(x, params):
    B, C, F, T = x.shape
    xs = jnp.transpose(x, (0, 3, 1, 2)).reshape(B, T, C * F)
    hp = jax.lax.Precision.HIGHEST

    def run_layer(seq, wih, whh, bih, bhh):
        H = whh.shape[0]

        def step(h, x_t):
            gi = jnp.dot(x_t, wih, precision=hp) + bih
            gh = jnp.dot(h, whh, precision=hp) + bhh
            r = jax.nn.sigmoid(gi[:, :H] + gh[:, :H])
            z = jax.nn.sigmoid(gi[:, H:2 * H] + gh[:, H:2 * H])
            n = jnp.tanh(gi[:, 2 * H:] + r * gh[:, 2 * H:])
            h_new = (1.0 - z) * n + z * h
            return h_new, h_new

        h0 = jnp.zeros((seq.shape[1], H), jnp.float32)
        _, out = jax.lax.scan(step, h0, seq)
        return out

    seq = jnp.transpose(xs, (1, 0, 2))
    h1 = run_layer(seq, params["w_ih_l0"], params["w_hh_l0"],
                   params["b_ih_l0"], params["b_hh_l0"])
    h2 = run_layer(h1, params["w_ih_l1"], params["w_hh_l1"],
                   params["b_ih_l1"], params["b_hh_l1"])
    h_last = jnp.maximum(h2[-1], 0.0)
    y = jnp.maximum(jnp.dot(h_last, params["fc1_w"], precision=hp) + params["fc1_b"], 0.0)
    return jnp.dot(y, params["fc2_w"], precision=hp) + params["fc2_b"]


if __name__ == "__main__":
    B, C, F, T = 2, 4, 16, 8          # batch, channels, freq_bins, time_steps
    H = 32                            # hidden_dim
    input_dim = C * F

    key = jax.random.PRNGKey(0)
    kx, kp = jax.random.split(key)
    x = jax.random.normal(kx, (B, C, F, T), jnp.float32)
    params = init_params(kp, input_dim, H)

    out = gru_model_forward(x, params)
    out = jax.block_until_ready(out)
    assert out.shape == (B, 1) and out.dtype == jnp.float32

    ref = _ref_forward(x, params)
    assert jnp.allclose(out, ref, atol=1e-2, rtol=1e-2), (out, ref)

    print("KERNEL_OK")
</pallas_src>

<mosaic_0001>
module attributes {stable_mosaic.version = 11 : i64} {
  func.func @_fused_kernel(%arg0: memref<8x2x64xf32, #tpu.memory_space<vmem>>, %arg1: memref<64x384xf32, #tpu.memory_space<vmem>>, %arg2: memref<1x384xf32, #tpu.memory_space<vmem>>, %arg3: memref<1x128xf32, #tpu.memory_space<vmem>>, %arg4: memref<256x1152xf32, #tpu.memory_space<vmem>>, %arg5: memref<1x384xf32, #tpu.memory_space<vmem>>, %arg6: memref<1x128xf32, #tpu.memory_space<vmem>>, %arg7: memref<128x16xf32, #tpu.memory_space<vmem>>, %arg8: memref<1x16xf32, #tpu.memory_space<vmem>>, %arg9: memref<16x1xf32, #tpu.memory_space<vmem>>, %arg10: memref<1x1xf32, #tpu.memory_space<vmem>>, %arg11: memref<2x1xf32, #tpu.memory_space<vmem>>) attributes {dimension_semantics = [], scalar_prefetch = 0 : i64, scratch_operands = 0 : i64, tpu.core_type = #tpu.core_type<tc>} {
    %c0 = arith.constant 0 : index
    %c0_0 = arith.constant 0 : index
    %0 = vector.load %arg2[%c0, %c0_0] : memref<1x384xf32, #tpu.memory_space<vmem>>, vector<1x384xf32>
    %c0_1 = arith.constant 0 : index
    %c0_2 = arith.constant 0 : index
    %1 = vector.load %arg3[%c0_1, %c0_2] : memref<1x128xf32, #tpu.memory_space<vmem>>, vector<1x128xf32>
    %c0_3 = arith.constant 0 : index
    %c0_4 = arith.constant 0 : index
    %2 = vector.load %arg5[%c0_3, %c0_4] : memref<1x384xf32, #tpu.memory_space<vmem>>, vector<1x384xf32>
    %c0_5 = arith.constant 0 : index
    %c0_6 = arith.constant 0 : index
    %3 = vector.load %arg6[%c0_5, %c0_6] : memref<1x128xf32, #tpu.memory_space<vmem>>, vector<1x128xf32>
    %cst = arith.constant 0.000000e+00 : f32
    %4 = vector.broadcast %cst : f32 to vector<2x128xf32>
    %cst_7 = arith.constant 0.000000e+00 : f32
    %5 = vector.broadcast %cst_7 : f32 to vector<2x128xf32>
    %c0_8 = arith.constant 0 : index
    %c0_9 = arith.constant 0 : index
    %c0_10 = arith.constant 0 : index
    %6 = vector.load %arg0[%c0_8, %c0_9, %c0_10] : memref<8x2x64xf32, #tpu.memory_space<vmem>>, vector<1x2x64xf32>
    %7 = vector.shape_cast %6 : vector<1x2x64xf32> to vector<2x64xf32>
    %c0_11 = arith.constant 0 : index
    %c0_12 = arith.constant 0 : index
    %8 = vector.load %arg1[%c0_11, %c0_12] : memref<64x384xf32, #tpu.memory_space<vmem>>, vector<64x384xf32>
    %cst_13 = arith.constant dense<0.000000e+00> : vector<2x384xf32>
    %9 = tpu.matmul %7, %8, %cst_13 {dimension_numbers = #tpu.dot_dimension_numbers<[1], [0], [0], [1], [0, 0, 1, 1], [], []>} : vector<2x64xf32>, vector<64x384xf32>, vector<2x384xf32> -> vector<2x384xf32>
    %10 = vector.broadcast %0 : vector<1x384xf32> to vector<2x384xf32>
    %11 = arith.addf %9, %10 : vector<2x384xf32>
    %cst_14 = arith.constant 0.000000e+00 : f32
    %12 = vector.broadcast %cst_14 : f32 to vector<2x384xf32>
    %13 = vector.extract_strided_slice %11 {offsets = [0, 0], sizes = [2, 256], strides = [1, 1]} : vector<2x384xf32> to vector<2x256xf32>
    %14 = vector.extract_strided_slice %12 {offsets = [0, 0], sizes = [2, 256], strides = [1, 1]} : vector<2x384xf32> to vector<2x256xf32>
    %15 = arith.addf %13, %14 : vector<2x256xf32>
    %16 = arith.negf %15 : vector<2x256xf32>
    %17 = math.exp %16 : vector<2x256xf32>
    %cst_15 = arith.constant 1.000000e+00 : f32
    %18 = vector.broadcast %cst_15 : f32 to vector<2x256xf32>
    %19 = arith.addf %18, %17 : vector<2x256xf32>
    %20 = arith.divf %18, %19 : vector<2x256xf32>
    %21 = vector.extract_strided_slice %20 {offsets = [0, 0], sizes = [2, 128], strides = [1, 1]} : vector<2x256xf32> to vector<2x128xf32>
    %22 = vector.extract_strided_slice %20 {offsets = [0, 128], sizes = [2, 128], strides = [1, 1]} : vector<2x256xf32> to vector<2x128xf32>
    %23 = vector.extract_strided_slice %11 {offsets = [0, 256], sizes = [2, 128], strides = [1, 1]} : vector<2x384xf32> to vector<2x128xf32>
    %24 = vector.extract_strided_slice %12 {offsets = [0, 256], sizes = [2, 128], strides = [1, 1]} : vector<2x384xf32> to vector<2x128xf32>
    %25 = vector.broadcast %1 : vector<1x128xf32> to vector<2x128xf32>
    %26 = arith.addf %24, %25 : vector<2x128xf32>
    %27 = arith.mulf %21, %26 : vector<2x128xf32>
    %28 = arith.addf %23, %27 : vector<2x128xf32>
    %29 = math.tanh %28 : vector<2x128xf32>
    %cst_16 = arith.constant 1.000000e+00 : f32
    %30 = vector.broadcast %cst_16 : f32 to vector<2x128xf32>
    %31 = arith.subf %30, %22 : vector<2x128xf32>
    %32 = arith.mulf %31, %29 : vector<2x128xf32>
    %33 = arith.mulf %22, %4 : vector<2x128xf32>
    %34 = arith.addf %32, %33 : vector<2x128xf32>
    %35 = tpu.concatenate %34, %5 in 1 : vector<2x128xf32>, vector<2x128xf32> -> vector<2x256xf32>
    %c0_17 = arith.constant 0 : index
    %c0_18 = arith.constant 0 : index
    %36 = vector.load %arg4[%c0_17, %c0_18] : memref<256x1152xf32, #tpu.memory_space<vmem>>, vector<256x1152xf32>
    %cst_19 = arith.constant dense<0.000000e+00> : vector<2x1152xf32>
    %37 = tpu.matmul %35, %36, %cst_19 {dimension_numbers = #tpu.dot_dimension_numbers<[1], [0], [0], [1], [0, 0, 1, 1], [], []>} : vector<2x256xf32>, vector<256x1152xf32>, vector<2x1152xf32> -> vector<2x1152xf32>
    %38 = vector.extract_strided_slice %37 {offsets = [0, 0], sizes = [2, 384], strides = [1, 1]} : vector<2x1152xf32> to vector<2x384xf32>
    %39 = vector.extract_strided_slice %37 {offsets = [0, 384], sizes = [2, 384], strides = [1, 1]} : vector<2x1152xf32> to vector<2x384xf32>
    %40 = vector.broadcast %2 : vector<1x384xf32> to vector<2x384xf32>
    %41 = arith.addf %39, %40 : vector<2x384xf32>
    %42 = vector.extract_strided_slice %37 {offsets = [0, 768], sizes = [2, 384], strides = [1, 1]} : vector<2x1152xf32> to vector<2x384xf32>
    %c1 = arith.constant 1 : index
    %c0_20 = arith.constant 0 : index
    %c0_21 = arith.constant 0 : index
    %43 = vector.load %arg0[%c1, %c0_20, %c0_21] : memref<8x2x64xf32, #tpu.memory_space<vmem>>, vector<1x2x64xf32>
    %44 = vector.shape_cast %43 : vector<1x2x64xf32> to vector<2x64xf32>
    %c0_22 = arith.constant 0 : index
    %c0_23 = arith.constant 0 : index
    %45 = vector.load %arg1[%c0_22, %c0_23] : memref<64x384xf32, #tpu.memory_space<vmem>>, vector<64x384xf32>
    %cst_24 = arith.constant dense<0.000000e+00> : vector<2x384xf32>
    %46 = tpu.matmul %44, %45, %cst_24 {dimension_numbers = #tpu.dot_dimension_numbers<[1], [0], [0], [1], [0, 0, 1, 1], [], []>} : vector<2x64xf32>, vector<64x384xf32>, vector<2x384xf32> -> vector<2x384xf32>
    %47 = vector.broadcast %0 : vector<1x384xf32> to vector<2x384xf32>
    %48 = arith.addf %46, %47 : vector<2x384xf32>
    %49 = vector.extract_strided_slice %48 {offsets = [0, 0], sizes = [2, 256], strides = [1, 1]} : vector<2x384xf32> to vector<2x256xf32>
    %50 = vector.extract_strided_slice %38 {offsets = [0, 0], sizes = [2, 256], strides = [1, 1]} : vector<2x384xf32> to vector<2x256xf32>
    %51 = arith.addf %49, %50 : vector<2x256xf32>
    %52 = arith.negf %51 : vector<2x256xf32>
    %53 = math.exp %52 : vector<2x256xf32>
    %cst_25 = arith.constant 1.000000e+00 : f32
    %54 = vector.broadcast %cst_25 : f32 to vector<2x256xf32>
    %55 = arith.addf %54, %53 : vector<2x256xf32>
    %56 = arith.divf %54, %55 : vector<2x256xf32>
    %57 = vector.extract_strided_slice %56 {offsets = [0, 0], sizes = [2, 128], strides = [1, 1]} : vector<2x256xf32> to vector<2x128xf32>
    %58 = vector.extract_strided_slice %56 {offsets = [0, 128], sizes = [2, 128], strides = [1, 1]} : vector<2x256xf32> to vector<2x128xf32>
    %59 = vector.extract_strided_slice %48 {offsets = [0, 256], sizes = [2, 128], strides = [1, 1]} : vector<2x384xf32> to vector<2x128xf32>
    %60 = vector.extract_strided_slice %38 {offsets = [0, 256], sizes = [2, 128], strides = [1, 1]} : vector<2x384xf32> to vector<2x128xf32>
    %61 = vector.broadcast %1 : vector<1x128xf32> to vector<2x128xf32>
    %62 = arith.addf %60, %61 : vector<2x128xf32>
    %63 = arith.mulf %57, %62 : vector<2x128xf32>
    %64 = arith.addf %59, %63 : vector<2x128xf32>
    %65 = math.tanh %64 : vector<2x128xf32>
    %cst_26 = arith.constant 1.000000e+00 : f32
    %66 = vector.broadcast %cst_26 : f32 to vector<2x128xf32>
    %67 = arith.subf %66, %58 : vector<2x128xf32>
    %68 = arith.mulf %67, %65 : vector<2x128xf32>
    %69 = arith.mulf %58, %34 : vector<2x128xf32>
    %70 = arith.addf %68, %69 : vector<2x128xf32>
    %71 = vector.extract_strided_slice %41 {offsets = [0, 0], sizes = [2, 256], strides = [1, 1]} : vector<2x384xf32> to vector<2x256xf32>
    %72 = vector.extract_strided_slice %42 {offsets = [0, 0], sizes = [2, 256], strides = [1, 1]} : vector<2x384xf32> to vector<2x256xf32>
    %73 = arith.addf %71, %72 : vector<2x256xf32>
    %74 = arith.negf %73 : vector<2x256xf32>
    %75 = math.exp %74 : vector<2x256xf32>
    %cst_27 = arith.constant 1.000000e+00 : f32
    %76 = vector.broadcast %cst_27 : f32 to vector<2x256xf32>
    %77 = arith.addf %76, %75 : vector<2x256xf32>
    %78 = arith.divf %76, %77 : vector<2x256xf32>
    %79 = vector.extract_strided_slice %78 {offsets = [0, 0], sizes = [2, 128], strides = [1, 1]} : vector<2x256xf32> to vector<2x128xf32>
    %80 = vector.extract_strided_slice %78 {offsets = [0, 128], sizes = [2, 128], strides = [1, 1]} : vector<2x256xf32> to vector<2x128xf32>
    %81 = vector.extract_strided_slice %41 {offsets = [0, 256], sizes = [2, 128], strides = [1, 1]} : vector<2x384xf32> to vector<2x128xf32>
    %82 = vector.extract_strided_slice %42 {offsets = [0, 256], sizes = [2, 128], strides = [1, 1]} : vector<2x384xf32> to vector<2x128xf32>
    %83 = vector.broadcast %3 : vector<1x128xf32> to vector<2x128xf32>
    %84 = arith.addf %82, %83 : vector<2x128xf32>
    %85 = arith.mulf %79, %84 : vector<2x128xf32>
    %86 = arith.addf %81, %85 : vector<2x128xf32>
    %87 = math.tanh %86 : vector<2x128xf32>
    %cst_28 = arith.constant 1.000000e+00 : f32
    %88 = vector.broadcast %cst_28 : f32 to vector<2x128xf32>
    %89 = arith.subf %88, %80 : vector<2x128xf32>
    %90 = arith.mulf %89, %87 : vector<2x128xf32>
    %91 = arith.mulf %80, %5 : vector<2x128xf32>
    %92 = arith.addf %90, %91 : vector<2x128xf32>
    %93 = tpu.concatenate %70, %92 in 1 : vector<2x128xf32>, vector<2x128xf32> -> vector<2x256xf32>
    %c0_29 = arith.constant 0 : index
    %c0_30 = arith.constant 0 : index
    %94 = vector.load %arg4[%c0_29, %c0_30] : memref<256x1152xf32, #tpu.memory_space<vmem>>, vector<256x1152xf32>
    %cst_31 = arith.constant dense<0.000000e+00> : vector<2x1152xf32>
    %95 = tpu.matmul %93, %94, %cst_31 {dimension_numbers = #tpu.dot_dimension_numbers<[1], [0], [0], [1], [0, 0, 1, 1], [], []>} : vector<2x256xf32>, vector<256x1152xf32>, vector<2x1152xf32> -> vector<2x1152xf32>
    %96 = vector.extract_strided_slice %95 {offsets = [0, 0], sizes = [2, 384], strides = [1, 1]} : vector<2x1152xf32> to vector<2x384xf32>
    %97 = vector.extract_strided_slice %95 {offsets = [0, 384], sizes = [2, 384], strides = [1, 1]} : vector<2x1152xf32> to vector<2x384xf32>
    %98 = vector.broadcast %2 : vector<1x384xf32> to vector<2x384xf32>
    %99 = arith.addf %97, %98 : vector<2x384xf32>
    %100 = vector.extract_strided_slice %95 {offsets = [0, 768], sizes = [2, 384], strides = [1, 1]} : vector<2x1152xf32> to vector<2x384xf32>
    %c2 = arith.constant 2 : index
    %c0_32 = arith.constant 0 : index
    %c0_33 = arith.constant 0 : index
    %101 = vector.load %arg0[%c2, %c0_32, %c0_33] : memref<8x2x64xf32, #tpu.memory_space<vmem>>, vector<1x2x64xf32>
    %102 = vector.shape_cast %101 : vector<1x2x64xf32> to vector<2x64xf32>
    %c0_34 = arith.constant 0 : index
    %c0_35 = arith.constant 0 : index
    %103 = vector.load %arg1[%c0_34, %c0_35] : memref<64x384xf32, #tpu.memory_space<vmem>>, vector<64x384xf32>
    %cst_36 = arith.constant dense<0.000000e+00> : vector<2x384xf32>
    %104 = tpu.matmul %102, %103, %cst_36 {dimension_numbers = #tpu.dot_dimension_numbers<[1], [0], [0], [1], [0, 0, 1, 1], [], []>} : vector<2x64xf32>, vector<64x384xf32>, vector<2x384xf32> -> vector<2x384xf32>
    %105 = vector.broadcast %0 : vector<1x384xf32> to vector<2x384xf32>
    %106 = arith.addf %104, %105 : vector<2x384xf32>
    %107 = vector.extract_strided_slice %106 {offsets = [0, 0], sizes = [2, 256], strides = [1, 1]} : vector<2x384xf32> to vector<2x256xf32>
    %108 = vector.extract_strided_slice %96 {offsets = [0, 0], sizes = [2, 256], strides = [1, 1]} : vector<2x384xf32> to vector<2x256xf32>
    %109 = arith.addf %107, %108 : vector<2x256xf32>
    %110 = arith.negf %109 : vector<2x256xf32>
    %111 = math.exp %110 : vector<2x256xf32>
    %cst_37 = arith.constant 1.000000e+00 : f32
    %112 = vector.broadcast %cst_37 : f32 to vector<2x256xf32>
    %113 = arith.addf %112, %111 : vector<2x256xf32>
    %114 = arith.divf %112, %113 : vector<2x256xf32>
    %115 = vector.extract_strided_slice %114 {offsets = [0, 0], sizes = [2, 128], strides = [1, 1]} : vector<2x256xf32> to vector<2x128xf32>
    %116 = vector.extract_strided_slice %114 {offsets = [0, 128], sizes = [2, 128], strides = [1, 1]} : vector<2x256xf32> to vector<2x128xf32>
    %117 = vector.extract_strided_slice %106 {offsets = [0, 256], sizes = [2, 128], strides = [1, 1]} : vector<2x384xf32> to vector<2x128xf32>
    %118 = vector.extract_strided_slice %96 {offsets = [0, 256], sizes = [2, 128], strides = [1, 1]} : vector<2x384xf32> to vector<2x128xf32>
    %119 = vector.broadcast %1 : vector<1x128xf32> to vector<2x128xf32>
    %120 = arith.addf %118, %119 : vector<2x128xf32>
    %121 = arith.mulf %115, %120 : vector<2x128xf32>
    %122 = arith.addf %117, %121 : vector<2x128xf32>
    %123 = math.tanh %122 : vector<2x128xf32>
    %cst_38 = arith.constant 1.000000e+00 : f32
    %124 = vector.broadcast %cst_38 : f32 to vector<2x128xf32>
    %125 = arith.subf %124, %116 : vector<2x128xf32>
    %126 = arith.mulf %125, %123 : vector<2x128xf32>
    %127 = arith.mulf %116, %70 : vector<2x128xf32>
    %128 = arith.addf %126, %127 : vector<2x128xf32>
    %129 = vector.extract_strided_slice %99 {offsets = [0, 0], sizes = [2, 256], strides = [1, 1]} : vector<2x384xf32> to vector<2x256xf32>
    %130 = vector.extract_strided_slice %100 {offsets = [0, 0], sizes = [2, 256], strides = [1, 1]} : vector<2x384xf32> to vector<2x256xf32>
    %131 = arith.addf %129, %130 : vector<2x256xf32>
    %132 = arith.negf %131 : vector<2x256xf32>
    %133 = math.exp %132 : vector<2x256xf32>
    %cst_39 = arith.constant 1.000000e+00 : f32
    %134 = vector.broadcast %cst_39 : f32 to vector<2x256xf32>
    %135 = arith.addf %134, %133 : vector<2x256xf32>
    %136 = arith.divf %134, %135 : vector<2x256xf32>
    %137 = vector.extract_strided_slice %136 {offsets = [0, 0], sizes = [2, 128], strides = [1, 1]} : vector<2x256xf32> to vector<2x128xf32>
    %138 = vector.extract_strided_slice %136 {offsets = [0, 128], sizes = [2, 128], strides = [1, 1]} : vector<2x256xf32> to vector<2x128xf32>
    %139 = vector.extract_strided_slice %99 {offsets = [0, 256], sizes = [2, 128], strides = [1, 1]} : vector<2x384xf32> to vector<2x128xf32>
    %140 = vector.extract_strided_slice %100 {offsets = [0, 256], sizes = [2, 128], strides = [1, 1]} : vector<2x384xf32> to vector<2x128xf32>
    %141 = vector.broadcast %3 : vector<1x128xf32> to vector<2x128xf32>
    %142 = arith.addf %140, %141 : vector<2x128xf32>
    %143 = arith.mulf %137, %142 : vector<2x128xf32>
    %144 = arith.addf %139, %143 : vector<2x128xf32>
    %145 = math.tanh %144 : vector<2x128xf32>
    %cst_40 = arith.constant 1.000000e+00 : f32
    %146 = vector.broadcast %cst_40 : f32 to vector<2x128xf32>
    %147 = arith.subf %146, %138 : vector<2x128xf32>
    %148 = arith.mulf %147, %145 : vector<2x128xf32>
    %149 = arith.mulf %138, %92 : vector<2x128xf32>
    %150 = arith.addf %148, %149 : vector<2x128xf32>
    %151 = tpu.concatenate %128, %150 in 1 : vector<2x128xf32>, vector<2x128xf32> -> vector<2x256xf32>
    %c0_41 = arith.constant 0 : index
    %c0_42 = arith.constant 0 : index
    %152 = vector.load %arg4[%c0_41, %c0_42] : memref<256x1152xf32, #tpu.memory_space<vmem>>, vector<256x1152xf32>
    %cst_43 = arith.constant dense<0.000000e+00> : vector<2x1152xf32>
    %153 = tpu.matmul %151, %152, %cst_43 {dimension_numbers = #tpu.dot_dimension_numbers<[1], [0], [0], [1], [0, 0, 1, 1], [], []>} : vector<2x256xf32>, vector<256x1152xf32>, vector<2x1152xf32> -> vector<2x1152xf32>
    %154 = vector.extract_strided_slice %153 {offsets = [0, 0], sizes = [2, 384], strides = [1, 1]} : vector<2x1152xf32> to vector<2x384xf32>
    %155 = vector.extract_strided_slice %153 {offsets = [0, 384], sizes = [2, 384], strides = [1, 1]} : vector<2x1152xf32> to vector<2x384xf32>
    %156 = vector.broadcast %2 : vector<1x384xf32> to vector<2x384xf32>
    %157 = arith.addf %155, %156 : vector<2x384xf32>
    %158 = vector.extract_strided_slice %153 {offsets = [0, 768], sizes = [2, 384], strides = [1, 1]} : vector<2x1152xf32> to vector<2x384xf32>
    %c3 = arith.constant 3 : index
    %c0_44 = arith.constant 0 : index
    %c0_45 = arith.constant 0 : index
    %159 = vector.load %arg0[%c3, %c0_44, %c0_45] : memref<8x2x64xf32, #tpu.memory_space<vmem>>, vector<1x2x64xf32>
    %160 = vector.shape_cast %159 : vector<1x2x64xf32> to vector<2x64xf32>
    %c0_46 = arith.constant 0 : index
    %c0_47 = arith.constant 0 : index
    %161 = vector.load %arg1[%c0_46, %c0_47] : memref<64x384xf32, #tpu.memory_space<vmem>>, vector<64x384xf32>
    %cst_48 = arith.constant dense<0.000000e+00> : vector<2x384xf32>
    %162 = tpu.matmul %160, %161, %cst_48 {dimension_numbers = #tpu.dot_dimension_numbers<[1], [0], [0], [1], [0, 0, 1, 1], [], []>} : vector<2x64xf32>, vector<64x384xf32>, vector<2x384xf32> -> vector<2x384xf32>
    %163 = vector.broadcast %0 : vector<1x384xf32> to vector<2x384xf32>
    %164 = arith.addf %162, %163 : vector<2x384xf32>
    %165 = vector.extract_strided_slice %164 {offsets = [0, 0], sizes = [2, 256], strides = [1, 1]} : vector<2x384xf32> to vector<2x256xf32>
    %166 = vector.extract_strided_slice %154 {offsets = [0, 0], sizes = [2, 256], strides = [1, 1]} : vector<2x384xf32> to vector<2x256xf32>
    %167 = arith.addf %165, %166 : vector<2x256xf32>
    %168 = arith.negf %167 : vector<2x256xf32>
    %169 = math.exp %168 : vector<2x256xf32>
    %cst_49 = arith.constant 1.000000e+00 : f32
    %170 = vector.broadcast %cst_49 : f32 to vector<2x256xf32>
    %171 = arith.addf %170, %169 : vector<2x256xf32>
    %172 = arith.divf %170, %171 : vector<2x256xf32>
    %173 = vector.extract_strided_slice %172 {offsets = [0, 0], sizes = [2, 128], strides = [1, 1]} : vector<2x256xf32> to vector<2x128xf32>
    %174 = vector.extract_strided_slice %172 {offsets = [0, 128], sizes = [2, 128], strides = [1, 1]} : vector<2x256xf32> to vector<2x128xf32>
    %175 = vector.extract_strided_slice %164 {offsets = [0, 256], sizes = [2, 128], strides = [1, 1]} : vector<2x384xf32> to vector<2x128xf32>
    %176 = vector.extract_strided_slice %154 {offsets = [0, 256], sizes = [2, 128], strides = [1, 1]} : vector<2x384xf32> to vector<2x128xf32>
    %177 = vector.broadcast %1 : vector<1x128xf32> to vector<2x128xf32>
    %178 = arith.addf %176, %177 : vector<2x128xf32>
    %179 = arith.mulf %173, %178 : vector<2x128xf32>
    %180 = arith.addf %175, %179 : vector<2x128xf32>
    %181 = math.tanh %180 : vector<2x128xf32>
    %cst_50 = arith.constant 1.000000e+00 : f32
    %182 = vector.broadcast %cst_50 : f32 to vector<2x128xf32>
    %183 = arith.subf %182, %174 : vector<2x128xf32>
    %184 = arith.mulf %183, %181 : vector<2x128xf32>
    %185 = arith.mulf %174, %128 : vector<2x128xf32>
    %186 = arith.addf %184, %185 : vector<2x128xf32>
    %187 = vector.extract_strided_slice %157 {offsets = [0, 0], sizes = [2, 256], strides = [1, 1]} : vector<2x384xf32> to vector<2x256xf32>
    %188 = vector.extract_strided_slice %158 {offsets = [0, 0], sizes = [2, 256], strides = [1, 1]} : vector<2x384xf32> to vector<2x256xf32>
    %189 = arith.addf %187, %188 : vector<2x256xf32>
    %190 = arith.negf %189 : vector<2x256xf32>
    %191 = math.exp %190 : vector<2x256xf32>
    %cst_51 = arith.constant 1.000000e+00 : f32
    %192 = vector.broadcast %cst_51 : f32 to vector<2x256xf32>
    %193 = arith.addf %192, %191 : vector<2x256xf32>
    %194 = arith.divf %192, %193 : vector<2x256xf32>
    %195 = vector.extract_strided_slice %194 {offsets = [0, 0], sizes = [2, 128], strides = [1, 1]} : vector<2x256xf32> to vector<2x128xf32>
    %196 = vector.extract_strided_slice %194 {offsets = [0, 128], sizes = [2, 128], strides = [1, 1]} : vector<2x256xf32> to vector<2x128xf32>
    %197 = vector.extract_strided_slice %157 {offsets = [0, 256], sizes = [2, 128], strides = [1, 1]} : vector<2x384xf32> to vector<2x128xf32>
    %198 = vector.extract_strided_slice %158 {offsets = [0, 256], sizes = [2, 128], strides = [1, 1]} : vector<2x384xf32> to vector<2x128xf32>
    %199 = vector.broadcast %3 : vector<1x128xf32> to vector<2x128xf32>
    %200 = arith.addf %198, %199 : vector<2x128xf32>
    %201 = arith.mulf %195, %200 : vector<2x128xf32>
    %202 = arith.addf %197, %201 : vector<2x128xf32>
    %203 = math.tanh %202 : vector<2x128xf32>
    %cst_52 = arith.constant 1.000000e+00 : f32
    %204 = vector.broadcast %cst_52 : f32 to vector<2x128xf32>
    %205 = arith.subf %204, %196 : vector<2x128xf32>
    %206 = arith.mulf %205, %203 : vector<2x128xf32>
    %207 = arith.mulf %196, %150 : vector<2x128xf32>
    %208 = arith.addf %206, %207 : vector<2x128xf32>
    %209 = tpu.concatenate %186, %208 in 1 : vector<2x128xf32>, vector<2x128xf32> -> vector<2x256xf32>
    %c0_53 = arith.constant 0 : index
    %c0_54 = arith.constant 0 : index
    %210 = vector.load %arg4[%c0_53, %c0_54] : memref<256x1152xf32, #tpu.memory_space<vmem>>, vector<256x1152xf32>
    %cst_55 = arith.constant dense<0.000000e+00> : vector<2x1152xf32>
    %211 = tpu.matmul %209, %210, %cst_55 {dimension_numbers = #tpu.dot_dimension_numbers<[1], [0], [0], [1], [0, 0, 1, 1], [], []>} : vector<2x256xf32>, vector<256x1152xf32>, vector<2x1152xf32> -> vector<2x1152xf32>
    %212 = vector.extract_strided_slice %211 {offsets = [0, 0], sizes = [2, 384], strides = [1, 1]} : vector<2x1152xf32> to vector<2x384xf32>
    %213 = vector.extract_strided_slice %211 {offsets = [0, 384], sizes = [2, 384], strides = [1, 1]} : vector<2x1152xf32> to vector<2x384xf32>
    %214 = vector.broadcast %2 : vector<1x384xf32> to vector<2x384xf32>
    %215 = arith.addf %213, %214 : vector<2x384xf32>
    %216 = vector.extract_strided_slice %211 {offsets = [0, 768], sizes = [2, 384], strides = [1, 1]} : vector<2x1152xf32> to vector<2x384xf32>
    %c4 = arith.constant 4 : index
    %c0_56 = arith.constant 0 : index
    %c0_57 = arith.constant 0 : index
    %217 = vector.load %arg0[%c4, %c0_56, %c0_57] : memref<8x2x64xf32, #tpu.memory_space<vmem>>, vector<1x2x64xf32>
    %218 = vector.shape_cast %217 : vector<1x2x64xf32> to vector<2x64xf32>
    %c0_58 = arith.constant 0 : index
    %c0_59 = arith.constant 0 : index
    %219 = vector.load %arg1[%c0_58, %c0_59] : memref<64x384xf32, #tpu.memory_space<vmem>>, vector<64x384xf32>
    %cst_60 = arith.constant dense<0.000000e+00> : vector<2x384xf32>
    %220 = tpu.matmul %218, %219, %cst_60 {dimension_numbers = #tpu.dot_dimension_numbers<[1], [0], [0], [1], [0, 0, 1, 1], [], []>} : vector<2x64xf32>, vector<64x384xf32>, vector<2x384xf32> -> vector<2x384xf32>
    %221 = vector.broadcast %0 : vector<1x384xf32> to vector<2x384xf32>
    %222 = arith.addf %220, %221 : vector<2x384xf32>
    %223 = vector.extract_strided_slice %222 {offsets = [0, 0], sizes = [2, 256], strides = [1, 1]} : vector<2x384xf32> to vector<2x256xf32>
    %224 = vector.extract_strided_slice %212 {offsets = [0, 0], sizes = [2, 256], strides = [1, 1]} : vector<2x384xf32> to vector<2x256xf32>
    %225 = arith.addf %223, %224 : vector<2x256xf32>
    %226 = arith.negf %225 : vector<2x256xf32>
    %227 = math.exp %226 : vector<2x256xf32>
    %cst_61 = arith.constant 1.000000e+00 : f32
    %228 = vector.broadcast %cst_61 : f32 to vector<2x256xf32>
    %229 = arith.addf %228, %227 : vector<2x256xf32>
    %230 = arith.divf %228, %229 : vector<2x256xf32>
    %231 = vector.extract_strided_slice %230 {offsets = [0, 0], sizes = [2, 128], strides = [1, 1]} : vector<2x256xf32> to vector<2x128xf32>
    %232 = vector.extract_strided_slice %230 {offsets = [0, 128], sizes = [2, 128], strides = [1, 1]} : vector<2x256xf32> to vector<2x128xf32>
    %233 = vector.extract_strided_slice %222 {offsets = [0, 256], sizes = [2, 128], strides = [1, 1]} : vector<2x384xf32> to vector<2x128xf32>
    %234 = vector.extract_strided_slice %212 {offsets = [0, 256], sizes = [2, 128], strides = [1, 1]} : vector<2x384xf32> to vector<2x128xf32>
    %235 = vector.broadcast %1 : vector<1x128xf32> to vector<2x128xf32>
    %236 = arith.addf %234, %235 : vector<2x128xf32>
    %237 = arith.mulf %231, %236 : vector<2x128xf32>
    %238 = arith.addf %233, %237 : vector<2x128xf32>
    %239 = math.tanh %238 : vector<2x128xf32>
    %cst_62 = arith.constant 1.000000e+00 : f32
    %240 = vector.broadcast %cst_62 : f32 to vector<2x128xf32>
    %241 = arith.subf %240, %232 : vector<2x128xf32>
    %242 = arith.mulf %241, %239 : vector<2x128xf32>
    %243 = arith.mulf %232, %186 : vector<2x128xf32>
    %244 = arith.addf %242, %243 : vector<2x128xf32>
    %245 = vector.extract_strided_slice %215 {offsets = [0, 0], sizes = [2, 256], strides = [1, 1]} : vector<2x384xf32> to vector<2x256xf32>
    %246 = vector.extract_strided_slice %216 {offsets = [0, 0], sizes = [2, 256], strides = [1, 1]} : vector<2x384xf32> to vector<2x256xf32>
    %247 = arith.addf %245, %246 : vector<2x256xf32>
    %248 = arith.negf %247 : vector<2x256xf32>
    %249 = math.exp %248 : vector<2x256xf32>
    %cst_63 = arith.constant 1.000000e+00 : f32
    %250 = vector.broadcast %cst_63 : f32 to vector<2x256xf32>
    %251 = arith.addf %250, %249 : vector<2x256xf32>
    %252 = arith.divf %250, %251 : vector<2x256xf32>
    %253 = vector.extract_strided_slice %252 {offsets = [0, 0], sizes = [2, 128], strides = [1, 1]} : vector<2x256xf32> to vector<2x128xf32>
    %254 = vector.extract_strided_slice %252 {offsets = [0, 128], sizes = [2, 128], strides = [1, 1]} : vector<2x256xf32> to vector<2x128xf32>
    %255 = vector.extract_strided_slice %215 {offsets = [0, 256], sizes = [2, 128], strides = [1, 1]} : vector<2x384xf32> to vector<2x128xf32>
    %256 = vector.extract_strided_slice %216 {offsets = [0, 256], sizes = [2, 128], strides = [1, 1]} : vector<2x384xf32> to vector<2x128xf32>
    %257 = vector.broadcast %3 : vector<1x128xf32> to vector<2x128xf32>
    %258 = arith.addf %256, %257 : vector<2x128xf32>
    %259 = arith.mulf %253, %258 : vector<2x128xf32>
    %260 = arith.addf %255, %259 : vector<2x128xf32>
    %261 = math.tanh %260 : vector<2x128xf32>
    %cst_64 = arith.constant 1.000000e+00 : f32
    %262 = vector.broadcast %cst_64 : f32 to vector<2x128xf32>
    %263 = arith.subf %262, %254 : vector<2x128xf32>
    %264 = arith.mulf %263, %261 : vector<2x128xf32>
    %265 = arith.mulf %254, %208 : vector<2x128xf32>
    %266 = arith.addf %264, %265 : vector<2x128xf32>
    %267 = tpu.concatenate %244, %266 in 1 : vector<2x128xf32>, vector<2x128xf32> -> vector<2x256xf32>
    %c0_65 = arith.constant 0 : index
    %c0_66 = arith.constant 0 : index
    %268 = vector.load %arg4[%c0_65, %c0_66] : memref<256x1152xf32, #tpu.memory_space<vmem>>, vector<256x1152xf32>
    %cst_67 = arith.constant dense<0.000000e+00> : vector<2x1152xf32>
    %269 = tpu.matmul %267, %268, %cst_67 {dimension_numbers = #tpu.dot_dimension_numbers<[1], [0], [0], [1], [0, 0, 1, 1], [], []>} : vector<2x256xf32>, vector<256x1152xf32>, vector<2x1152xf32> -> vector<2x1152xf32>
    %270 = vector.extract_strided_slice %269 {offsets = [0, 0], sizes = [2, 384], strides = [1, 1]} : vector<2x1152xf32> to vector<2x384xf32>
    %271 = vector.extract_strided_slice %269 {offsets = [0, 384], sizes = [2, 384], strides = [1, 1]} : vector<2x1152xf32> to vector<2x384xf32>
    %272 = vector.broadcast %2 : vector<1x384xf32> to vector<2x384xf32>
    %273 = arith.addf %271, %272 : vector<2x384xf32>
    %274 = vector.extract_strided_slice %269 {offsets = [0, 768], sizes = [2, 384], strides = [1, 1]} : vector<2x1152xf32> to vector<2x384xf32>
    %c5 = arith.constant 5 : index
    %c0_68 = arith.constant 0 : index
    %c0_69 = arith.constant 0 : index
    %275 = vector.load %arg0[%c5, %c0_68, %c0_69] : memref<8x2x64xf32, #tpu.memory_space<vmem>>, vector<1x2x64xf32>
    %276 = vector.shape_cast %275 : vector<1x2x64xf32> to vector<2x64xf32>
    %c0_70 = arith.constant 0 : index
    %c0_71 = arith.constant 0 : index
    %277 = vector.load %arg1[%c0_70, %c0_71] : memref<64x384xf32, #tpu.memory_space<vmem>>, vector<64x384xf32>
    %cst_72 = arith.constant dense<0.000000e+00> : vector<2x384xf32>
    %278 = tpu.matmul %276, %277, %cst_72 {dimension_numbers = #tpu.dot_dimension_numbers<[1], [0], [0], [1], [0, 0, 1, 1], [], []>} : vector<2x64xf32>, vector<64x384xf32>, vector<2x384xf32> -> vector<2x384xf32>
    %279 = vector.broadcast %0 : vector<1x384xf32> to vector<2x384xf32>
    %280 = arith.addf %278, %279 : vector<2x384xf32>
    %281 = vector.extract_strided_slice %280 {offsets = [0, 0], sizes = [2, 256], strides = [1, 1]} : vector<2x384xf32> to vector<2x256xf32>
    %282 = vector.extract_strided_slice %270 {offsets = [0, 0], sizes = [2, 256], strides = [1, 1]} : vector<2x384xf32> to vector<2x256xf32>
    %283 = arith.addf %281, %282 : vector<2x256xf32>
    %284 = arith.negf %283 : vector<2x256xf32>
    %285 = math.exp %284 : vector<2x256xf32>
    %cst_73 = arith.constant 1.000000e+00 : f32
    %286 = vector.broadcast %cst_73 : f32 to vector<2x256xf32>
    %287 = arith.addf %286, %285 : vector<2x256xf32>
    %288 = arith.divf %286, %287 : vector<2x256xf32>
    %289 = vector.extract_strided_slice %288 {offsets = [0, 0], sizes = [2, 128], strides = [1, 1]} : vector<2x256xf32> to vector<2x128xf32>
    %290 = vector.extract_strided_slice %288 {offsets = [0, 128], sizes = [2, 128], strides = [1, 1]} : vector<2x256xf32> to vector<2x128xf32>
    %291 = vector.extract_strided_slice %280 {offsets = [0, 256], sizes = [2, 128], strides = [1, 1]} : vector<2x384xf32> to vector<2x128xf32>
    %292 = vector.extract_strided_slice %270 {offsets = [0, 256], sizes = [2, 128], strides = [1, 1]} : vector<2x384xf32> to vector<2x128xf32>
    %293 = vector.broadcast %1 : vector<1x128xf32> to vector<2x128xf32>
    %294 = arith.addf %292, %293 : vector<2x128xf32>
    %295 = arith.mulf %289, %294 : vector<2x128xf32>
    %296 = arith.addf %291, %295 : vector<2x128xf32>
    %297 = math.tanh %296 : vector<2x128xf32>
    %cst_74 = arith.constant 1.000000e+00 : f32
    %298 = vector.broadcast %cst_74 : f32 to vector<2x128xf32>
    %299 = arith.subf %298, %290 : vector<2x128xf32>
    %300 = arith.mulf %299, %297 : vector<2x128xf32>
    %301 = arith.mulf %290, %244 : vector<2x128xf32>
    %302 = arith.addf %300, %301 : vector<2x128xf32>
    %303 = vector.extract_strided_slice %273 {offsets = [0, 0], sizes = [2, 256], strides = [1, 1]} : vector<2x384xf32> to vector<2x256xf32>
    %304 = vector.extract_strided_slice %274 {offsets = [0, 0], sizes = [2, 256], strides = [1, 1]} : vector<2x384xf32> to vector<2x256xf32>
    %305 = arith.addf %303, %304 : vector<2x256xf32>
    %306 = arith.negf %305 : vector<2x256xf32>
    %307 = math.exp %306 : vector<2x256xf32>
    %cst_75 = arith.constant 1.000000e+00 : f32
    %308 = vector.broadcast %cst_75 : f32 to vector<2x256xf32>
    %309 = arith.addf %308, %307 : vector<2x256xf32>
    %310 = arith.divf %308, %309 : vector<2x256xf32>
    %311 = vector.extract_strided_slice %310 {offsets = [0, 0], sizes = [2, 128], strides = [1, 1]} : vector<2x256xf32> to vector<2x128xf32>
    %312 = vector.extract_strided_slice %310 {offsets = [0, 128], sizes = [2, 128], strides = [1, 1]} : vector<2x256xf32> to vector<2x128xf32>
    %313 = vector.extract_strided_slice %273 {offsets = [0, 256], sizes = [2, 128], strides = [1, 1]} : vector<2x384xf32> to vector<2x128xf32>
    %314 = vector.extract_strided_slice %274 {offsets = [0, 256], sizes = [2, 128], strides = [1, 1]} : vector<2x384xf32> to vector<2x128xf32>
    %315 = vector.broadcast %3 : vector<1x128xf32> to vector<2x128xf32>
    %316 = arith.addf %314, %315 : vector<2x128xf32>
    %317 = arith.mulf %311, %316 : vector<2x128xf32>
    %318 = arith.addf %313, %317 : vector<2x128xf32>
    %319 = math.tanh %318 : vector<2x128xf32>
    %cst_76 = arith.constant 1.000000e+00 : f32
    %320 = vector.broadcast %cst_76 : f32 to vector<2x128xf32>
    %321 = arith.subf %320, %312 : vector<2x128xf32>
    %322 = arith.mulf %321, %319 : vector<2x128xf32>
    %323 = arith.mulf %312, %266 : vector<2x128xf32>
    %324 = arith.addf %322, %323 : vector<2x128xf32>
    %325 = tpu.concatenate %302, %324 in 1 : vector<2x128xf32>, vector<2x128xf32> -> vector<2x256xf32>
    %c0_77 = arith.constant 0 : index
    %c0_78 = arith.constant 0 : index
    %326 = vector.load %arg4[%c0_77, %c0_78] : memref<256x1152xf32, #tpu.memory_space<vmem>>, vector<256x1152xf32>
    %cst_79 = arith.constant dense<0.000000e+00> : vector<2x1152xf32>
    %327 = tpu.matmul %325, %326, %cst_79 {dimension_numbers = #tpu.dot_dimension_numbers<[1], [0], [0], [1], [0, 0, 1, 1], [], []>} : vector<2x256xf32>, vector<256x1152xf32>, vector<2x1152xf32> -> vector<2x1152xf32>
    %328 = vector.extract_strided_slice %327 {offsets = [0, 0], sizes = [2, 384], strides = [1, 1]} : vector<2x1152xf32> to vector<2x384xf32>
    %329 = vector.extract_strided_slice %327 {offsets = [0, 384], sizes = [2, 384], strides = [1, 1]} : vector<2x1152xf32> to vector<2x384xf32>
    %330 = vector.broadcast %2 : vector<1x384xf32> to vector<2x384xf32>
    %331 = arith.addf %329, %330 : vector<2x384xf32>
    %332 = vector.extract_strided_slice %327 {offsets = [0, 768], sizes = [2, 384], strides = [1, 1]} : vector<2x1152xf32> to vector<2x384xf32>
    %c6 = arith.constant 6 : index
    %c0_80 = arith.constant 0 : index
    %c0_81 = arith.constant 0 : index
    %333 = vector.load %arg0[%c6, %c0_80, %c0_81] : memref<8x2x64xf32, #tpu.memory_space<vmem>>, vector<1x2x64xf32>
    %334 = vector.shape_cast %333 : vector<1x2x64xf32> to vector<2x64xf32>
    %c0_82 = arith.constant 0 : index
    %c0_83 = arith.constant 0 : index
    %335 = vector.load %arg1[%c0_82, %c0_83] : memref<64x384xf32, #tpu.memory_space<vmem>>, vector<64x384xf32>
    %cst_84 = arith.constant dense<0.000000e+00> : vector<2x384xf32>
    %336 = tpu.matmul %334, %335, %cst_84 {dimension_numbers = #tpu.dot_dimension_numbers<[1], [0], [0], [1], [0, 0, 1, 1], [], []>} : vector<2x64xf32>, vector<64x384xf32>, vector<2x384xf32> -> vector<2x384xf32>
    %337 = vector.broadcast %0 : vector<1x384xf32> to vector<2x384xf32>
    %338 = arith.addf %336, %337 : vector<2x384xf32>
    %339 = vector.extract_strided_slice %338 {offsets = [0, 0], sizes = [2, 256], strides = [1, 1]} : vector<2x384xf32> to vector<2x256xf32>
    %340 = vector.extract_strided_slice %328 {offsets = [0, 0], sizes = [2, 256], strides = [1, 1]} : vector<2x384xf32> to vector<2x256xf32>
    %341 = arith.addf %339, %340 : vector<2x256xf32>
    %342 = arith.negf %341 : vector<2x256xf32>
    %343 = math.exp %342 : vector<2x256xf32>
    %cst_85 = arith.constant 1.000000e+00 : f32
    %344 = vector.broadcast %cst_85 : f32 to vector<2x256xf32>
    %345 = arith.addf %344, %343 : vector<2x256xf32>
    %346 = arith.divf %344, %345 : vector<2x256xf32>
    %347 = vector.extract_strided_slice %346 {offsets = [0, 0], sizes = [2, 128], strides = [1, 1]} : vector<2x256xf32> to vector<2x128xf32>
    %348 = vector.extract_strided_slice %346 {offsets = [0, 128], sizes = [2, 128], strides = [1, 1]} : vector<2x256xf32> to vector<2x128xf32>
    %349 = vector.extract_strided_slice %338 {offsets = [0, 256], sizes = [2, 128], strides = [1, 1]} : vector<2x384xf32> to vector<2x128xf32>
    %350 = vector.extract_strided_slice %328 {offsets = [0, 256], sizes = [2, 128], strides = [1, 1]} : vector<2x384xf32> to vector<2x128xf32>
    %351 = vector.broadcast %1 : vector<1x128xf32> to vector<2x128xf32>
    %352 = arith.addf %350, %351 : vector<2x128xf32>
    %353 = arith.mulf %347, %352 : vector<2x128xf32>
    %354 = arith.addf %349, %353 : vector<2x128xf32>
    %355 = math.tanh %354 : vector<2x128xf32>
    %cst_86 = arith.constant 1.000000e+00 : f32
    %356 = vector.broadcast %cst_86 : f32 to vector<2x128xf32>
    %357 = arith.subf %356, %348 : vector<2x128xf32>
    %358 = arith.mulf %357, %355 : vector<2x128xf32>
    %359 = arith.mulf %348, %302 : vector<2x128xf32>
    %360 = arith.addf %358, %359 : vector<2x128xf32>
    %361 = vector.extract_strided_slice %331 {offsets = [0, 0], sizes = [2, 256], strides = [1, 1]} : vector<2x384xf32> to vector<2x256xf32>
    %362 = vector.extract_strided_slice %332 {offsets = [0, 0], sizes = [2, 256], strides = [1, 1]} : vector<2x384xf32> to vector<2x256xf32>
    %363 = arith.addf %361, %362 : vector<2x256xf32>
    %364 = arith.negf %363 : vector<2x256xf32>
    %365 = math.exp %364 : vector<2x256xf32>
    %cst_87 = arith.constant 1.000000e+00 : f32
    %366 = vector.broadcast %cst_87 : f32 to vector<2x256xf32>
    %367 = arith.addf %366, %365 : vector<2x256xf32>
    %368 = arith.divf %366, %367 : vector<2x256xf32>
    %369 = vector.extract_strided_slice %368 {offsets = [0, 0], sizes = [2, 128], strides = [1, 1]} : vector<2x256xf32> to vector<2x128xf32>
    %370 = vector.extract_strided_slice %368 {offsets = [0, 128], sizes = [2, 128], strides = [1, 1]} : vector<2x256xf32> to vector<2x128xf32>
    %371 = vector.extract_strided_slice %331 {offsets = [0, 256], sizes = [2, 128], strides = [1, 1]} : vector<2x384xf32> to vector<2x128xf32>
    %372 = vector.extract_strided_slice %332 {offsets = [0, 256], sizes = [2, 128], strides = [1, 1]} : vector<2x384xf32> to vector<2x128xf32>
    %373 = vector.broadcast %3 : vector<1x128xf32> to vector<2x128xf32>
    %374 = arith.addf %372, %373 : vector<2x128xf32>
    %375 = arith.mulf %369, %374 : vector<2x128xf32>
    %376 = arith.addf %371, %375 : vector<2x128xf32>
    %377 = math.tanh %376 : vector<2x128xf32>
    %cst_88 = arith.constant 1.000000e+00 : f32
    %378 = vector.broadcast %cst_88 : f32 to vector<2x128xf32>
    %379 = arith.subf %378, %370 : vector<2x128xf32>
    %380 = arith.mulf %379, %377 : vector<2x128xf32>
    %381 = arith.mulf %370, %324 : vector<2x128xf32>
    %382 = arith.addf %380, %381 : vector<2x128xf32>
    %383 = tpu.concatenate %360, %382 in 1 : vector<2x128xf32>, vector<2x128xf32> -> vector<2x256xf32>
    %c0_89 = arith.constant 0 : index
    %c0_90 = arith.constant 0 : index
    %384 = vector.load %arg4[%c0_89, %c0_90] : memref<256x1152xf32, #tpu.memory_space<vmem>>, vector<256x1152xf32>
    %cst_91 = arith.constant dense<0.000000e+00> : vector<2x1152xf32>
    %385 = tpu.matmul %383, %384, %cst_91 {dimension_numbers = #tpu.dot_dimension_numbers<[1], [0], [0], [1], [0, 0, 1, 1], [], []>} : vector<2x256xf32>, vector<256x1152xf32>, vector<2x1152xf32> -> vector<2x1152xf32>
    %386 = vector.extract_strided_slice %385 {offsets = [0, 0], sizes = [2, 384], strides = [1, 1]} : vector<2x1152xf32> to vector<2x384xf32>
    %387 = vector.extract_strided_slice %385 {offsets = [0, 384], sizes = [2, 384], strides = [1, 1]} : vector<2x1152xf32> to vector<2x384xf32>
    %388 = vector.broadcast %2 : vector<1x384xf32> to vector<2x384xf32>
    %389 = arith.addf %387, %388 : vector<2x384xf32>
    %390 = vector.extract_strided_slice %385 {offsets = [0, 768], sizes = [2, 384], strides = [1, 1]} : vector<2x1152xf32> to vector<2x384xf32>
    %c7 = arith.constant 7 : index
    %c0_92 = arith.constant 0 : index
    %c0_93 = arith.constant 0 : index
    %391 = vector.load %arg0[%c7, %c0_92, %c0_93] : memref<8x2x64xf32, #tpu.memory_space<vmem>>, vector<1x2x64xf32>
    %392 = vector.shape_cast %391 : vector<1x2x64xf32> to vector<2x64xf32>
    %c0_94 = arith.constant 0 : index
    %c0_95 = arith.constant 0 : index
    %393 = vector.load %arg1[%c0_94, %c0_95] : memref<64x384xf32, #tpu.memory_space<vmem>>, vector<64x384xf32>
    %cst_96 = arith.constant dense<0.000000e+00> : vector<2x384xf32>
    %394 = tpu.matmul %392, %393, %cst_96 {dimension_numbers = #tpu.dot_dimension_numbers<[1], [0], [0], [1], [0, 0, 1, 1], [], []>} : vector<2x64xf32>, vector<64x384xf32>, vector<2x384xf32> -> vector<2x384xf32>
    %395 = vector.broadcast %0 : vector<1x384xf32> to vector<2x384xf32>
    %396 = arith.addf %394, %395 : vector<2x384xf32>
    %397 = vector.extract_strided_slice %396 {offsets = [0, 0], sizes = [2, 256], strides = [1, 1]} : vector<2x384xf32> to vector<2x256xf32>
    %398 = vector.extract_strided_slice %386 {offsets = [0, 0], sizes = [2, 256], strides = [1, 1]} : vector<2x384xf32> to vector<2x256xf32>
    %399 = arith.addf %397, %398 : vector<2x256xf32>
    %400 = arith.negf %399 : vector<2x256xf32>
    %401 = math.exp %400 : vector<2x256xf32>
    %cst_97 = arith.constant 1.000000e+00 : f32
    %402 = vector.broadcast %cst_97 : f32 to vector<2x256xf32>
    %403 = arith.addf %402, %401 : vector<2x256xf32>
    %404 = arith.divf %402, %403 : vector<2x256xf32>
    %405 = vector.extract_strided_slice %404 {offsets = [0, 0], sizes = [2, 128], strides = [1, 1]} : vector<2x256xf32> to vector<2x128xf32>
    %406 = vector.extract_strided_slice %404 {offsets = [0, 128], sizes = [2, 128], strides = [1, 1]} : vector<2x256xf32> to vector<2x128xf32>
    %407 = vector.extract_strided_slice %396 {offsets = [0, 256], sizes = [2, 128], strides = [1, 1]} : vector<2x384xf32> to vector<2x128xf32>
    %408 = vector.extract_strided_slice %386 {offsets = [0, 256], sizes = [2, 128], strides = [1, 1]} : vector<2x384xf32> to vector<2x128xf32>
    %409 = vector.broadcast %1 : vector<1x128xf32> to vector<2x128xf32>
    %410 = arith.addf %408, %409 : vector<2x128xf32>
    %411 = arith.mulf %405, %410 : vector<2x128xf32>
    %412 = arith.addf %407, %411 : vector<2x128xf32>
    %413 = math.tanh %412 : vector<2x128xf32>
    %cst_98 = arith.constant 1.000000e+00 : f32
    %414 = vector.broadcast %cst_98 : f32 to vector<2x128xf32>
    %415 = arith.subf %414, %406 : vector<2x128xf32>
    %416 = arith.mulf %415, %413 : vector<2x128xf32>
    %417 = arith.mulf %406, %360 : vector<2x128xf32>
    %418 = arith.addf %416, %417 : vector<2x128xf32>
    %419 = vector.extract_strided_slice %389 {offsets = [0, 0], sizes = [2, 256], strides = [1, 1]} : vector<2x384xf32> to vector<2x256xf32>
    %420 = vector.extract_strided_slice %390 {offsets = [0, 0], sizes = [2, 256], strides = [1, 1]} : vector<2x384xf32> to vector<2x256xf32>
    %421 = arith.addf %419, %420 : vector<2x256xf32>
    %422 = arith.negf %421 : vector<2x256xf32>
    %423 = math.exp %422 : vector<2x256xf32>
    %cst_99 = arith.constant 1.000000e+00 : f32
    %424 = vector.broadcast %cst_99 : f32 to vector<2x256xf32>
    %425 = arith.addf %424, %423 : vector<2x256xf32>
    %426 = arith.divf %424, %425 : vector<2x256xf32>
    %427 = vector.extract_strided_slice %426 {offsets = [0, 0], sizes = [2, 128], strides = [1, 1]} : vector<2x256xf32> to vector<2x128xf32>
    %428 = vector.extract_strided_slice %426 {offsets = [0, 128], sizes = [2, 128], strides = [1, 1]} : vector<2x256xf32> to vector<2x128xf32>
    %429 = vector.extract_strided_slice %389 {offsets = [0, 256], sizes = [2, 128], strides = [1, 1]} : vector<2x384xf32> to vector<2x128xf32>
    %430 = vector.extract_strided_slice %390 {offsets = [0, 256], sizes = [2, 128], strides = [1, 1]} : vector<2x384xf32> to vector<2x128xf32>
    %431 = vector.broadcast %3 : vector<1x128xf32> to vector<2x128xf32>
    %432 = arith.addf %430, %431 : vector<2x128xf32>
    %433 = arith.mulf %427, %432 : vector<2x128xf32>
    %434 = arith.addf %429, %433 : vector<2x128xf32>
    %435 = math.tanh %434 : vector<2x128xf32>
    %cst_100 = arith.constant 1.000000e+00 : f32
    %436 = vector.broadcast %cst_100 : f32 to vector<2x128xf32>
    %437 = arith.subf %436, %428 : vector<2x128xf32>
    %438 = arith.mulf %437, %435 : vector<2x128xf32>
    %439 = arith.mulf %428, %382 : vector<2x128xf32>
    %440 = arith.addf %438, %439 : vector<2x128xf32>
    %441 = tpu.concatenate %418, %440 in 1 : vector<2x128xf32>, vector<2x128xf32> -> vector<2x256xf32>
    %c0_101 = arith.constant 0 : index
    %c0_102 = arith.constant 0 : index
    %442 = vector.load %arg4[%c0_101, %c0_102] : memref<256x1152xf32, #tpu.memory_space<vmem>>, vector<256x1152xf32>
    %cst_103 = arith.constant dense<0.000000e+00> : vector<2x1152xf32>
    %443 = tpu.matmul %441, %442, %cst_103 {dimension_numbers = #tpu.dot_dimension_numbers<[1], [0], [0], [1], [0, 0, 1, 1], [], []>} : vector<2x256xf32>, vector<256x1152xf32>, vector<2x1152xf32> -> vector<2x1152xf32>
    %444 = vector.extract_strided_slice %443 {offsets = [0, 384], sizes = [2, 384], strides = [1, 1]} : vector<2x1152xf32> to vector<2x384xf32>
    %445 = vector.broadcast %2 : vector<1x384xf32> to vector<2x384xf32>
    %446 = arith.addf %444, %445 : vector<2x384xf32>
    %447 = vector.extract_strided_slice %443 {offsets = [0, 768], sizes = [2, 384], strides = [1, 1]} : vector<2x1152xf32> to vector<2x384xf32>
    %448 = vector.extract_strided_slice %446 {offsets = [0, 0], sizes = [2, 256], strides = [1, 1]} : vector<2x384xf32> to vector<2x256xf32>
    %449 = vector.extract_strided_slice %447 {offsets = [0, 0], sizes = [2, 256], strides = [1, 1]} : vector<2x384xf32> to vector<2x256xf32>
    %450 = arith.addf %448, %449 : vector<2x256xf32>
    %451 = arith.negf %450 : vector<2x256xf32>
    %452 = math.exp %451 : vector<2x256xf32>
    %cst_104 = arith.constant 1.000000e+00 : f32
    %453 = vector.broadcast %cst_104 : f32 to vector<2x256xf32>
    %454 = arith.addf %453, %452 : vector<2x256xf32>
    %455 = arith.divf %453, %454 : vector<2x256xf32>
    %456 = vector.extract_strided_slice %455 {offsets = [0, 0], sizes = [2, 128], strides = [1, 1]} : vector<2x256xf32> to vector<2x128xf32>
    %457 = vector.extract_strided_slice %455 {offsets = [0, 128], sizes = [2, 128], strides = [1, 1]} : vector<2x256xf32> to vector<2x128xf32>
    %458 = vector.extract_strided_slice %446 {offsets = [0, 256], sizes = [2, 128], strides = [1, 1]} : vector<2x384xf32> to vector<2x128xf32>
    %459 = vector.extract_strided_slice %447 {offsets = [0, 256], sizes = [2, 128], strides = [1, 1]} : vector<2x384xf32> to vector<2x128xf32>
    %460 = vector.broadcast %3 : vector<1x128xf32> to vector<2x128xf32>
    %461 = arith.addf %459, %460 : vector<2x128xf32>
    %462 = arith.mulf %456, %461 : vector<2x128xf32>
    %463 = arith.addf %458, %462 : vector<2x128xf32>
    %464 = math.tanh %463 : vector<2x128xf32>
    %cst_105 = arith.constant 1.000000e+00 : f32
    %465 = vector.broadcast %cst_105 : f32 to vector<2x128xf32>
    %466 = arith.subf %465, %457 : vector<2x128xf32>
    %467 = arith.mulf %466, %464 : vector<2x128xf32>
    %468 = arith.mulf %457, %440 : vector<2x128xf32>
    %469 = arith.addf %467, %468 : vector<2x128xf32>
    %cst_106 = arith.constant 0.000000e+00 : f32
    %470 = vector.broadcast %cst_106 : f32 to vector<2x128xf32>
    %471 = arith.maximumf %469, %470 : vector<2x128xf32>
    %c0_107 = arith.constant 0 : index
    %c0_108 = arith.constant 0 : index
    %472 = vector.load %arg7[%c0_107, %c0_108] : memref<128x16xf32, #tpu.memory_space<vmem>>, vector<128x16xf32>
    %cst_109 = arith.constant dense<0.000000e+00> : vector<2x16xf32>
    %473 = tpu.matmul %471, %472, %cst_109 {dimension_numbers = #tpu.dot_dimension_numbers<[1], [0], [0], [1], [0, 0, 1, 1], [], []>} : vector<2x128xf32>, vector<128x16xf32>, vector<2x16xf32> -> vector<2x16xf32>
    %c0_110 = arith.constant 0 : index
    %c0_111 = arith.constant 0 : index
    %474 = vector.load %arg8[%c0_110, %c0_111] : memref<1x16xf32, #tpu.memory_space<vmem>>, vector<1x16xf32>
    %475 = vector.broadcast %474 : vector<1x16xf32> to vector<2x16xf32>
    %476 = arith.addf %473, %475 : vector<2x16xf32>
    %cst_112 = arith.constant 0.000000e+00 : f32
    %477 = vector.broadcast %cst_112 : f32 to vector<2x16xf32>
    %478 = arith.maximumf %476, %477 : vector<2x16xf32>
    %c0_113 = arith.constant 0 : index
    %c0_114 = arith.constant 0 : index
    %479 = vector.load %arg9[%c0_113, %c0_114] : memref<16x1xf32, #tpu.memory_space<vmem>>, vector<16x1xf32>
    %cst_115 = arith.constant dense<0.000000e+00> : vector<2x1xf32>
    %480 = tpu.matmul %478, %479, %cst_115 {dimension_numbers = #tpu.dot_dimension_numbers<[1], [0], [0], [1], [0, 0, 1, 1], [], []>} : vector<2x16xf32>, vector<16x1xf32>, vector<2x1xf32> -> vector<2x1xf32>
    %c0_116 = arith.constant 0 : index
    %c0_117 = arith.constant 0 : index
    %481 = vector.load %arg10[%c0_116, %c0_117] : memref<1x1xf32, #tpu.memory_space<vmem>>, vector<1x1xf32>
    %482 = vector.broadcast %481 : vector<1x1xf32> to vector<2x1xf32>
    %483 = arith.addf %480, %482 : vector<2x1xf32>
    %c0_118 = arith.constant 0 : index
    %c0_119 = arith.constant 0 : index
    %484 = vector.load %arg11[%c0_118, %c0_119] : memref<2x1xf32, #tpu.memory_space<vmem>>, vector<2x1xf32>
    tpu.vector_store %arg11[%c0_118, %c0_119], %483 {strides = array<i32>} : memref<2x1xf32, #tpu.memory_space<vmem>>, vector<2x1xf32>,
    return
  }
}

</mosaic_0001>

<bundles_post_ra>
// kernel: gru_model_forward.1
= control target key start
LH: loop header
LB: loop body
LE: loop exit
PB: predicated region body
PF: predicated region fallthrough
CT: control target
= control target key end

     0   :  { %v11158_v3 = vmov 0.0   ;;  %vm85_vm0 = vcmask 523264   ;;  %v11156_v48 = vmov 0.0|0.0   ;;  %vm8202_vm1 = vmmov 0   ;;  %s11144_s1 = inlined_call_operand.vmem [shape: f32[64,384], index: 1, kind: input, shape index: {}]   ;;  %s11145_s4 = inlined_call_operand.vmem [shape: f32[256,1152], index: 4, kind: input, shape index: {}]   ;;  %s11146_s0 = inlined_call_operand.vmem [shape: f32[8,2,64], index: 0, kind: input, shape index: {}]   ;;  %s11147_s2 = inlined_call_operand.vmem [shape: f32[1,384], index: 2, kind: input, shape index: {}]   ;;  %s11148_s3 = inlined_call_operand.vmem [shape: f32[1,128], index: 3, kind: input, shape index: {}]   ;;  %s11149_s5 = inlined_call_operand.vmem [shape: f32[1,384], index: 5, kind: input, shape index: {}]   ;;  %s11150_s6 = inlined_call_operand.vmem [shape: f32[1,128], index: 6, kind: input, shape index: {}]   ;;  %s11151_s7 = inlined_call_operand.vmem [shape: f32[128,16], index: 7, kind: input, shape index: {}]   ;;  %s11152_s9 = inlined_call_operand.vmem [shape: f32[16,1], index: 9, kind: input, shape index: {}]   ;;  %s11153_s10 = inlined_call_operand.<no memory space> [shape: f32[1,1], index: 10, kind: input, shape index: {}]   ;;  %s11154_s8 = inlined_call_operand.vmem [shape: f32[1,16], index: 8, kind: input, shape index: {}]   ;;  %s11155_s11 = inlined_call_operand.vmem [shape: f32[2,1], index: 11, kind: output, shape index: {}]  }
   0x1   :  { %v46_v0 = vld [vmem:[%s11144_s1 + $0x8] sm:$0xff]  ;;  %v49_v1 = vld [vmem:[%s11144_s1 + $0x20] sm:$0xff]  ;;  %153 = vmatprep.mubr.f32.mxu1 %v11158_v3  ;;  %610 = vmatprep.mubr.f32.mxu0 %v11158_v3  ;;  %v48_v5 = vld [vmem:[%s11144_s1 + $0x18] sm:$0xff]  ;;  %vm4808_vm2 = vcmask 130048   ;;  %vm4882_vm3 = vcmask 1024  }
   0x2   :  { %v45_v2 = vld [vmem:[%s11144_s1] sm:$0xff]  ;;  %v8274_v4 = vpack.c.bf16 %v49_v1, %v46_v0  ;;  %v52_v6 = vld [vmem:[%s11144_s1 + $0x38] sm:$0xff]  ;;  %v55_v7 = vld [vmem:[%s11144_s1 + $0x50] sm:$0xff] }
   0x3   :  { %v8285_v8 = vpack.c.bf16 %v48_v5, %v45_v2  ;;  %v8287_v9 = vpack.c.bf16 %v55_v7, %v52_v6  ;;  %v51_v10 = vld [vmem:[%s11144_s1 + $0x30] sm:$0xff]  ;;  %v54_v11 = vld [vmem:[%s11144_s1 + $0x48] sm:$0xff]  ;;  %v61_v13 = vld [vmem:[%s11144_s1 + $0x80] sm:$0xff] }
   0x4   :  { %11530 = vst [vmem:[#allocation3_spill] sm:$0xff] %v8274_v4  ;;  %v58_v12 = vld [vmem:[%s11144_s1 + $0x68] sm:$0xff]  ;;  %5515 = vmatprep.subr.bf16.mxu1 %v8274_v4  ;;  %v8303_v14 = vpack.c.bf16 %v54_v11, %v51_v10  ;;  %v57_v16 = vld [vmem:[%s11144_s1 + $0x60] sm:$0xff]  ;;  %v60_v17 = vld [vmem:[%s11144_s1 + $0x78] sm:$0xff] }
   0x5   :  { %11531 = vst [vmem:[#allocation4_spill] sm:$0xff] %v8285_v8  ;;  %11532 = vst [vmem:[#allocation5_spill] sm:$0xff] %v8287_v9  ;;  %5517 = vmatpush1.bf16.msra.mxu1 %v8285_v8  ;;  %v8306_v15 = vpack.c.bf16 %v61_v13, %v58_v12  ;;  %v64_v18 = vld [vmem:[%s11144_s1 + $0x98] sm:$0xff]  ;;  %v67_v19 = vld [vmem:[%s11144_s1 + $0xb0] sm:$0xff]  ;;  %v8321_v20 = vpack.c.bf16 %v60_v17, %v57_v16 }
   0x6   :  { %11533 = vst [vmem:[#allocation6_spill] sm:$0xff] %v8303_v14  ;;  %5519 = vmatprep.subr.bf16.mxu1 %v8287_v9  ;;  %v259_v21 = vld [vmem:[%s11145_s4 + $0x8] sm:$0xff]  ;;  %v268_v22 = vld [vmem:[%s11145_s4 + $0x50] sm:$0xff]  ;;  %v8330_v23 = vpack.c.bf16 %v67_v19, %v64_v18  ;;  %v258_v27 = vld [vmem:[%s11145_s4] sm:$0xff] }
   0x7   :  { %11534 = vst [vmem:[#allocation7_spill] sm:$0xff] %v8306_v15  ;;  %11535 = vst [vmem:[#allocation8_spill] sm:$0xff] %v8321_v20  ;;  %v63_v24 = vld [vmem:[%s11144_s1 + $0x90] sm:$0xff]  ;;  %v66_v25 = vld [vmem:[%s11144_s1 + $0xa8] sm:$0xff]  ;;  %v8338_v26 = vpack.c.bf16 %v268_v22, %v259_v21 }
   0x8   :  { %11536 = vst [vmem:[#allocation9_spill] sm:$0xff] %v8330_v23  ;;  %v267_v28 = vld [vmem:[%s11145_s4 + $0x48] sm:$0xff]  ;;  %v277_v30 = vld [vmem:[%s11145_s4 + $0x98] sm:$0xff]  ;;  %v286_v31 = vld [vmem:[%s11145_s4 + $0xe0] sm:$0xff]  ;;  %v8356_v32 = vpack.c.bf16 %v66_v25, %v63_v24 }
   0x9   :  { %5521 = vmatpush1.bf16.msra.mxu1 %v8303_v14  ;;  %11537 = vst [vmem:[#allocation10_spill] sm:$0xff] %v8338_v26  ;;  %5543 = vmatprep.subr.bf16.mxu0 %v8338_v26  ;;  %v8347_v29 = vpack.c.bf16 %v267_v28, %v258_v27  ;;  %v8358_v33 = vpack.c.bf16 %v286_v31, %v277_v30  ;;  %v276_v34 = vld [vmem:[%s11145_s4 + $0x90] sm:$0xff]  ;;  %v285_v35 = vld [vmem:[%s11145_s4 + $0xd8] sm:$0xff]  ;;  %v50_v37 = vld [vmem:[%s11144_s1 + $0x28] sm:$0xff] }
   0xa   :  { %5523 = vmatprep.subr.bf16.mxu1 %v8306_v15  ;;  %11539 = vst [vmem:[#allocation12_spill] sm:$0xff] %v8356_v32  ;;  %v47_v36 = vld [vmem:[%s11144_s1 + $0x10] sm:$0xff]  ;;  %v8374_v38 = vpack.c.bf16 %v285_v35, %v276_v34  ;;  %v295_v39 = vld [vmem:[%s11145_s4 + $0x128] sm:$0xff]  ;;  %v294_v42 = vld [vmem:[%s11145_s4 + $0x120] sm:$0xff] }
   0xb   :  { %11538 = vst [vmem:[#allocation11_spill] sm:$0xff] %v8347_v29  ;;  %11540 = vst [vmem:[#allocation13_spill] sm:$0xff] %v8358_v33  ;;  %5545 = vmatpush1.bf16.msra.mxu0 %v8347_v29  ;;  %v304_v40 = vld [vmem:[%s11145_s4 + $0x170] sm:$0xff]  ;;  %v303_v43 = vld [vmem:[%s11145_s4 + $0x168] sm:$0xff]  ;;  %v8395_v45 = vpack.c.bf16 %v50_v37, %v47_v36 }
   0xc   :  { %11541 = vst [vmem:[#allocation14_spill] sm:$0xff] %v8374_v38  ;;  %5547 = vmatprep.subr.bf16.mxu0 %v8358_v33  ;;  %v8383_v41 = vpack.c.bf16 %v304_v40, %v295_v39  ;;  %v44_v44 = vld [vmem:[%s11146_s0] sm:$0x3]  ;;  %v313_v46 = vld [vmem:[%s11145_s4 + $0x1b8] sm:$0xff]  ;;  %v8411_v51 = vpack.c.bf16 %v303_v43, %v294_v42  ;;  %v312_v53 = vld [vmem:[%s11145_s4 + $0x1b0] sm:$0xff] }
   0xd   :  { %5525 = vmatpush1.bf16.msra.mxu1 %v8321_v20  ;;  %11543 = vst [vmem:[#allocation16_spill] sm:$0xff] %v8395_v45  ;;  %v322_v47 = vld [vmem:[%s11145_s4 + $0x200] sm:$0xff]  ;;  %v56_v50 = vld [vmem:[%s11144_s1 + $0x58] sm:$0xff]  ;;  %v331_v55 = vld [vmem:[%s11145_s4 + $0x248] sm:$0xff] }
   0xe   :  { %5527 = vmatprep.subr.bf16.mxu1 %v8330_v23  ;;  %11542 = vst [vmem:[#allocation15_spill] sm:$0xff] %v8383_v41  ;;  %v53_v49 = vld [vmem:[%s11144_s1 + $0x40] sm:$0xff]  ;;  %11544 = vst [vmem:[#allocation17_spill] sm:$0xff] %v8411_v51  ;;  %v8414_v52 = vpack.c.bf16 %v322_v47, %v313_v46  ;;  %v321_v54 = vld [vmem:[%s11145_s4 + $0x1f8] sm:$0xff] }
   0xf   :  { %5549 = vmatpush1.bf16.msra.mxu0 %v8374_v38  ;;  %v340_v56 = vld [vmem:[%s11145_s4 + $0x290] sm:$0xff]  ;;  %v8430_v57 = vpack.c.bf16 %v56_v50, %v53_v49  ;;  %v62_v59 = vld [vmem:[%s11144_s1 + $0x88] sm:$0xff]  ;;  %v8442_v60 = vpack.c.bf16 %v321_v54, %v312_v53  ;;  %v65_v63 = vld [vmem:[%s11144_s1 + $0xa0] sm:$0xff] }
  0x10   :  { %5551 = vmatprep.subr.bf16.mxu0 %v8383_v41  ;;  %11545 = vst [vmem:[#allocation18_spill] sm:$0xff] %v8414_v52  ;;  %v59_v58 = vld [vmem:[%s11144_s1 + $0x70] sm:$0xff]  ;;  %v8445_v61 = vpack.c.bf16 %v340_v56, %v331_v55  ;;  %v68_v0 = vld [vmem:[%s11144_s1 + $0xb8] sm:$0xff]  ;;  %v270_v2 = vld [vmem:[%s11145_s4 + $0x60] sm:$0xff] }
  0x11   :  { %5529 = vmatpush1.bf16.msra.mxu1 %v8356_v32  ;;  %11546 = vst [vmem:[#allocation19_spill] sm:$0xff] %v8430_v57  ;;  %11547 = vst [vmem:[#allocation20_spill] sm:$0xff] %v8442_v60  ;;  %v8448_v62 = vpack.c.bf16 %v62_v59, %v59_v58  ;;  %v261_v1 = vld [vmem:[%s11145_s4 + $0x18] sm:$0xff]  ;;  %v8466_v5 = vpack.c.bf16 %v68_v0, %v65_v63  ;;  %v260_v7 = vld [vmem:[%s11145_s4 + $0x10] sm:$0xff] }
  0x12   :  { %5530 = vmatprep.subr.bf16.mxu1 %v11156_v48  ;;  %11548 = vst [vmem:[#allocation21_spill] sm:$0xff] %v8445_v61  ;;  %v8469_v6 = vpack.c.bf16 %v270_v2, %v261_v1  ;;  %v269_v10 = vld [vmem:[%s11145_s4 + $0x58] sm:$0xff]  ;;  %v279_v11 = vld [vmem:[%s11145_s4 + $0xa8] sm:$0xff]  ;;  %v288_v12 = vld [vmem:[%s11145_s4 + $0xf0] sm:$0xff] }
  0x13   :  { %5553 = vmatpush1.bf16.msra.mxu0 %v8411_v51  ;;  %11549 = vst [vmem:[#allocation22_spill] sm:$0xff] %v8448_v62  ;;  %11550 = vst [vmem:[#allocation23_spill] sm:$0xff] %v8466_v5  ;;  %v8484_v13 = vpack.c.bf16 %v269_v10, %v260_v7  ;;  %v8487_v16 = vpack.c.bf16 %v288_v12, %v279_v11  ;;  %v278_v17 = vld [vmem:[%s11145_s4 + $0xa0] sm:$0xff]  ;;  %v287_v18 = vld [vmem:[%s11145_s4 + $0xe8] sm:$0xff] }
  0x14   :  { %4888 = vmatmul.mubr.msk.f32.vlgmr.msra.gmra.mrb[0].mxu1 %vm85_vm0, %v44_v44  ;;  %5555 = vmatprep.subr.bf16.mxu0 %v8414_v52  ;;  %11551 = vst [vmem:[#allocation24_spill] sm:$0xff] %v8469_v6  ;;  %v297_v19 = vld [vmem:[%s11145_s4 + $0x138] sm:$0xff]  ;;  %v306_v21 = vld [vmem:[%s11145_s4 + $0x180] sm:$0xff]  ;;  %v8503_v22 = vpack.c.bf16 %v287_v18, %v278_v17  ;;  %v296_v25 = vld [vmem:[%s11145_s4 + $0x130] sm:$0xff] }
  0x15   :  { %5532 = vmatpush3.bf16.msra.mxu1 %v8395_v45  ;;  %5336 = vmatprep.mubr.msk.f32.mxu1 %vm8202_vm1, %v11158_v3  ;;  %11552 = vst [vmem:[#allocation25_spill] sm:$0xff] %v8484_v13  ;;  %11553 = vst [vmem:[#allocation26_spill] sm:$0xff] %v8487_v16  ;;  %v8507_v24 = vpack.c.bf16 %v306_v21, %v297_v19  ;;  %v305_v27 = vld [vmem:[%s11145_s4 + $0x178] sm:$0xff]  ;;  %v315_v28 = vld [vmem:[%s11145_s4 + $0x1c8] sm:$0xff] }
  0x16   :  { %5533 = vmatprep.subr.bf16.mxu1 %v11156_v48  ;;  %11554 = vst [vmem:[#allocation27_spill] sm:$0xff] %v8503_v22  ;;  %v324_v30 = vld [vmem:[%s11145_s4 + $0x210] sm:$0xff]  ;;  %v8522_v31 = vpack.c.bf16 %v305_v27, %v296_v25  ;;  %v314_v35 = vld [vmem:[%s11145_s4 + $0x1c0] sm:$0xff]  ;;  %v323_v36 = vld [vmem:[%s11145_s4 + $0x208] sm:$0xff] }
  0x17   :  { %5557 = vmatpush1.bf16.msra.mxu0 %v8442_v60  ;;  %11555 = vst [vmem:[#allocation28_spill] sm:$0xff] %v8507_v24  ;;  %v8525_v34 = vpack.c.bf16 %v324_v30, %v315_v28  ;;  %v333_v37 = vld [vmem:[%s11145_s4 + $0x258] sm:$0xff]  ;;  %v342_v39 = vld [vmem:[%s11145_s4 + $0x2a0] sm:$0xff]  ;;  %v8540_v40 = vpack.c.bf16 %v323_v36, %v314_v35  ;;  %v332_v46 = vld [vmem:[%s11145_s4 + $0x250] sm:$0xff] }
  0x18   :  { %5559 = vmatprep.subr.bf16.mxu0 %v8445_v61  ;;  %11556 = vst [vmem:[#allocation29_spill] sm:$0xff] %v8522_v31  ;;  %v8543_v42 = vpack.c.bf16 %v342_v39, %v333_v37  ;;  %v330_v43 = vld [vmem:[%s11145_s4 + $0x240] sm:$0xff]  ;;  %v341_v49 = vld [vmem:[%s11145_s4 + $0x298] sm:$0xff]  ;;  %v351_v55 = vld [vmem:[%s11145_s4 + $0x2e8] sm:$0xff] }
  0x19   :  { %5535 = vmatpush3.bf16.msra.mxu1 %v8430_v57  ;;  %11557 = vst [vmem:[#allocation30_spill] sm:$0xff] %v8525_v34  ;;  %11558 = vst [vmem:[#allocation31_spill] sm:$0xff] %v8540_v40  ;;  %v8561_v50 = vpack.c.bf16 %v341_v49, %v332_v46  ;;  %v349_v53 = vld [vmem:[%s11145_s4 + $0x2d8] sm:$0xff]  ;;  %v358_v54 = vld [vmem:[%s11145_s4 + $0x320] sm:$0xff] }
  0x1a   :  { %5536 = vmatprep.subr.bf16.mxu1 %v11156_v48  ;;  %11559 = vst [vmem:[#allocation32_spill] sm:$0xff] %v8543_v42  ;;  %v8574_v56 = vpack.c.bf16 %v358_v54, %v349_v53  ;;  %v360_v58 = vld [vmem:[%s11145_s4 + $0x330] sm:$0xff]  ;;  %v357_v63 = vld [vmem:[%s11145_s4 + $0x318] sm:$0xff]  ;;  %v350_v2 = vld [vmem:[%s11145_s4 + $0x2e0] sm:$0xff] }
  0x1b   :  { %11561 = vst [vmem:[#allocation34_spill] sm:$0xff] %v8561_v50  ;;  %v348_v59 = vld [vmem:[%s11145_s4 + $0x2d0] sm:$0xff]  ;;  %v8585_v0 = vpack.c.bf16 %v360_v58, %v351_v55  ;;  %v359_v7 = vld [vmem:[%s11145_s4 + $0x328] sm:$0xff]  ;;  %v369_v17 = vld [vmem:[%s11145_s4 + $0x378] sm:$0xff] }
  0x1c   :  { %11562 = vst [vmem:[#allocation35_spill] sm:$0xff] %v8574_v56  ;;  %v8587_v1 = vpack.c.bf16 %v357_v63, %v348_v59  ;;  %v8596_v10 = vpack.c.bf16 %v359_v7, %v350_v2  ;;  %v367_v11 = vld [vmem:[%s11145_s4 + $0x368] sm:$0xff]  ;;  %v376_v12 = vld [vmem:[%s11145_s4 + $0x3b0] sm:$0xff]  ;;  %v378_v19 = vld [vmem:[%s11145_s4 + $0x3c0] sm:$0xff] }
  0x1d   :  { %5538 = vmatpush3.bf16.msra.mxu1 %v8448_v62  ;;  %11563 = vst [vmem:[#allocation36_spill] sm:$0xff] %v8585_v0  ;;  %v8610_v18 = vpack.c.bf16 %v376_v12, %v367_v11  ;;  %v366_v21 = vld [vmem:[%s11145_s4 + $0x360] sm:$0xff]  ;;  %v375_v25 = vld [vmem:[%s11145_s4 + $0x3a8] sm:$0xff]  ;;  %v8621_v27 = vpack.c.bf16 %v378_v19, %v369_v17  ;;  %v368_v30 = vld [vmem:[%s11145_s4 + $0x370] sm:$0xff] }
  0x1e   :  { %5539 = vmatprep.subr.bf16.mxu1 %v11156_v48  ;;  %11564 = vst [vmem:[#allocation37_spill] sm:$0xff] %v8587_v1  ;;  %11565 = vst [vmem:[#allocation38_spill] sm:$0xff] %v8596_v10  ;;  %v8623_v28 = vpack.c.bf16 %v375_v25, %v366_v21  ;;  %v377_v35 = vld [vmem:[%s11145_s4 + $0x3b8] sm:$0xff]  ;;  %v394_v39 = vld [vmem:[%s11145_s4 + $0x440] sm:$0xff] }
  0x1f   :  { %11566 = vst [vmem:[#allocation39_spill] sm:$0xff] %v8610_v18  ;;  %11567 = vst [vmem:[#allocation40_spill] sm:$0xff] %v8621_v27  ;;  %v8632_v36 = vpack.c.bf16 %v377_v35, %v368_v30  ;;  %v385_v37 = vld [vmem:[%s11145_s4 + $0x3f8] sm:$0xff]  ;;  %v396_v46 = vld [vmem:[%s11145_s4 + $0x450] sm:$0xff] }
  0x20   :  { %11568 = vst [vmem:[#allocation41_spill] sm:$0xff] %v8623_v28  ;;  %v384_v49 = vld [vmem:[%s11145_s4 + $0x3f0] sm:$0xff]  ;;  %v393_v53 = vld [vmem:[%s11145_s4 + $0x438] sm:$0xff]  ;;  %v386_v58 = vld [vmem:[%s11145_s4 + $0x400] sm:$0xff] }
  0x21   :  { %5541 = vmatpush3.bf16.msra.mxu1 %v8466_v5  ;;  %11569 = vst [vmem:[#allocation42_spill] sm:$0xff] %v8632_v36  ;;  %v8659_v55 = vpack.c.bf16 %v393_v53, %v384_v49  ;;  %v395_v59 = vld [vmem:[%s11145_s4 + $0x448] sm:$0xff]  ;;  %v412_v7 = vld [vmem:[%s11145_s4 + $0x4d0] sm:$0xff]  ;;  %v405_v11 = vld [vmem:[%s11145_s4 + $0x498] sm:$0xff] }
  0x22   :  { %5607 = vmatprep.subr.bf16.mxu1 %v8469_v6  ;;  %v8668_v63 = vpack.c.bf16 %v395_v59, %v386_v58  ;;  %v403_v2 = vld [vmem:[%s11145_s4 + $0x488] sm:$0xff]  ;;  %v414_v17 = vld [vmem:[%s11145_s4 + $0x4e0] sm:$0xff]  ;;  %v404_v35 = vld [vmem:[%s11145_s4 + $0x490] sm:$0xff] }
  0x23   :  { %11572 = vst [vmem:[#allocation45_spill] sm:$0xff] %v8659_v55  ;;  %v8682_v12 = vpack.c.bf16 %v412_v7, %v403_v2  ;;  %v402_v19 = vld [vmem:[%s11145_s4 + $0x480] sm:$0xff]  ;;  %v411_v21 = vld [vmem:[%s11145_s4 + $0x4c8] sm:$0xff]  ;;  %v8693_v25 = vpack.c.bf16 %v414_v17, %v405_v11  ;;  %v432_v58 = vld [vmem:[%s11145_s4 + $0x570] sm:$0xff] }
  0x24   :  { %5337 = vmatmul.mubr.msk.f32.vlgmr.msra.gmra.mrb[2].mxu1 %vm85_vm0, %v44_v44  ;;  %v339_v44 = vld [vmem:[%s11145_s4 + $0x288] sm:$0xff]  ;;  %11573 = vst [vmem:[#allocation46_spill] sm:$0xff] %v8668_v63  ;;  %v8695_v30 = vpack.c.bf16 %v411_v21, %v402_v19  ;;  %v420_v59 = vld [vmem:[%s11145_s4 + $0x510] sm:$0xff]  ;;  %v429_v2 = vld [vmem:[%s11145_s4 + $0x558] sm:$0xff] }
  0x25   :  { %5609 = vmatpush1.bf16.msra.mxu1 %v8484_v13  ;;  %681 = vmatprep.mubr.f32.mxu1 %v11158_v3  ;;  %v8556_v47 = vpack.c.bf16 %v339_v44, %v330_v43  ;;  %v387_v43 = vld [vmem:[%s11145_s4 + $0x408] sm:$0xff]  ;;  %v8646_v44 = vpack.c.bf16 %v394_v39, %v385_v37  ;;  %11574 = vst [vmem:[#allocation47_spill] sm:$0xff] %v8682_v12  ;;  %11575 = vst [vmem:[#allocation48_spill] sm:$0xff] %v8693_v25  ;;  %v413_v37 = vld [vmem:[%s11145_s4 + $0x4d8] sm:$0xff] }
  0x26   :  { %5611 = vmatprep.subr.bf16.mxu1 %v8487_v16  ;;  %v8657_v54 = vpack.c.bf16 %v396_v46, %v387_v43  ;;  %11576 = vst [vmem:[#allocation49_spill] sm:$0xff] %v8695_v30  ;;  %v8704_v39 = vpack.c.bf16 %v413_v37, %v404_v35  ;;  %v421_v43 = vld [vmem:[%s11145_s4 + $0x518] sm:$0xff]  ;;  %v430_v46 = vld [vmem:[%s11145_s4 + $0x560] sm:$0xff]  ;;  %v423_v49 = vld [vmem:[%s11145_s4 + $0x528] sm:$0xff]  ;;  %v8731_v11 = vpack.c.bf16 %v429_v2, %v420_v59 }
  0x27   :  { %11560 = vst [vmem:[#allocation33_spill] sm:$0xff] %v8556_v47  ;;  %5561 = vmatpush1.bf16.msra.mxu0 %v8556_v47  ;;  %11570 = vst [vmem:[#allocation43_spill] sm:$0xff] %v8646_v44  ;;  %v8718_v53 = vpack.c.bf16 %v430_v46, %v421_v43  ;;  %v8729_v7 = vpack.c.bf16 %v432_v58, %v423_v49  ;;  %v422_v17 = vld [vmem:[%s11145_s4 + $0x520] sm:$0xff]  ;;  %v431_v19 = vld [vmem:[%s11145_s4 + $0x568] sm:$0xff] }
  0x28   :  { %5563 = vmatprep.subr.bf16.mxu0 %v8574_v56  ;;  %11571 = vst [vmem:[#allocation44_spill] sm:$0xff] %v8657_v54  ;;  %11577 = vst [vmem:[#allocation50_spill] sm:$0xff] %v8704_v39  ;;  %v8740_v21 = vpack.c.bf16 %v431_v19, %v422_v17  ;;  %v439_v35 = vld [vmem:[%s11145_s4 + $0x5a8] sm:$0xff]  ;;  %v448_v37 = vld [vmem:[%s11145_s4 + $0x5f0] sm:$0xff] }
  0x29   :  { %5613 = vmatpush1.bf16.msra.mxu1 %v8503_v22  ;;  %11578 = vst [vmem:[#allocation51_spill] sm:$0xff] %v8718_v53  ;;  %11579 = vst [vmem:[#allocation52_spill] sm:$0xff] %v8729_v7  ;;  %v441_v43 = vld [vmem:[%s11145_s4 + $0x5b8] sm:$0xff]  ;;  %v8754_v46 = vpack.c.bf16 %v448_v37, %v439_v35  ;;  %v450_v49 = vld [vmem:[%s11145_s4 + $0x600] sm:$0xff] }
  0x2a   :  { %5615 = vmatprep.subr.bf16.mxu1 %v8507_v24  ;;  %11580 = vst [vmem:[#allocation53_spill] sm:$0xff] %v8731_v11  ;;  %11581 = vst [vmem:[#allocation54_spill] sm:$0xff] %v8740_v21  ;;  %v438_v58 = vld [vmem:[%s11145_s4 + $0x5a0] sm:$0xff]  ;;  %v447_v59 = vld [vmem:[%s11145_s4 + $0x5e8] sm:$0xff]  ;;  %v8765_v2 = vpack.c.bf16 %v450_v49, %v441_v43 }
  0x2b   :  { %5565 = vmatpush1.bf16.msra.mxu0 %v8587_v1  ;;  %11582 = vst [vmem:[#allocation55_spill] sm:$0xff] %v8754_v46  ;;  %v8767_v17 = vpack.c.bf16 %v447_v59, %v438_v58  ;;  %v440_v19 = vld [vmem:[%s11145_s4 + $0x5b0] sm:$0xff]  ;;  %v449_v35 = vld [vmem:[%s11145_s4 + $0x5f8] sm:$0xff]  ;;  %v466_v49 = vld [vmem:[%s11145_s4 + $0x680] sm:$0xff] }
  0x2c   :  { %5567 = vmatprep.subr.bf16.mxu0 %v8610_v18  ;;  %11583 = vst [vmem:[#allocation56_spill] sm:$0xff] %v8765_v2  ;;  %v8776_v37 = vpack.c.bf16 %v449_v35, %v440_v19  ;;  %v457_v43 = vld [vmem:[%s11145_s4 + $0x638] sm:$0xff]  ;;  %v459_v58 = vld [vmem:[%s11145_s4 + $0x648] sm:$0xff]  ;;  %v468_v19 = vld [vmem:[%s11145_s4 + $0x690] sm:$0xff] }
  0x2d   :  { %5617 = vmatpush1.bf16.msra.mxu1 %v8522_v31  ;;  %11584 = vst [vmem:[#allocation57_spill] sm:$0xff] %v8767_v17  ;;  %v8790_v59 = vpack.c.bf16 %v466_v49, %v457_v43  ;;  %v456_v35 = vld [vmem:[%s11145_s4 + $0x630] sm:$0xff]  ;;  %v465_v48 = vld [vmem:[%s11145_s4 + $0x678] sm:$0xff]  ;;  %v8801_v3 = vpack.c.bf16 %v468_v19, %v459_v58  ;;  %v458_v43 = vld [vmem:[%s11145_s4 + $0x640] sm:$0xff] }
  0x2e   :  { %5619 = vmatprep.subr.bf16.mxu1 %v8525_v34  ;;  %11585 = vst [vmem:[#allocation58_spill] sm:$0xff] %v8776_v37  ;;  %v467_v49 = vld [vmem:[%s11145_s4 + $0x688] sm:$0xff]  ;;  %v484_v58 = vld [vmem:[%s11145_s4 + $0x710] sm:$0xff] }
  0x2f   :  { %5569 = vmatpush1.bf16.msra.mxu0 %v8623_v28  ;;  %11586 = vst [vmem:[#allocation59_spill] sm:$0xff] %v8790_v59  ;;  %11587 = vst [vmem:[#allocation60_spill] sm:$0xff] %v8801_v3 }
  0x30   :  { %5571 = vmatprep.subr.bf16.mxu0 %v8646_v44 }
  0x31   :  { %5621 = vmatpush1.bf16.msra.mxu1 %v8540_v40 }
  0x32   :  { %5623 = vmatprep.subr.bf16.mxu1 %v8543_v42 }
  0x33   :  { %5573 = vmatpush1.bf16.msra.mxu0 %v8659_v55 }
  0x34   :  { %5575 = vmatprep.subr.bf16.mxu0 %v8682_v12 }
  0x35   :  { %5625 = vmatpush1.bf16.msra.mxu1 %v8561_v50 }
  0x36   :  { %5627 = vmatprep.subr.bf16.mxu1 %v8585_v0 }
  0x37   :  { %5577 = vmatpush1.bf16.msra.mxu0 %v8695_v30 }
  0x38   :  { %5579 = vmatprep.subr.bf16.mxu0 %v8718_v53 }
  0x39   :  { %5629 = vmatpush1.bf16.msra.mxu1 %v8596_v10 }
  0x3a   :  { %5631 = vmatprep.subr.bf16.mxu1 %v8621_v27 }
  0x3b   :  { %5581 = vmatpush1.bf16.msra.mxu0 %v8731_v11 }
  0x3c   :  { %5583 = vmatprep.subr.bf16.mxu0 %v8754_v46 }
  0x3d   :  { %5633 = vmatpush1.bf16.msra.mxu1 %v8632_v36 }
  0x3e   :  { %5635 = vmatprep.subr.bf16.mxu1 %v8657_v54 }
  0x3f   :  { %5585 = vmatpush1.bf16.msra.mxu0 %v8767_v17 }
  0x40   :  { %5587 = vmatprep.subr.bf16.mxu0 %v8790_v59 }
  0x41   :  { %5637 = vmatpush1.bf16.msra.mxu1 %v8668_v63 }
  0x42   :  { %5639 = vmatprep.subr.bf16.mxu1 %v8693_v25 }
  0x45   :  { %5641 = vmatpush1.bf16.msra.mxu1 %v8704_v39  ;;  %v495_v39 = vld [vmem:[%s11145_s4 + $0x768] sm:$0xff] }
  0x46   :  { %5643 = vmatprep.subr.bf16.mxu1 %v8729_v7 }
  0x49   :  { %5645 = vmatpush1.bf16.msra.mxu1 %v8740_v21 }
  0x4a   :  { %5647 = vmatprep.subr.bf16.mxu1 %v8765_v2  ;;  %v8803_v2 = vpack.c.bf16 %v465_v48, %v456_v35  ;;  %v475_v48 = vld [vmem:[%s11145_s4 + $0x6c8] sm:$0xff]  ;;  %v477_v35 = vld [vmem:[%s11145_s4 + $0x6d8] sm:$0xff] }
  0x4b   :  { %v8823_v19 = vpack.c.bf16 %v484_v58, %v475_v48  ;;  %v476_v48 = vld [vmem:[%s11145_s4 + $0x6d0] sm:$0xff]  ;;  %v485_v58 = vld [vmem:[%s11145_s4 + $0x718] sm:$0xff] }
  0x4c   :  { %11588 = vst [vmem:[#allocation61_spill] sm:$0xff] %v8803_v2  ;;  %5589 = vmatpush1.bf16.msra.mxu0 %v8803_v2  ;;  %v8848_v7 = vpack.c.bf16 %v485_v58, %v476_v48  ;;  %v492_v48 = vld [vmem:[%s11145_s4 + $0x750] sm:$0xff]  ;;  %v501_v58 = vld [vmem:[%s11145_s4 + $0x798] sm:$0xff] }
  0x4d   :  { %5649 = vmatpush1.bf16.msra.mxu1 %v8776_v37  ;;  %v8812_v37 = vpack.c.bf16 %v467_v49, %v458_v43  ;;  %11590 = vst [vmem:[#allocation63_spill] sm:$0xff] %v8823_v19  ;;  %v486_v43 = vld [vmem:[%s11145_s4 + $0x720] sm:$0xff]  ;;  %5591 = vmatprep.subr.bf16.mxu0 %v8823_v19  ;;  %v8875_v25 = vpack.c.bf16 %v501_v58, %v492_v48  ;;  %v513_v48 = vld [vmem:[%s11145_s4 + $0x7f8] sm:$0xff] }
  0x4e   :  { %5651 = vmatprep.subr.bf16.mxu1 %v8801_v3  ;;  %v474_v49 = vld [vmem:[%s11145_s4 + $0x6c0] sm:$0xff]  ;;  %v8834_v3 = vpack.c.bf16 %v486_v43, %v477_v35  ;;  %11593 = vst [vmem:[#allocation66_spill] sm:$0xff] %v8848_v7  ;;  %v493_v35 = vld [vmem:[%s11145_s4 + $0x758] sm:$0xff] }
  0x4f   :  { %11589 = vst [vmem:[#allocation62_spill] sm:$0xff] %v8812_v37  ;;  %v502_v43 = vld [vmem:[%s11145_s4 + $0x7a0] sm:$0xff]  ;;  %11596 = vst [vmem:[#allocation69_spill] sm:$0xff] %v8875_v25 }
  0x50   :  { %11591 = vst [vmem:[#allocation64_spill] sm:$0xff] %v8834_v3 }
  0x51   :  { %5653 = vmatpush1.bf16.msra.mxu1 %v8812_v37  ;;  %v483_v37 = vld [vmem:[%s11145_s4 + $0x708] sm:$0xff] }
  0x52   :  { %v8846_v21 = vpack.c.bf16 %v483_v37, %v474_v49  ;;  %5655 = vmatprep.subr.bf16.mxu1 %v8834_v3  ;;  %v8862_v37 = vpack.c.bf16 %v502_v43, %v493_v35  ;;  %v504_v49 = vld [vmem:[%s11145_s4 + $0x7b0] sm:$0xff]  ;;  %v494_v35 = vld [vmem:[%s11145_s4 + $0x760] sm:$0xff]  ;;  %v503_v43 = vld [vmem:[%s11145_s4 + $0x7a8] sm:$0xff] }
  0x53   :  { %v8873_v3 = vpack.c.bf16 %v504_v49, %v495_v39  ;;  %v511_v39 = vld [vmem:[%s11145_s4 + $0x7e8] sm:$0xff]  ;;  %v520_v49 = vld [vmem:[%s11145_s4 + $0x830] sm:$0xff] }
  0x54   :  { %11592 = vst [vmem:[#allocation65_spill] sm:$0xff] %v8846_v21  ;;  %5593 = vmatpush1.bf16.msra.mxu0 %v8846_v21  ;;  %11594 = vst [vmem:[#allocation67_spill] sm:$0xff] %v8862_v37  ;;  %v8898_v58 = vpack.c.bf16 %v520_v49, %v511_v39  ;;  %v512_v39 = vld [vmem:[%s11145_s4 + $0x7f0] sm:$0xff]  ;;  %v521_v49 = vld [vmem:[%s11145_s4 + $0x838] sm:$0xff] }
  0x55   :  { %5657 = vmatpush1.bf16.msra.mxu1 %v8848_v7  ;;  %11595 = vst [vmem:[#allocation68_spill] sm:$0xff] %v8873_v3  ;;  %5595 = vmatprep.subr.bf16.mxu0 %v8862_v37  ;;  %v8884_v7 = vpack.c.bf16 %v503_v43, %v494_v35  ;;  %v522_v35 = vld [vmem:[%s11145_s4 + $0x840] sm:$0xff] }
  0x56   :  { %5659 = vmatprep.subr.bf16.mxu1 %v8873_v3  ;;  %11598 = vst [vmem:[#allocation71_spill] sm:$0xff] %v8898_v58  ;;  %v510_v43 = vld [vmem:[%s11145_s4 + $0x7e0] sm:$0xff]  ;;  %v519_v3 = vld [vmem:[%s11145_s4 + $0x828] sm:$0xff]  ;;  %v8909_v63 = vpack.c.bf16 %v522_v35, %v513_v48  ;;  %v529_v48 = vld [vmem:[%s11145_s4 + $0x878] sm:$0xff] }
  0x57   :  { %11597 = vst [vmem:[#allocation70_spill] sm:$0xff] %v8884_v7  ;;  %v8911_v54 = vpack.c.bf16 %v519_v3, %v510_v43  ;;  %v538_v3 = vld [vmem:[%s11145_s4 + $0x8c0] sm:$0xff]  ;;  %v531_v35 = vld [vmem:[%s11145_s4 + $0x888] sm:$0xff] }
  0x58   :  { %5597 = vmatpush1.bf16.msra.mxu0 %v8875_v25  ;;  %11599 = vst [vmem:[#allocation72_spill] sm:$0xff] %v8909_v63  ;;  %v8934_v43 = vpack.c.bf16 %v538_v3, %v529_v48  ;;  %v530_v48 = vld [vmem:[%s11145_s4 + $0x880] sm:$0xff]  ;;  %v539_v3 = vld [vmem:[%s11145_s4 + $0x8c8] sm:$0xff] }
  0x59   :  { %5661 = vmatpush1.bf16.msra.mxu1 %v8884_v7  ;;  %11600 = vst [vmem:[#allocation73_spill] sm:$0xff] %v8911_v54  ;;  %5599 = vmatprep.subr.bf16.mxu0 %v8898_v58  ;;  %v8920_v7 = vpack.c.bf16 %v521_v49, %v512_v39  ;;  %v540_v39 = vld [vmem:[%s11145_s4 + $0x8d0] sm:$0xff] }
  0x5a   :  { %5663 = vmatprep.subr.bf16.mxu1 %v8909_v63  ;;  %11602 = vst [vmem:[#allocation75_spill] sm:$0xff] %v8934_v43  ;;  %v528_v49 = vld [vmem:[%s11145_s4 + $0x870] sm:$0xff]  ;;  %v537_v63 = vld [vmem:[%s11145_s4 + $0x8b8] sm:$0xff]  ;;  %v8945_v36 = vpack.c.bf16 %v540_v39, %v531_v35  ;;  %v263_v35 = vld [vmem:[%s11145_s4 + $0x28] sm:$0xff] }
  0x5b   :  { %11601 = vst [vmem:[#allocation74_spill] sm:$0xff] %v8920_v7  ;;  %v8947_v58 = vpack.c.bf16 %v537_v63, %v528_v49  ;;  %v272_v63 = vld [vmem:[%s11145_s4 + $0x70] sm:$0xff]  ;;  %v265_v39 = vld [vmem:[%s11145_s4 + $0x38] sm:$0xff] }
  0x5c   :  { %5601 = vmatpush1.bf16.msra.mxu0 %v8911_v54  ;;  %11603 = vst [vmem:[#allocation76_spill] sm:$0xff] %v8945_v36  ;;  %v8970_v49 = vpack.c.bf16 %v272_v63, %v263_v35  ;;  %v40_v35 = vld [vmem:[%s11147_s2] sm:$0x7] }
  0x5d   :  { %5665 = vmatpush1.bf16.msra.mxu1 %v8920_v7  ;;  %11604 = vst [vmem:[#allocation77_spill] sm:$0xff] %v8947_v58  ;;  %5603 = vmatprep.subr.bf16.mxu0 %v8934_v43  ;;  %v8956_v7 = vpack.c.bf16 %v539_v3, %v530_v48  ;;  %v274_v48 = vld [vmem:[%s11145_s4 + $0x80] sm:$0xff] }
  0x5e   :  { %5667 = vmatprep.subr.bf16.mxu1 %v8945_v36  ;;  %11606 = vst [vmem:[#allocation79_spill] sm:$0xff] %v8970_v49  ;;  %v8975_v3 = vpack.c.bf16 %v274_v48, %v265_v39  ;;  %v70_v36 = vlaneseq }
  0x5f   :  { %11605 = vst [vmem:[#allocation78_spill] sm:$0xff] %v8956_v7 }
  0x60   :  { %5605 = vmatpush1.bf16.msra.mxu0 %v8947_v58  ;;  %11607 = vst [vmem:[#allocation80_spill] sm:$0xff] %v8975_v3  ;;  %v8979_v43 = vshrl.u32 %v70_v36, 7 }
  0x61   :  { %5669 = vmatpush1.bf16.msra.mxu1 %v8956_v7  ;;  %5671 = vmatprep.subr.bf16.mxu0 %v8970_v49 }
  0x62   :  { %5735 = vmatprep.subr.bf16.mxu1 %v8975_v3  ;;  %11608 = vst [vmem:[#allocation81_spill] sm:$0xff] %v8979_v43  ;;  %v11220_v54 = vsub.s32 0, %v8979_v43  ;;  %v11223_v63 = vsub.s32 1, %v8979_v43 }
  0x64   :  { %v8988_v7 = vrot.slane %v40_v35, %v11220_v54  ;;  %v8992_v48 = vrot.slane %v40_v35, %v11223_v63  ;;  %v11224_v54 = vsub.s32 2, %v8979_v43  ;;  %v289_v43 = vld [vmem:[%s11145_s4 + $0xf8] sm:$0xff] }
  0x66   :  { %11609 = vst [vmem:[#allocation82_spill] sm:$0xff] %v8988_v7  ;;  %11610 = vst [vmem:[#allocation83_spill] sm:$0xff] %v8992_v48  ;;  %v8999_v63 = vrot.slane %v40_v35, %v11224_v54 }
  0x68   :  { %11611 = vst [vmem:[#allocation84_spill] sm:$0xff] %v8999_v63 }
  0xe7   :  { %v155_v39 = vpop.f32.mrb[0].mxu1 }
  0xe8   :  { %v156_v36 = vadd.f32 %v155_v39, %v8988_v7  ;;  %v157_v3 = vpop.f32.mrb[1].mxu1  ;;  %v280_v7 = vld [vmem:[%s11145_s4 + $0xb0] sm:$0xff] }
  0xe9   :  { %v158_v58 = vadd.f32 %v157_v3, %v8992_v48  ;;  %v9004_v3 = vld [vmem:[%s11148_s3] ss:$0 sm:$0xff] }
  0xea   :  { %v4890_v49 = vmul.f32 -1.442695, %v156_v36  ;;  %11612 = vst [vmem:[#allocation85_spill] sm:$0xff] %v9004_v3  ;;  %v273_v36 = vld [vmem:[%s11145_s4 + $0x78] sm:$0xff] }
  0xeb   :  { %v4891_v25 = vmul.f32 -1.442695, %v158_v58 }
  0xec   :  { %8036 = vpow2.f32 %v4890_v49  ;;  %v262_v49 = vld [vmem:[%s11145_s4 + $0x20] sm:$0xff] }
  0xed   :  { %8038 = vpow2.f32 %v4891_v25 }
  0xf6   :  { %v8037_v27 = vpop.eup %8036 }
  0xf7   :  { %v238_v10 = vadd.f32 1.0, %v8037_v27  ;;  %v226_v37 = vpop.f32.mrb[2].mxu1  ;;  %v8039_v0 = vpop.eup %8038 }
  0xf8   :  { %v5338_v21 = vpop.f32.mrb[3].mxu1  ;;  %v239_v39 = vadd.f32 1.0, %v8039_v0  ;;  %v227_v25 = vadd.f32 %v226_v37, %v8999_v63  ;;  %v271_v0 = vld [vmem:[%s11145_s4 + $0x68] sm:$0xff]  ;;  %v264_v37 = vld [vmem:[%s11145_s4 + $0x30] sm:$0xff] }
  0xf9   :  { %8040 = vrcp.f32 %v238_v10  ;;  %v9034_v48 = vpack.c.bf16 %v273_v36, %v264_v37  ;;  %v9070_v37 = vpack.c.bf16 %v289_v43, %v280_v7  ;;  %v300_v7 = vld [vmem:[%s11145_s4 + $0x150] sm:$0xff]  ;;  %v309_v43 = vld [vmem:[%s11145_s4 + $0x198] sm:$0xff] }
  0xfa   :  { %8042 = vrcp.f32 %v239_v39  ;;  %v281_v39 = vld [vmem:[%s11145_s4 + $0xb8] sm:$0xff] }
  0xfb   :  { %11613 = vst [vmem:[#allocation86_spill] sm:$0xff] %v9034_v48  ;;  %11616 = vst [vmem:[#allocation89_spill] sm:$0xff] %v9070_v37 }
 0x103   :  { %v8041_v58 = vpop.eup %8040 }
 0x104   :  { %v251_v27 = vmul.f32 %v8041_v58, %v9004_v3  ;;  %v8043_v21 = vpop.eup %8042  ;;  %v290_v58 = vld [vmem:[%s11145_s4 + $0x100] sm:$0xff]  ;;  %v9032_v3 = vpack.c.bf16 %v271_v0, %v262_v49  ;;  %v291_v49 = vld [vmem:[%s11145_s4 + $0x108] sm:$0xff] }
 0x105   :  { %v254_v35 = vsub.f32 1.0, %v8043_v21  ;;  %v256_v54 = vmul.f32 0.0, %v8043_v21  ;;  %v9044_v19 = vpack.c.bf16 %v290_v58, %v281_v39  ;;  %v282_v21 = vld [vmem:[%s11145_s4 + $0xc0] sm:$0xff]  ;;  %v299_v0 = vld [vmem:[%s11145_s4 + $0x148] sm:$0xff] }
 0x106   :  { %v252_v10 = vadd.f32 %v251_v27, %v227_v25  ;;  %v283_v27 = vld [vmem:[%s11145_s4 + $0xc8] sm:$0xff]  ;;  %v9072_v36 = vpack.c.bf16 %v291_v49, %v282_v21  ;;  %v298_v39 = vld [vmem:[%s11145_s4 + $0x140] sm:$0xff] }
 0x107   :  { %11614 = vst [vmem:[#allocation87_spill] sm:$0xff] %v9044_v19  ;;  %v326_v21 = vld [vmem:[%s11145_s4 + $0x220] sm:$0xff]  ;;  %v319_v49 = vld [vmem:[%s11145_s4 + $0x1e8] sm:$0xff] }
 0x108   :  { %8044 = vtanh.f32 %v252_v10  ;;  %v292_v10 = vld [vmem:[%s11145_s4 + $0x110] sm:$0xff]  ;;  %11617 = vst [vmem:[#allocation90_spill] sm:$0xff] %v9072_v36 }
 0x109   :  { %v9046_v2 = vpack.c.bf16 %v292_v10, %v283_v27  ;;  %v317_v10 = vld [vmem:[%s11145_s4 + $0x1d8] sm:$0xff] }
 0x10b   :  { %11615 = vst [vmem:[#allocation88_spill] sm:$0xff] %v9046_v2 }
 0x112   :  { %v8045_v25 = vpop.eup %8044 }
 0x113   :  { %v255_v63 = vmul.f32 %v8045_v25, %v254_v35  ;;  %v310_v35 = vld [vmem:[%s11145_s4 + $0x1a0] sm:$0xff]  ;;  %v307_v25 = vld [vmem:[%s11145_s4 + $0x188] sm:$0xff] }
 0x115   :  { %v9042_v50 = vadd.f32 %v256_v54, %v255_v63  ;;  %v308_v54 = vld [vmem:[%s11145_s4 + $0x190] sm:$0xff]  ;;  %v301_v63 = vld [vmem:[%s11145_s4 + $0x158] sm:$0xff] }
 0x116   :  { %v9082_v58 = vpack.c.bf16 %v308_v54, %v299_v0  ;;  %v9084_v27 = vpack.c.bf16 %v310_v35, %v301_v63  ;;  %v328_v0 = vld [vmem:[%s11145_s4 + $0x230] sm:$0xff]  ;;  %v11620_v54 = vmov 0.0   ;;  %v9108_v63 = vpack.c.bf16 %v307_v25, %v298_v39  ;;  %v318_v39 = vld [vmem:[%s11145_s4 + $0x1e0] sm:$0xff]  ;;  %v327_v25 = vld [vmem:[%s11145_s4 + $0x228] sm:$0xff] }
 0x117   :  { %611 = vmatmul.mubr.f32.vlgmr.msra.gmra.mrb[0].mxu0 %v9042_v50  ;;  %682 = vmatmul.mubr.f32.vlgmr.msra.gmra.mrb[4].mxu1 %v9042_v50  ;;  %v9110_v35 = vpack.c.bf16 %v309_v43, %v300_v7  ;;  %v335_v7 = vld [vmem:[%s11145_s4 + $0x268] sm:$0xff]  ;;  %v344_v43 = vld [vmem:[%s11145_s4 + $0x2b0] sm:$0xff] }
 0x118   :  { %5673 = vmatpush1.bf16.msra.mxu0 %v9032_v3  ;;  %5737 = vmatpush1.bf16.msra.mxu1 %v9034_v48  ;;  %11618 = vst [vmem:[#allocation91_spill] sm:$0xff] %v9082_v58  ;;  %11619 = vst [vmem:[#allocation92_spill] sm:$0xff] %v9084_v27  ;;  %v9120_v48 = vpack.c.bf16 %v326_v21, %v317_v10  ;;  %v337_v10 = vld [vmem:[%s11145_s4 + $0x278] sm:$0xff]  ;;  %v346_v21 = vld [vmem:[%s11145_s4 + $0x2c0] sm:$0xff] }
 0x119   :  { %5675 = vmatprep.subr.bf16.mxu0 %v9044_v19  ;;  %5739 = vmatprep.subr.bf16.mxu1 %v9046_v2  ;;  %11621 = vst [vmem:[#allocation93_spill] sm:$0xff] %v9108_v63  ;;  %11622 = vst [vmem:[#allocation94_spill] sm:$0xff] %v9110_v35  ;;  %v316_v2 = vld [vmem:[%s11145_s4 + $0x1d0] sm:$0xff]  ;;  %v325_v19 = vld [vmem:[%s11145_s4 + $0x218] sm:$0xff] }
 0x11a   :  { %752 = vmatprep.mubr.f32.mxu0 %v11620_v54  ;;  %823 = vmatprep.mubr.f32.mxu1 %v11620_v54  ;;  %11623 = vst [vmem:[#allocation95_spill] sm:$0xff] %v9120_v48 }
 0x11c   :  { %5677 = vmatpush1.bf16.msra.mxu0 %v9070_v37  ;;  %5741 = vmatpush1.bf16.msra.mxu1 %v9072_v36  ;;  %v9122_v37 = vpack.c.bf16 %v328_v0, %v319_v49  ;;  %v9144_v49 = vpack.c.bf16 %v325_v19, %v316_v2  ;;  %v9146_v0 = vpack.c.bf16 %v327_v25, %v318_v39  ;;  %v336_v2 = vld [vmem:[%s11145_s4 + $0x270] sm:$0xff]  ;;  %v345_v19 = vld [vmem:[%s11145_s4 + $0x2b8] sm:$0xff]  ;;  %v362_v25 = vld [vmem:[%s11145_s4 + $0x340] sm:$0xff] }
 0x11d   :  { %5679 = vmatprep.subr.bf16.mxu0 %v9082_v58  ;;  %5743 = vmatprep.subr.bf16.mxu1 %v9084_v27  ;;  %v334_v27 = vld [vmem:[%s11145_s4 + $0x260] sm:$0xff]  ;;  %v343_v58 = vld [vmem:[%s11145_s4 + $0x2a8] sm:$0xff]  ;;  %v9156_v36 = vpack.c.bf16 %v344_v43, %v335_v7  ;;  %v353_v39 = vld [vmem:[%s11145_s4 + $0x2f8] sm:$0xff] }
 0x11e   :  { %11624 = vst [vmem:[#allocation96_spill] sm:$0xff] %v9122_v37  ;;  %11625 = vst [vmem:[#allocation97_spill] sm:$0xff] %v9144_v49  ;;  %v355_v7 = vld [vmem:[%s11145_s4 + $0x308] sm:$0xff]  ;;  %v364_v43 = vld [vmem:[%s11145_s4 + $0x350] sm:$0xff] }
 0x11f   :  { %11626 = vst [vmem:[#allocation98_spill] sm:$0xff] %v9146_v0  ;;  %11627 = vst [vmem:[#allocation99_spill] sm:$0xff] %v9156_v36 }
 0x120   :  { %5681 = vmatpush1.bf16.msra.mxu0 %v9108_v63  ;;  %5745 = vmatpush1.bf16.msra.mxu1 %v9110_v35  ;;  %v9158_v63 = vpack.c.bf16 %v346_v21, %v337_v10  ;;  %v9180_v10 = vpack.c.bf16 %v343_v58, %v334_v27  ;;  %v9182_v21 = vpack.c.bf16 %v345_v19, %v336_v2  ;;  %v354_v58 = vld [vmem:[%s11145_s4 + $0x300] sm:$0xff]  ;;  %v363_v27 = vld [vmem:[%s11145_s4 + $0x348] sm:$0xff]  ;;  %v380_v19 = vld [vmem:[%s11145_s4 + $0x3d0] sm:$0xff] }
 0x121   :  { %5683 = vmatprep.subr.bf16.mxu0 %v9120_v48  ;;  %5747 = vmatprep.subr.bf16.mxu1 %v9122_v37  ;;  %v352_v37 = vld [vmem:[%s11145_s4 + $0x2f0] sm:$0xff]  ;;  %v361_v48 = vld [vmem:[%s11145_s4 + $0x338] sm:$0xff]  ;;  %v9192_v35 = vpack.c.bf16 %v362_v25, %v353_v39  ;;  %v371_v2 = vld [vmem:[%s11145_s4 + $0x388] sm:$0xff] }
 0x122   :  { %11628 = vst [vmem:[#allocation100_spill] sm:$0xff] %v9158_v63  ;;  %11629 = vst [vmem:[#allocation101_spill] sm:$0xff] %v9180_v10  ;;  %v373_v39 = vld [vmem:[%s11145_s4 + $0x398] sm:$0xff]  ;;  %v382_v25 = vld [vmem:[%s11145_s4 + $0x3e0] sm:$0xff] }
 0x123   :  { %11630 = vst [vmem:[#allocation102_spill] sm:$0xff] %v9182_v21  ;;  %11631 = vst [vmem:[#allocation103_spill] sm:$0xff] %v9192_v35 }
 0x124   :  { %5685 = vmatpush1.bf16.msra.mxu0 %v9144_v49  ;;  %5749 = vmatpush1.bf16.msra.mxu1 %v9146_v0  ;;  %v9194_v49 = vpack.c.bf16 %v364_v43, %v355_v7  ;;  %v9216_v7 = vpack.c.bf16 %v361_v48, %v352_v37  ;;  %v9218_v43 = vpack.c.bf16 %v363_v27, %v354_v58  ;;  %v372_v48 = vld [vmem:[%s11145_s4 + $0x390] sm:$0xff]  ;;  %v381_v37 = vld [vmem:[%s11145_s4 + $0x3d8] sm:$0xff]  ;;  %v398_v27 = vld [vmem:[%s11145_s4 + $0x460] sm:$0xff] }
 0x125   :  { %5687 = vmatprep.subr.bf16.mxu0 %v9156_v36  ;;  %5751 = vmatprep.subr.bf16.mxu1 %v9158_v63  ;;  %v370_v63 = vld [vmem:[%s11145_s4 + $0x380] sm:$0xff]  ;;  %v379_v36 = vld [vmem:[%s11145_s4 + $0x3c8] sm:$0xff]  ;;  %v9228_v0 = vpack.c.bf16 %v380_v19, %v371_v2  ;;  %v389_v58 = vld [vmem:[%s11145_s4 + $0x418] sm:$0xff] }
 0x126   :  { %11632 = vst [vmem:[#allocation104_spill] sm:$0xff] %v9194_v49  ;;  %11633 = vst [vmem:[#allocation105_spill] sm:$0xff] %v9216_v7  ;;  %v391_v2 = vld [vmem:[%s11145_s4 + $0x428] sm:$0xff]  ;;  %v400_v19 = vld [vmem:[%s11145_s4 + $0x470] sm:$0xff] }
 0x127   :  { %11634 = vst [vmem:[#allocation106_spill] sm:$0xff] %v9218_v43  ;;  %11635 = vst [vmem:[#allocation107_spill] sm:$0xff] %v9228_v0 }
 0x128   :  { %5689 = vmatpush1.bf16.msra.mxu0 %v9180_v10  ;;  %5753 = vmatpush1.bf16.msra.mxu1 %v9182_v21  ;;  %v9230_v10 = vpack.c.bf16 %v382_v25, %v373_v39  ;;  %v9252_v39 = vpack.c.bf16 %v379_v36, %v370_v63  ;;  %v9254_v25 = vpack.c.bf16 %v381_v37, %v372_v48  ;;  %v390_v36 = vld [vmem:[%s11145_s4 + $0x420] sm:$0xff]  ;;  %v399_v63 = vld [vmem:[%s11145_s4 + $0x468] sm:$0xff]  ;;  %v416_v37 = vld [vmem:[%s11145_s4 + $0x4f0] sm:$0xff] }
 0x129   :  { %5691 = vmatprep.subr.bf16.mxu0 %v9192_v35  ;;  %5755 = vmatprep.subr.bf16.mxu1 %v9194_v49  ;;  %v388_v49 = vld [vmem:[%s11145_s4 + $0x410] sm:$0xff]  ;;  %v397_v35 = vld [vmem:[%s11145_s4 + $0x458] sm:$0xff]  ;;  %v9264_v21 = vpack.c.bf16 %v398_v27, %v389_v58  ;;  %v407_v48 = vld [vmem:[%s11145_s4 + $0x4a8] sm:$0xff] }
 0x12a   :  { %11636 = vst [vmem:[#allocation108_spill] sm:$0xff] %v9230_v10  ;;  %11637 = vst [vmem:[#allocation109_spill] sm:$0xff] %v9252_v39  ;;  %v409_v58 = vld [vmem:[%s11145_s4 + $0x4b8] sm:$0xff]  ;;  %v418_v27 = vld [vmem:[%s11145_s4 + $0x500] sm:$0xff] }
 0x12b   :  { %11638 = vst [vmem:[#allocation110_spill] sm:$0xff] %v9254_v25  ;;  %11639 = vst [vmem:[#allocation111_spill] sm:$0xff] %v9264_v21 }
 0x12c   :  { %5693 = vmatpush1.bf16.msra.mxu0 %v9216_v7  ;;  %5757 = vmatpush1.bf16.msra.mxu1 %v9218_v43  ;;  %v9266_v7 = vpack.c.bf16 %v400_v19, %v391_v2  ;;  %v9288_v2 = vpack.c.bf16 %v397_v35, %v388_v49  ;;  %v9290_v19 = vpack.c.bf16 %v399_v63, %v390_v36  ;;  %v408_v35 = vld [vmem:[%s11145_s4 + $0x4b0] sm:$0xff]  ;;  %v417_v49 = vld [vmem:[%s11145_s4 + $0x4f8] sm:$0xff]  ;;  %v434_v63 = vld [vmem:[%s11145_s4 + $0x580] sm:$0xff] }
 0x12d   :  { %5695 = vmatprep.subr.bf16.mxu0 %v9228_v0  ;;  %5759 = vmatprep.subr.bf16.mxu1 %v9230_v10  ;;  %v406_v10 = vld [vmem:[%s11145_s4 + $0x4a0] sm:$0xff]  ;;  %v415_v0 = vld [vmem:[%s11145_s4 + $0x4e8] sm:$0xff]  ;;  %v9300_v43 = vpack.c.bf16 %v416_v37, %v407_v48  ;;  %v425_v36 = vld [vmem:[%s11145_s4 + $0x538] sm:$0xff] }
 0x12e   :  { %11640 = vst [vmem:[#allocation112_spill] sm:$0xff] %v9266_v7  ;;  %11641 = vst [vmem:[#allocation113_spill] sm:$0xff] %v9288_v2  ;;  %v427_v48 = vld [vmem:[%s11145_s4 + $0x548] sm:$0xff]  ;;  %v436_v37 = vld [vmem:[%s11145_s4 + $0x590] sm:$0xff] }
 0x12f   :  { %11642 = vst [vmem:[#allocation114_spill] sm:$0xff] %v9290_v19  ;;  %11643 = vst [vmem:[#allocation115_spill] sm:$0xff] %v9300_v43 }
 0x130   :  { %5697 = vmatpush1.bf16.msra.mxu0 %v9252_v39  ;;  %5761 = vmatpush1.bf16.msra.mxu1 %v9254_v25  ;;  %v9302_v39 = vpack.c.bf16 %v418_v27, %v409_v58  ;;  %v9324_v58 = vpack.c.bf16 %v415_v0, %v406_v10  ;;  %v9326_v27 = vpack.c.bf16 %v417_v49, %v408_v35  ;;  %v426_v0 = vld [vmem:[%s11145_s4 + $0x540] sm:$0xff]  ;;  %v435_v10 = vld [vmem:[%s11145_s4 + $0x588] sm:$0xff]  ;;  %v452_v49 = vld [vmem:[%s11145_s4 + $0x610] sm:$0xff] }
 0x131   :  { %5699 = vmatprep.subr.bf16.mxu0 %v9264_v21  ;;  %5763 = vmatprep.subr.bf16.mxu1 %v9266_v7  ;;  %v424_v7 = vld [vmem:[%s11145_s4 + $0x530] sm:$0xff]  ;;  %v433_v21 = vld [vmem:[%s11145_s4 + $0x578] sm:$0xff]  ;;  %v9336_v25 = vpack.c.bf16 %v434_v63, %v425_v36  ;;  %v443_v35 = vld [vmem:[%s11145_s4 + $0x5c8] sm:$0xff] }
 0x132   :  { %11644 = vst [vmem:[#allocation116_spill] sm:$0xff] %v9302_v39  ;;  %11645 = vst [vmem:[#allocation117_spill] sm:$0xff] %v9324_v58  ;;  %v445_v36 = vld [vmem:[%s11145_s4 + $0x5d8] sm:$0xff]  ;;  %v454_v63 = vld [vmem:[%s11145_s4 + $0x620] sm:$0xff] }
 0x133   :  { %11646 = vst [vmem:[#allocation118_spill] sm:$0xff] %v9326_v27  ;;  %11647 = vst [vmem:[#allocation119_spill] sm:$0xff] %v9336_v25 }
 0x134   :  { %5701 = vmatpush1.bf16.msra.mxu0 %v9288_v2  ;;  %5765 = vmatpush1.bf16.msra.mxu1 %v9290_v19  ;;  %v9338_v2 = vpack.c.bf16 %v436_v37, %v427_v48  ;;  %v9360_v48 = vpack.c.bf16 %v433_v21, %v424_v7  ;;  %v9362_v37 = vpack.c.bf16 %v435_v10, %v426_v0  ;;  %v444_v21 = vld [vmem:[%s11145_s4 + $0x5d0] sm:$0xff]  ;;  %v453_v7 = vld [vmem:[%s11145_s4 + $0x618] sm:$0xff]  ;;  %v470_v10 = vld [vmem:[%s11145_s4 + $0x6a0] sm:$0xff] }
 0x135   :  { %5703 = vmatprep.subr.bf16.mxu0 %v9300_v43  ;;  %5767 = vmatprep.subr.bf16.mxu1 %v9302_v39  ;;  %v442_v39 = vld [vmem:[%s11145_s4 + $0x5c0] sm:$0xff]  ;;  %v451_v43 = vld [vmem:[%s11145_s4 + $0x608] sm:$0xff]  ;;  %v9372_v19 = vpack.c.bf16 %v452_v49, %v443_v35  ;;  %v461_v0 = vld [vmem:[%s11145_s4 + $0x658] sm:$0xff] }
 0x136   :  { %11648 = vst [vmem:[#allocation120_spill] sm:$0xff] %v9338_v2  ;;  %11649 = vst [vmem:[#allocation121_spill] sm:$0xff] %v9360_v48  ;;  %v463_v35 = vld [vmem:[%s11145_s4 + $0x668] sm:$0xff]  ;;  %v472_v49 = vld [vmem:[%s11145_s4 + $0x6b0] sm:$0xff] }
 0x137   :  { %11650 = vst [vmem:[#allocation122_spill] sm:$0xff] %v9362_v37  ;;  %11651 = vst [vmem:[#allocation123_spill] sm:$0xff] %v9372_v19 }
 0x138   :  { %5705 = vmatpush1.bf16.msra.mxu0 %v9324_v58  ;;  %5769 = vmatpush1.bf16.msra.mxu1 %v9326_v27  ;;  %v9374_v58 = vpack.c.bf16 %v454_v63, %v445_v36  ;;  %v9396_v36 = vpack.c.bf16 %v451_v43, %v442_v39  ;;  %v9398_v63 = vpack.c.bf16 %v453_v7, %v444_v21  ;;  %v462_v43 = vld [vmem:[%s11145_s4 + $0x660] sm:$0xff]  ;;  %v471_v39 = vld [vmem:[%s11145_s4 + $0x6a8] sm:$0xff]  ;;  %v488_v7 = vld [vmem:[%s11145_s4 + $0x730] sm:$0xff] }
 0x139   :  { %5707 = vmatprep.subr.bf16.mxu0 %v9336_v25  ;;  %5771 = vmatprep.subr.bf16.mxu1 %v9338_v2  ;;  %v460_v2 = vld [vmem:[%s11145_s4 + $0x650] sm:$0xff]  ;;  %v469_v25 = vld [vmem:[%s11145_s4 + $0x698] sm:$0xff]  ;;  %v9408_v27 = vpack.c.bf16 %v470_v10, %v461_v0  ;;  %v479_v21 = vld [vmem:[%s11145_s4 + $0x6e8] sm:$0xff] }
 0x13a   :  { %11652 = vst [vmem:[#allocation124_spill] sm:$0xff] %v9374_v58  ;;  %11653 = vst [vmem:[#allocation125_spill] sm:$0xff] %v9396_v36  ;;  %v481_v0 = vld [vmem:[%s11145_s4 + $0x6f8] sm:$0xff]  ;;  %v490_v10 = vld [vmem:[%s11145_s4 + $0x740] sm:$0xff] }
 0x13b   :  { %11654 = vst [vmem:[#allocation126_spill] sm:$0xff] %v9398_v63  ;;  %11655 = vst [vmem:[#allocation127_spill] sm:$0xff] %v9408_v27 }
 0x13c   :  { %5709 = vmatpush1.bf16.msra.mxu0 %v9360_v48  ;;  %5773 = vmatpush1.bf16.msra.mxu1 %v9362_v37  ;;  %v9410_v48 = vpack.c.bf16 %v472_v49, %v463_v35  ;;  %v9432_v35 = vpack.c.bf16 %v469_v25, %v460_v2  ;;  %v9434_v49 = vpack.c.bf16 %v471_v39, %v462_v43  ;;  %v480_v25 = vld [vmem:[%s11145_s4 + $0x6f0] sm:$0xff]  ;;  %v489_v2 = vld [vmem:[%s11145_s4 + $0x738] sm:$0xff]  ;;  %v506_v39 = vld [vmem:[%s11145_s4 + $0x7c0] sm:$0xff] }
 0x13d   :  { %5711 = vmatprep.subr.bf16.mxu0 %v9372_v19  ;;  %5775 = vmatprep.subr.bf16.mxu1 %v9374_v58  ;;  %v478_v58 = vld [vmem:[%s11145_s4 + $0x6e0] sm:$0xff]  ;;  %v487_v19 = vld [vmem:[%s11145_s4 + $0x728] sm:$0xff]  ;;  %v9444_v37 = vpack.c.bf16 %v488_v7, %v479_v21  ;;  %v497_v43 = vld [vmem:[%s11145_s4 + $0x778] sm:$0xff] }
 0x13e   :  { %11656 = vst [vmem:[#allocation128_spill] sm:$0xff] %v9410_v48  ;;  %11657 = vst [vmem:[#allocation129_spill] sm:$0xff] %v9432_v35  ;;  %v499_v21 = vld [vmem:[%s11145_s4 + $0x788] sm:$0xff]  ;;  %v508_v7 = vld [vmem:[%s11145_s4 + $0x7d0] sm:$0xff] }
 0x13f   :  { %11658 = vst [vmem:[#allocation130_spill] sm:$0xff] %v9434_v49  ;;  %11659 = vst [vmem:[#allocation131_spill] sm:$0xff] %v9444_v37 }
 0x140   :  { %5713 = vmatpush1.bf16.msra.mxu0 %v9396_v36  ;;  %5777 = vmatpush1.bf16.msra.mxu1 %v9398_v63  ;;  %v9446_v36 = vpack.c.bf16 %v490_v10, %v481_v0  ;;  %v9468_v0 = vpack.c.bf16 %v487_v19, %v478_v58  ;;  %v9470_v10 = vpack.c.bf16 %v489_v2, %v480_v25  ;;  %v498_v19 = vld [vmem:[%s11145_s4 + $0x780] sm:$0xff]  ;;  %v507_v58 = vld [vmem:[%s11145_s4 + $0x7c8] sm:$0xff]  ;;  %v524_v2 = vld [vmem:[%s11145_s4 + $0x850] sm:$0xff] }
 0x141   :  { %5715 = vmatprep.subr.bf16.mxu0 %v9408_v27  ;;  %5779 = vmatprep.subr.bf16.mxu1 %v9410_v48  ;;  %v496_v48 = vld [vmem:[%s11145_s4 + $0x770] sm:$0xff]  ;;  %v505_v27 = vld [vmem:[%s11145_s4 + $0x7b8] sm:$0xff]  ;;  %v9480_v63 = vpack.c.bf16 %v506_v39, %v497_v43  ;;  %v515_v25 = vld [vmem:[%s11145_s4 + $0x808] sm:$0xff] }
 0x142   :  { %11660 = vst [vmem:[#allocation132_spill] sm:$0xff] %v9446_v36  ;;  %11661 = vst [vmem:[#allocation133_spill] sm:$0xff] %v9468_v0  ;;  %v517_v43 = vld [vmem:[%s11145_s4 + $0x818] sm:$0xff]  ;;  %v526_v39 = vld [vmem:[%s11145_s4 + $0x860] sm:$0xff] }
 0x143   :  { %11662 = vst [vmem:[#allocation134_spill] sm:$0xff] %v9470_v10  ;;  %11663 = vst [vmem:[#allocation135_spill] sm:$0xff] %v9480_v63 }
 0x144   :  { %5717 = vmatpush1.bf16.msra.mxu0 %v9432_v35  ;;  %5781 = vmatpush1.bf16.msra.mxu1 %v9434_v49  ;;  %v9482_v35 = vpack.c.bf16 %v508_v7, %v499_v21  ;;  %v9504_v21 = vpack.c.bf16 %v505_v27, %v496_v48  ;;  %v9506_v7 = vpack.c.bf16 %v507_v58, %v498_v19  ;;  %v516_v27 = vld [vmem:[%s11145_s4 + $0x810] sm:$0xff]  ;;  %v525_v48 = vld [vmem:[%s11145_s4 + $0x858] sm:$0xff]  ;;  %v542_v58 = vld [vmem:[%s11145_s4 + $0x8e0] sm:$0xff] }
 0x145   :  { %5719 = vmatprep.subr.bf16.mxu0 %v9444_v37  ;;  %5783 = vmatprep.subr.bf16.mxu1 %v9446_v36  ;;  %v514_v36 = vld [vmem:[%s11145_s4 + $0x800] sm:$0xff]  ;;  %v523_v37 = vld [vmem:[%s11145_s4 + $0x848] sm:$0xff]  ;;  %v9516_v49 = vpack.c.bf16 %v524_v2, %v515_v25  ;;  %v533_v19 = vld [vmem:[%s11145_s4 + $0x898] sm:$0xff] }
 0x146   :  { %11664 = vst [vmem:[#allocation136_spill] sm:$0xff] %v9482_v35  ;;  %11665 = vst [vmem:[#allocation137_spill] sm:$0xff] %v9504_v21  ;;  %v535_v25 = vld [vmem:[%s11145_s4 + $0x8a8] sm:$0xff]  ;;  %v544_v2 = vld [vmem:[%s11145_s4 + $0x8f0] sm:$0xff] }
 0x147   :  { %11666 = vst [vmem:[#allocation138_spill] sm:$0xff] %v9506_v7  ;;  %11667 = vst [vmem:[#allocation139_spill] sm:$0xff] %v9516_v49 }
 0x148   :  { %5721 = vmatpush1.bf16.msra.mxu0 %v9468_v0  ;;  %5785 = vmatpush1.bf16.msra.mxu1 %v9470_v10  ;;  %v9518_v0 = vpack.c.bf16 %v526_v39, %v517_v43  ;;  %v9540_v43 = vpack.c.bf16 %v523_v37, %v514_v36  ;;  %v9542_v39 = vpack.c.bf16 %v525_v48, %v516_v27  ;;  %v534_v37 = vld [vmem:[%s11145_s4 + $0x8a0] sm:$0xff]  ;;  %v543_v36 = vld [vmem:[%s11145_s4 + $0x8e8] sm:$0xff] }
 0x149   :  { %5723 = vmatprep.subr.bf16.mxu0 %v9480_v63  ;;  %5787 = vmatprep.subr.bf16.mxu1 %v9482_v35  ;;  %v532_v35 = vld [vmem:[%s11145_s4 + $0x890] sm:$0xff]  ;;  %v9549_v63 = vpack.c.bf16 %v542_v58, %v533_v19  ;;  %v9551_v10 = vpack.c.bf16 %v544_v2, %v535_v25  ;;  %v410_v27 = vld [vmem:[%s11145_s4 + $0x4c0] sm:$0xff]  ;;  %v419_v48 = vld [vmem:[%s11145_s4 + $0x508] sm:$0xff]  ;;  %v9572_v58 = vpack.c.bf16 %v543_v36, %v534_v37 }
 0x14a   :  { %11668 = vst [vmem:[#allocation140_spill] sm:$0xff] %v9518_v0  ;;  %11669 = vst [vmem:[#allocation141_spill] sm:$0xff] %v9540_v43  ;;  %v9576_v25 = vpack.c.bf16 %v419_v48, %v410_v27  ;;  %v266_v2 = vld [vmem:[%s11145_s4 + $0x40] sm:$0xff]  ;;  %v284_v27 = vld [vmem:[%s11145_s4 + $0xd0] sm:$0xff] }
 0x14b   :  { %11670 = vst [vmem:[#allocation142_spill] sm:$0xff] %v9542_v39  ;;  %11671 = vst [vmem:[#allocation143_spill] sm:$0xff] %v9549_v63  ;;  %v293_v48 = vld [vmem:[%s11145_s4 + $0x118] sm:$0xff] }
 0x14c   :  { %5725 = vmatpush1.bf16.msra.mxu0 %v9504_v21  ;;  %5789 = vmatpush1.bf16.msra.mxu1 %v9506_v7  ;;  %11672 = vst [vmem:[#allocation144_spill] sm:$0xff] %v9551_v10  ;;  %v541_v7 = vld [vmem:[%s11145_s4 + $0x8d8] sm:$0xff]  ;;  %11674 = vst [vmem:[#allocation146_spill] sm:$0xff] %v9572_v58 }
 0x14d   :  { %5727 = vmatprep.subr.bf16.mxu0 %v9516_v49  ;;  %5791 = vmatprep.subr.bf16.mxu1 %v9518_v0  ;;  %v9570_v19 = vpack.c.bf16 %v541_v7, %v532_v35  ;;  %11675 = vst [vmem:[#allocation147_spill] sm:$0xff] %v9576_v25  ;;  %v428_v35 = vld [vmem:[%s11145_s4 + $0x550] sm:$0xff]  ;;  %v437_v7 = vld [vmem:[%s11145_s4 + $0x598] sm:$0xff] }
 0x14e   :  { %v9595_v36 = vpack.c.bf16 %v437_v7, %v428_v35  ;;  %v302_v7 = vld [vmem:[%s11145_s4 + $0x160] sm:$0xff] }
 0x14f   :  { %11673 = vst [vmem:[#allocation145_spill] sm:$0xff] %v9570_v19 }
 0x150   :  { %5729 = vmatpush1.bf16.msra.mxu0 %v9540_v43  ;;  %5793 = vmatpush1.bf16.msra.mxu1 %v9542_v39  ;;  %v275_v43 = vld [vmem:[%s11145_s4 + $0x88] sm:$0xff]  ;;  %11677 = vst [vmem:[#allocation149_spill] sm:$0xff] %v9595_v36 }
 0x151   :  { %5731 = vmatprep.subr.bf16.mxu0 %v9549_v63  ;;  %5795 = vmatprep.subr.bf16.mxu1 %v9551_v10  ;;  %v9592_v37 = vpack.c.bf16 %v275_v43, %v266_v2  ;;  %v11678_v10 = vmov 0.0|0.0   ;;  %v455_v43 = vld [vmem:[%s11145_s4 + $0x628] sm:$0xff]  ;;  %v9613_v2 = vpack.c.bf16 %v293_v48, %v284_v27  ;;  %v464_v27 = vld [vmem:[%s11145_s4 + $0x670] sm:$0xff]  ;;  %v473_v48 = vld [vmem:[%s11145_s4 + $0x6b8] sm:$0xff] }
 0x153   :  { %11676 = vst [vmem:[#allocation148_spill] sm:$0xff] %v9592_v37  ;;  %11679 = vst [vmem:[#allocation150_spill] sm:$0xff] %v9613_v2 }
 0x154   :  { %5733 = vmatpush1.bf16.msra.mxu0 %v9570_v19  ;;  %5797 = vmatpush1.bf16.msra.mxu1 %v9572_v58  ;;  %v446_v58 = vld [vmem:[%s11145_s4 + $0x5e0] sm:$0xff] }
 0x155   :  { %5799 = vmatprep.subr.bf16.mxu0 %v9576_v25  ;;  %5846 = vmatprep.subr.bf16.mxu1 %v11678_v10  ;;  %v9617_v35 = vpack.c.bf16 %v455_v43, %v446_v58  ;;  %v311_v25 = vld [vmem:[%s11145_s4 + $0x1a8] sm:$0xff]  ;;  %v9639_v43 = vpack.c.bf16 %v473_v48, %v464_v27  ;;  %v338_v48 = vld [vmem:[%s11145_s4 + $0x280] sm:$0xff] }
 0x156   :  { %v9636_v58 = vpack.c.bf16 %v311_v25, %v302_v7  ;;  %v491_v25 = vld [vmem:[%s11145_s4 + $0x748] sm:$0xff] }
 0x157   :  { %753 = vmatmul.mubr.f32.vlgmr.msra.gmra.mrb[2].mxu0 %v9042_v50  ;;  %824 = vmatmul.mubr.f32.vlgmr.msra.gmra.mrb[6].mxu1 %v9042_v50  ;;  %11680 = vst [vmem:[#allocation151_spill] sm:$0xff] %v9617_v35  ;;  %11682 = vst [vmem:[#allocation153_spill] sm:$0xff] %v9639_v43 }
 0x158   :  { %5801 = vmatpush3.bf16.msra.mxu0 %v9592_v37  ;;  %894 = vmatprep.mubr.f32.mxu0 %v11620_v54  ;;  %11681 = vst [vmem:[#allocation152_spill] sm:$0xff] %v9636_v58 }
 0x159   :  { %5803 = vmatprep.subr.bf16.mxu0 %v9595_v36  ;;  %5848 = vmatpush3.bf16.msra.mxu1 %v8395_v45  ;;  %v320_v45 = vld [vmem:[%s11145_s4 + $0x1f0] sm:$0xff]  ;;  %v329_v36 = vld [vmem:[%s11145_s4 + $0x238] sm:$0xff] }
 0x15a   :  { %5849 = vmatprep.subr.bf16.mxu1 %v11678_v10  ;;  %5355 = vmatprep.mubr.msk.f32.mxu1 %vm8202_vm1, %v11620_v54  ;;  %v9656_v7 = vpack.c.bf16 %v329_v36, %v320_v45  ;;  %v509_v45 = vld [vmem:[%s11145_s4 + $0x7d8] sm:$0xff] }
 0x15c   :  { %5805 = vmatpush3.bf16.msra.mxu0 %v9613_v2  ;;  %v482_v2 = vld [vmem:[%s11145_s4 + $0x700] sm:$0xff]  ;;  %11683 = vst [vmem:[#allocation154_spill] sm:$0xff] %v9656_v7 }
 0x15d   :  { %5807 = vmatprep.subr.bf16.mxu0 %v9617_v35  ;;  %5851 = vmatpush3.bf16.msra.mxu1 %v8430_v57  ;;  %v9659_v27 = vpack.c.bf16 %v491_v25, %v482_v2  ;;  %v347_v57 = vld [vmem:[%s11145_s4 + $0x2c8] sm:$0xff]  ;;  %v356_v25 = vld [vmem:[%s11145_s4 + $0x310] sm:$0xff] }
 0x15e   :  { %5852 = vmatprep.subr.bf16.mxu1 %v11678_v10  ;;  %v9676_v36 = vpack.c.bf16 %v347_v57, %v338_v48  ;;  %v527_v57 = vld [vmem:[%s11145_s4 + $0x868] sm:$0xff] }
 0x15f   :  { %11684 = vst [vmem:[#allocation155_spill] sm:$0xff] %v9659_v27 }
 0x160   :  { %5809 = vmatpush3.bf16.msra.mxu0 %v9636_v58  ;;  %v500_v58 = vld [vmem:[%s11145_s4 + $0x790] sm:$0xff]  ;;  %11685 = vst [vmem:[#allocation156_spill] sm:$0xff] %v9676_v36 }
 0x161   :  { %5811 = vmatprep.subr.bf16.mxu0 %v9639_v43  ;;  %5854 = vmatpush3.bf16.msra.mxu1 %v8448_v62  ;;  %v9679_v2 = vpack.c.bf16 %v509_v45, %v500_v58  ;;  %v365_v62 = vld [vmem:[%s11145_s4 + $0x358] sm:$0xff]  ;;  %v4893_v58 = vld [vmem:[%s11146_s0 + $0x2] sm:$0x3] }
 0x162   :  { %5855 = vmatprep.subr.bf16.mxu1 %v11678_v10  ;;  %v9699_v48 = vpack.c.bf16 %v365_v62, %v356_v25  ;;  %v536_v62 = vld [vmem:[%s11145_s4 + $0x8b0] sm:$0xff]  ;;  %v545_v25 = vld [vmem:[%s11145_s4 + $0x8f8] sm:$0xff] }
 0x163   :  { %11686 = vst [vmem:[#allocation157_spill] sm:$0xff] %v9679_v2 }
 0x164   :  { %5813 = vmatpush3.bf16.msra.mxu0 %v9656_v7  ;;  %v518_v7 = vld [vmem:[%s11145_s4 + $0x820] sm:$0xff]  ;;  %11687 = vst [vmem:[#allocation158_spill] sm:$0xff] %v9699_v48 }
 0x165   :  { %5815 = vmatprep.subr.bf16.mxu0 %v9659_v27  ;;  %5857 = vmatpush3.bf16.msra.mxu1 %v8466_v5  ;;  %v9703_v45 = vpack.c.bf16 %v527_v57, %v518_v7  ;;  %v374_v5 = vld [vmem:[%s11145_s4 + $0x3a0] sm:$0xff]  ;;  %v9723_v57 = vpack.c.bf16 %v545_v25, %v536_v62  ;;  %v11696_v62 = vld [vmem:[#allocation65_spill] sm:$0xff] }
 0x166   :  { %5859 = vmatprep.subr.bf16.mxu1 %v8338_v26  ;;  %v383_v26 = vld [vmem:[%s11145_s4 + $0x3e8] sm:$0xff] }
 0x167   :  { %11688 = vst [vmem:[#allocation159_spill] sm:$0xff] %v9703_v45  ;;  %v9720_v7 = vpack.c.bf16 %v383_v26, %v374_v5  ;;  %11690 = vst [vmem:[#allocation161_spill] sm:$0xff] %v9723_v57  ;;  %v11693_v5 = vld [vmem:[#allocation63_spill] sm:$0xff] }
 0x168   :  { %5817 = vmatpush3.bf16.msra.mxu0 %v9676_v36  ;;  %5356 = vmatmul.mubr.msk.f32.vlgmr.msra.gmra.mrb[8].mxu1 %vm85_vm0, %v4893_v58  ;;  %v11697_v25 = vld [vmem:[#allocation67_spill] sm:$0xff] }
 0x169   :  { %5819 = vmatprep.subr.bf16.mxu0 %v9679_v2  ;;  %5861 = vmatpush1.bf16.msra.mxu1 %v8347_v29  ;;  %11689 = vst [vmem:[#allocation160_spill] sm:$0xff] %v9720_v7  ;;  %v392_v29 = vld [vmem:[%s11145_s4 + $0x430] sm:$0xff]  ;;  %v401_v2 = vld [vmem:[%s11145_s4 + $0x478] sm:$0xff] }
 0x16a   :  { %5863 = vmatprep.subr.bf16.mxu1 %v8358_v33  ;;  %v9734_v26 = vpack.c.bf16 %v401_v2, %v392_v29  ;;  %v11692_v29 = vld [vmem:[#allocation61_spill] sm:$0xff]  ;;  %v11694_v2 = vld [vmem:[#allocation34_spill] sm:$0xff] }
 0x16c   :  { %5821 = vmatpush3.bf16.msra.mxu0 %v9699_v48  ;;  %11691 = vst [vmem:[#allocation162_spill] sm:$0xff] %v9734_v26 }
 0x16d   :  { %5823 = vmatprep.subr.bf16.mxu0 %v9703_v45  ;;  %5865 = vmatpush1.bf16.msra.mxu1 %v8374_v38 }
 0x16e   :  { %5867 = vmatprep.subr.bf16.mxu1 %v8383_v41 }
 0x170   :  { %5825 = vmatpush3.bf16.msra.mxu0 %v9720_v7 }
 0x171   :  { %5827 = vmatprep.subr.bf16.mxu0 %v9723_v57  ;;  %5869 = vmatpush1.bf16.msra.mxu1 %v8411_v51 }
 0x172   :  { %5871 = vmatprep.subr.bf16.mxu1 %v8414_v52 }
 0x174   :  { %5829 = vmatpush3.bf16.msra.mxu0 %v9734_v26 }
 0x175   :  { %5831 = vmatprep.subr.bf16.mxu0 %v8274_v4  ;;  %5873 = vmatpush1.bf16.msra.mxu1 %v8442_v60 }
 0x176   :  { %5875 = vmatprep.subr.bf16.mxu1 %v8445_v61 }
 0x177   :  { %895 = vmatmul.mubr.f32.vlgmr.msra.gmra.mrb[4].mxu0 %v9042_v50 }
 0x178   :  { %5833 = vmatpush1.bf16.msra.mxu0 %v8285_v8  ;;  %988 = vmatprep.mubr.f32.mxu0 %v11620_v54 }
 0x179   :  { %5835 = vmatprep.subr.bf16.mxu0 %v8287_v9  ;;  %5877 = vmatpush1.bf16.msra.mxu1 %v8556_v47 }
 0x17a   :  { %5879 = vmatprep.subr.bf16.mxu1 %v8574_v56 }
 0x17c   :  { %5837 = vmatpush1.bf16.msra.mxu0 %v8303_v14 }
 0x17d   :  { %5839 = vmatprep.subr.bf16.mxu0 %v8306_v15  ;;  %5881 = vmatpush1.bf16.msra.mxu1 %v8587_v1 }
 0x17e   :  { %5883 = vmatprep.subr.bf16.mxu1 %v8610_v18 }
 0x180   :  { %5841 = vmatpush1.bf16.msra.mxu0 %v8321_v20 }
 0x181   :  { %5843 = vmatprep.subr.bf16.mxu0 %v8330_v23  ;;  %5885 = vmatpush1.bf16.msra.mxu1 %v8623_v28 }
 0x182   :  { %5887 = vmatprep.subr.bf16.mxu1 %v8646_v44 }
 0x184   :  { %5845 = vmatpush1.bf16.msra.mxu0 %v8356_v32 }
 0x185   :  { %5923 = vmatprep.subr.bf16.mxu0 %v8469_v6  ;;  %5889 = vmatpush1.bf16.msra.mxu1 %v8659_v55 }
 0x186   :  { %5891 = vmatprep.subr.bf16.mxu1 %v8682_v12 }
 0x187   :  { %4894 = vmatmul.mubr.msk.f32.vlgmr.msra.gmra.mrb[0].mxu0 %vm85_vm0, %v4893_v58  ;;  %v11695_v58 = vld [vmem:[#allocation36_spill] sm:$0xff] }
 0x188   :  { %5925 = vmatpush1.bf16.msra.mxu0 %v8484_v13 }
 0x189   :  { %5927 = vmatprep.subr.bf16.mxu0 %v8487_v16  ;;  %5893 = vmatpush1.bf16.msra.mxu1 %v8695_v30 }
 0x18a   :  { %5895 = vmatprep.subr.bf16.mxu1 %v8718_v53 }
 0x18c   :  { %5929 = vmatpush1.bf16.msra.mxu0 %v8503_v22 }
 0x18d   :  { %5931 = vmatprep.subr.bf16.mxu0 %v8507_v24  ;;  %5897 = vmatpush1.bf16.msra.mxu1 %v8731_v11 }
 0x18e   :  { %5899 = vmatprep.subr.bf16.mxu1 %v8754_v46 }
 0x190   :  { %5933 = vmatpush1.bf16.msra.mxu0 %v8522_v31 }
 0x191   :  { %5935 = vmatprep.subr.bf16.mxu0 %v8525_v34  ;;  %5901 = vmatpush1.bf16.msra.mxu1 %v8767_v17  ;;  %v11698_v34 = vld [vmem:[#allocation38_spill] sm:$0xff]  ;;  %v11699_v17 = vld [vmem:[#allocation40_spill] sm:$0xff] }
 0x192   :  { %5903 = vmatprep.subr.bf16.mxu1 %v8790_v59  ;;  %v11700_v59 = vld [vmem:[#allocation69_spill] sm:$0xff] }
 0x194   :  { %5937 = vmatpush1.bf16.msra.mxu0 %v8540_v40  ;;  %v11701_v40 = vld [vmem:[#allocation71_spill] sm:$0xff] }
 0x195   :  { %5939 = vmatprep.subr.bf16.mxu0 %v8543_v42  ;;  %5905 = vmatpush1.bf16.msra.mxu1 %v11692_v29  ;;  %v11702_v42 = vld [vmem:[#allocation42_spill] sm:$0xff]  ;;  %v11703_v29 = vld [vmem:[#allocation44_spill] sm:$0xff] }
 0x196   :  { %5907 = vmatprep.subr.bf16.mxu1 %v11693_v5  ;;  %v11704_v5 = vld [vmem:[#allocation73_spill] sm:$0xff] }
 0x198   :  { %5941 = vmatpush1.bf16.msra.mxu0 %v11694_v2  ;;  %v11705_v2 = vld [vmem:[#allocation75_spill] sm:$0xff] }
 0x199   :  { %5943 = vmatprep.subr.bf16.mxu0 %v11695_v58  ;;  %5909 = vmatpush1.bf16.msra.mxu1 %v11696_v62  ;;  %v11706_v58 = vld [vmem:[#allocation46_spill] sm:$0xff]  ;;  %v11707_v62 = vld [vmem:[#allocation48_spill] sm:$0xff] }
 0x19a   :  { %5911 = vmatprep.subr.bf16.mxu1 %v11697_v25  ;;  %v11708_v25 = vld [vmem:[#allocation77_spill] sm:$0xff] }
 0x19c   :  { %5945 = vmatpush1.bf16.msra.mxu0 %v11698_v34  ;;  %v11709_v34 = vld [vmem:[#allocation79_spill] sm:$0xff] }
 0x19d   :  { %5947 = vmatprep.subr.bf16.mxu0 %v11699_v17  ;;  %5913 = vmatpush1.bf16.msra.mxu1 %v11700_v59  ;;  %v11710_v17 = vld [vmem:[#allocation50_spill] sm:$0xff]  ;;  %v11711_v59 = vld [vmem:[#allocation52_spill] sm:$0xff] }
 0x19e   :  { %5915 = vmatprep.subr.bf16.mxu1 %v11701_v40  ;;  %v11712_v40 = vld [vmem:[#allocation54_spill] sm:$0xff] }
 0x1a0   :  { %5949 = vmatpush1.bf16.msra.mxu0 %v11702_v42  ;;  %v11713_v42 = vld [vmem:[#allocation56_spill] sm:$0xff] }
 0x1a1   :  { %5951 = vmatprep.subr.bf16.mxu0 %v11703_v29  ;;  %5917 = vmatpush1.bf16.msra.mxu1 %v11704_v5  ;;  %v11714_v29 = vld [vmem:[#allocation58_spill] sm:$0xff]  ;;  %v11715_v5 = vld [vmem:[#allocation60_spill] sm:$0xff] }
 0x1a2   :  { %5919 = vmatprep.subr.bf16.mxu1 %v11705_v2  ;;  %v11716_v2 = vld [vmem:[#allocation62_spill] sm:$0xff] }
 0x1a4   :  { %5953 = vmatpush1.bf16.msra.mxu0 %v11706_v58  ;;  %v11717_v58 = vld [vmem:[#allocation64_spill] sm:$0xff] }
 0x1a5   :  { %5955 = vmatprep.subr.bf16.mxu0 %v11707_v62  ;;  %5921 = vmatpush1.bf16.msra.mxu1 %v11708_v25  ;;  %v11718_v62 = vld [vmem:[#allocation66_spill] sm:$0xff]  ;;  %v11719_v25 = vld [vmem:[#allocation68_spill] sm:$0xff] }
 0x1a6   :  { %5987 = vmatprep.subr.bf16.mxu1 %v11709_v34  ;;  %v11720_v34 = vld [vmem:[#allocation70_spill] sm:$0xff] }
 0x1a8   :  { %5957 = vmatpush1.bf16.msra.mxu0 %v11710_v17  ;;  %v11721_v17 = vld [vmem:[#allocation72_spill] sm:$0xff] }
 0x1a9   :  { %5959 = vmatprep.subr.bf16.mxu0 %v11711_v59  ;;  %v11722_v59 = vld [vmem:[#allocation74_spill] sm:$0xff] }
 0x1ac   :  { %5961 = vmatpush1.bf16.msra.mxu0 %v11712_v40  ;;  %v11723_v40 = vld [vmem:[#allocation76_spill] sm:$0xff] }
 0x1ad   :  { %5963 = vmatprep.subr.bf16.mxu0 %v11713_v42  ;;  %v11724_v42 = vld [vmem:[#allocation78_spill] sm:$0xff] }
 0x1b0   :  { %5965 = vmatpush1.bf16.msra.mxu0 %v11714_v29  ;;  %v11725_v29 = vld [vmem:[#allocation80_spill] sm:$0xff] }
 0x1b1   :  { %5967 = vmatprep.subr.bf16.mxu0 %v11715_v5 }
 0x1b4   :  { %5969 = vmatpush1.bf16.msra.mxu0 %v11716_v2 }
 0x1b5   :  { %5971 = vmatprep.subr.bf16.mxu0 %v11717_v58  ;;  %v11726_v58 = vld [vmem:[#allocation81_spill] sm:$0xff] }
 0x1b8   :  { %5973 = vmatpush1.bf16.msra.mxu0 %v11718_v62  ;;  %v42_v62 = vld [vmem:[%s11149_s5] sm:$0x7] }
 0x1b9   :  { %5975 = vmatprep.subr.bf16.mxu0 %v11719_v25  ;;  %v11727_v25 = vsub.s32 0, %v11726_v58 }
 0x1bb   :  { %v9815_v31 = vrot.slane %v42_v62, %v11727_v25 }
 0x1bc   :  { %5977 = vmatpush1.bf16.msra.mxu0 %v11720_v34 }
 0x1bd   :  { %5979 = vmatprep.subr.bf16.mxu0 %v11721_v17  ;;  %11728 = vst [vmem:[#allocation81_spill] sm:$0xff] %v9815_v31  ;;  %v11729_v17 = vsub.s32 1, %v11726_v58 }
 0x1bf   :  { %v9819_v34 = vrot.slane %v42_v62, %v11729_v17 }
 0x1c0   :  { %5981 = vmatpush1.bf16.msra.mxu0 %v11722_v59 }
 0x1c1   :  { %5983 = vmatprep.subr.bf16.mxu0 %v11723_v40  ;;  %11730 = vst [vmem:[#allocation163_spill] sm:$0xff] %v9819_v34 }
 0x1c4   :  { %5985 = vmatpush1.bf16.msra.mxu0 %v11724_v42 }
 0x1c5   :  { %6051 = vmatprep.subr.bf16.mxu0 %v11725_v29 }
 0x1ea   :  { %v683_v5 = vpop.f32.mrb[4].mxu1 }
 0x1eb   :  { %v685_v2 = vpop.f32.mrb[5].mxu1 }
 0x1ec   :  { %v916_v40 = vadd.f32 %v9815_v31, %v685_v2  ;;  %v9826_v2 = vld [vmem:[%s11150_s6] ss:$0 sm:$0xff] }
 0x22a   :  { %v754_v59 = vpop.f32.mrb[2].mxu0  ;;  %v825_v42 = vpop.f32.mrb[6].mxu1 }
 0x22b   :  { %v917_v29 = vadd.f32 %v9819_v34, %v754_v59  ;;  %v1087_v46 = vadd.f32 %v916_v40, %v825_v42  ;;  %v756_v11 = vpop.f32.mrb[3].mxu0  ;;  %v827_v24 = vpop.f32.mrb[7].mxu1  ;;  %v11731_v42 = vsub.s32 2, %v11726_v58  ;;  %v11732_v34 = vld [vmem:[#allocation82_spill] sm:$0xff] }
 0x22d   :  { %v1088_v22 = vadd.f32 %v917_v29, %v827_v24  ;;  %v4898_v53 = vmul.f32 -1.442695, %v1087_v46  ;;  %v9830_v24 = vrot.slane %v42_v62, %v11731_v42  ;;  %v11733_v42 = vld [vmem:[#allocation83_spill] sm:$0xff] }
 0x22f   :  { %8046 = vpow2.f32 %v4898_v53  ;;  %v4899_v30 = vmul.f32 -1.442695, %v1088_v22 }
 0x231   :  { %8048 = vpow2.f32 %v4899_v30 }
 0x239   :  { %v8047_v13 = vpop.eup %8046 }
 0x23a   :  { %v1095_v12 = vadd.f32 1.0, %v8047_v13  ;;  %v918_v13 = vadd.f32 %v9830_v24, %v756_v11 }
 0x23b   :  { %v1061_v16 = vpop.f32.mrb[8].mxu1  ;;  %v8049_v17 = vpop.eup %8048 }
 0x23c   :  { %v5357_v25 = vpop.f32.mrb[9].mxu1  ;;  %8050 = vrcp.f32 %v1095_v12  ;;  %v1096_v53 = vadd.f32 1.0, %v8049_v17 }
 0x23e   :  { %8052 = vrcp.f32 %v1096_v53 }
 0x246   :  { %v8051_v59 = vpop.eup %8050 }
 0x248   :  { %v8053_v29 = vpop.eup %8052 }
 0x249   :  { %v1111_v32 = vsub.f32 1.0, %v8053_v29 }
 0x24a   :  { %v4989_v55 = vpop.f32.mrb[4].mxu0 }
 0x24b   :  { %v4990_v40 = vpop.f32.mrb[5].mxu0 }
 0x24c   :  { %v4991_v22 = vadd.f32 %v4990_v40, %v4989_v55  ;;  %v1113_v55 = vmul.f32 0.0, %v8053_v29 }
 0x24e   :  { %v1107_v46 = vadd.f32 %v4991_v22, %v9826_v2 }
 0x250   :  { %v1108_v12 = vmul.f32 %v8051_v59, %v1107_v46 }
 0x252   :  { %v1109_v30 = vadd.f32 %v1108_v12, %v918_v13 }
 0x254   :  { %8054 = vtanh.f32 %v1109_v30  ;;  %v11735_v30 = vld [vmem:[#allocation84_spill] sm:$0xff] }
 0x25a   :  { %v990_v25 = vpop.f32.mrb[0].mxu0 }
 0x25b   :  { %v991_v31 = vadd.f32 %v990_v25, %v11732_v34  ;;  %v992_v6 = vpop.f32.mrb[1].mxu0 }
 0x25c   :  { %v993_v17 = vadd.f32 %v992_v6, %v11733_v42  ;;  %v1062_v6 = vadd.f32 %v1061_v16, %v11735_v30  ;;  %v11736_v16 = vld [vmem:[#allocation86_spill] sm:$0xff] }
 0x25d   :  { %v4896_v58 = vmul.f32 -1.442695, %v991_v31  ;;  %v11734_v31 = vld [vmem:[#allocation85_spill] sm:$0xff] }
 0x25e   :  { %v8055_v62 = vpop.eup %8054  ;;  %v4897_v11 = vmul.f32 -1.442695, %v993_v17  ;;  %v1079_v12 = vadd.f32 %v11734_v31, %v683_v5  ;;  %v11737_v5 = vld [vmem:[#allocation87_spill] sm:$0xff]  ;;  %v11743_v31 = vld [vmem:[#allocation93_spill] sm:$0xff] }
 0x25f   :  { %v1112_v40 = vmul.f32 %v8055_v62, %v1111_v32  ;;  %8056 = vpow2.f32 %v4896_v58 }
 0x260   :  { %8058 = vpow2.f32 %v4897_v11 }
 0x261   :  { %v9836_v22 = vadd.f32 %v1113_v55, %v1112_v40 }
 0x263   :  { %1179 = vmatprep.mubr.f32.mxu1 %v9836_v22  ;;  %1250 = vmatprep.mubr.f32.mxu0 %v9836_v22 }
 0x269   :  { %v8057_v53 = vpop.eup %8056 }
 0x26a   :  { %v1073_v46 = vadd.f32 1.0, %v8057_v53  ;;  %v8059_v59 = vpop.eup %8058  ;;  %v11738_v53 = vld [vmem:[#allocation88_spill] sm:$0xff] }
 0x26b   :  { %v1074_v13 = vadd.f32 1.0, %v8059_v59  ;;  %v11741_v59 = vld [vmem:[#allocation91_spill] sm:$0xff] }
 0x26c   :  { %8060 = vrcp.f32 %v1073_v46  ;;  %v11740_v46 = vld [vmem:[#allocation90_spill] sm:$0xff] }
 0x26d   :  { %8062 = vrcp.f32 %v1074_v13  ;;  %v11742_v13 = vld [vmem:[#allocation92_spill] sm:$0xff] }
 0x276   :  { %v8061_v29 = vpop.eup %8060 }
 0x277   :  { %v1080_v32 = vmul.f32 %v8061_v29, %v1079_v12  ;;  %v8063_v58 = vpop.eup %8062  ;;  %v11744_v12 = vld [vmem:[#allocation94_spill] sm:$0xff]  ;;  %v11746_v29 = vld [vmem:[#allocation96_spill] sm:$0xff] }
 0x278   :  { %v1083_v62 = vsub.f32 1.0, %v8063_v58  ;;  %v1085_v55 = vmul.f32 %v8063_v58, %v9042_v50  ;;  %v11739_v50 = vld [vmem:[#allocation89_spill] sm:$0xff]  ;;  %v11749_v58 = vld [vmem:[#allocation99_spill] sm:$0xff] }
 0x279   :  { %v1081_v25 = vadd.f32 %v1080_v32, %v1062_v6  ;;  %v11745_v6 = vld [vmem:[#allocation95_spill] sm:$0xff]  ;;  %v11747_v32 = vld [vmem:[#allocation97_spill] sm:$0xff] }
 0x27b   :  { %8064 = vtanh.f32 %v1081_v25  ;;  %v11748_v25 = vld [vmem:[#allocation98_spill] sm:$0xff] }
 0x285   :  { %v8065_v17 = vpop.eup %8064 }
 0x286   :  { %v1084_v40 = vmul.f32 %v8065_v17, %v1083_v62  ;;  %v11750_v62 = vld [vmem:[#allocation100_spill] sm:$0xff]  ;;  %v11751_v17 = vld [vmem:[#allocation101_spill] sm:$0xff] }
 0x288   :  { %v9843_v11 = vadd.f32 %v1085_v55, %v1084_v40  ;;  %v11752_v55 = vld [vmem:[#allocation102_spill] sm:$0xff]  ;;  %v11753_v40 = vld [vmem:[#allocation103_spill] sm:$0xff] }
 0x28a   :  { %1180 = vmatmul.mubr.f32.vlgmr.msra.gmra.mrb[10].mxu1 %v9843_v11  ;;  %1251 = vmatmul.mubr.f32.vlgmr.msra.gmra.mrb[6].mxu0 %v9843_v11 }
 0x28b   :  { %5989 = vmatpush1.bf16.msra.mxu1 %v9032_v3  ;;  %6053 = vmatpush1.bf16.msra.mxu0 %v11736_v16 }
 0x28c   :  { %1321 = vmatprep.mubr.f32.mxu1 %v9836_v22  ;;  %1392 = vmatprep.mubr.f32.mxu0 %v9836_v22 }
 0x28d   :  { %5991 = vmatprep.subr.bf16.mxu1 %v11737_v5  ;;  %6055 = vmatprep.subr.bf16.mxu0 %v11738_v53 }
 0x28f   :  { %5993 = vmatpush1.bf16.msra.mxu1 %v11739_v50  ;;  %6057 = vmatpush1.bf16.msra.mxu0 %v11740_v46 }
 0x290   :  { %5995 = vmatprep.subr.bf16.mxu1 %v11741_v59  ;;  %6059 = vmatprep.subr.bf16.mxu0 %v11742_v13 }
 0x293   :  { %5997 = vmatpush1.bf16.msra.mxu1 %v11743_v31  ;;  %6061 = vmatpush1.bf16.msra.mxu0 %v11744_v12  ;;  %v11754_v31 = vld [vmem:[#allocation104_spill] sm:$0xff]  ;;  %v11755_v12 = vld [vmem:[#allocation105_spill] sm:$0xff] }
 0x294   :  { %5999 = vmatprep.subr.bf16.mxu1 %v11745_v6  ;;  %6063 = vmatprep.subr.bf16.mxu0 %v11746_v29  ;;  %v11756_v6 = vld [vmem:[#allocation106_spill] sm:$0xff]  ;;  %v11757_v29 = vld [vmem:[#allocation107_spill] sm:$0xff] }
 0x297   :  { %6001 = vmatpush1.bf16.msra.mxu1 %v11747_v32  ;;  %6065 = vmatpush1.bf16.msra.mxu0 %v11748_v25  ;;  %v11758_v32 = vld [vmem:[#allocation108_spill] sm:$0xff]  ;;  %v11759_v25 = vld [vmem:[#allocation109_spill] sm:$0xff] }
 0x298   :  { %6003 = vmatprep.subr.bf16.mxu1 %v11749_v58  ;;  %6067 = vmatprep.subr.bf16.mxu0 %v11750_v62  ;;  %v11760_v58 = vld [vmem:[#allocation110_spill] sm:$0xff]  ;;  %v11761_v62 = vld [vmem:[#allocation111_spill] sm:$0xff] }
 0x29b   :  { %6005 = vmatpush1.bf16.msra.mxu1 %v11751_v17  ;;  %6069 = vmatpush1.bf16.msra.mxu0 %v11752_v55  ;;  %v11762_v17 = vld [vmem:[#allocation112_spill] sm:$0xff]  ;;  %v11763_v55 = vld [vmem:[#allocation113_spill] sm:$0xff] }
 0x29c   :  { %6007 = vmatprep.subr.bf16.mxu1 %v11753_v40  ;;  %6071 = vmatprep.subr.bf16.mxu0 %v11754_v31  ;;  %v11764_v40 = vld [vmem:[#allocation114_spill] sm:$0xff]  ;;  %v11765_v31 = vld [vmem:[#allocation115_spill] sm:$0xff] }
 0x29f   :  { %6009 = vmatpush1.bf16.msra.mxu1 %v11755_v12  ;;  %6073 = vmatpush1.bf16.msra.mxu0 %v11756_v6  ;;  %v11766_v12 = vld [vmem:[#allocation116_spill] sm:$0xff]  ;;  %v11767_v6 = vld [vmem:[#allocation117_spill] sm:$0xff] }
 0x2a0   :  { %6011 = vmatprep.subr.bf16.mxu1 %v11757_v29  ;;  %6075 = vmatprep.subr.bf16.mxu0 %v11758_v32  ;;  %v11768_v29 = vld [vmem:[#allocation118_spill] sm:$0xff]  ;;  %v11769_v32 = vld [vmem:[#allocation119_spill] sm:$0xff] }
 0x2a3   :  { %6013 = vmatpush1.bf16.msra.mxu1 %v11759_v25  ;;  %6077 = vmatpush1.bf16.msra.mxu0 %v11760_v58  ;;  %v11770_v25 = vld [vmem:[#allocation120_spill] sm:$0xff]  ;;  %v11771_v58 = vld [vmem:[#allocation121_spill] sm:$0xff] }
 0x2a4   :  { %6015 = vmatprep.subr.bf16.mxu1 %v11761_v62  ;;  %6079 = vmatprep.subr.bf16.mxu0 %v11762_v17  ;;  %v11772_v62 = vld [vmem:[#allocation122_spill] sm:$0xff]  ;;  %v11773_v17 = vld [vmem:[#allocation123_spill] sm:$0xff] }
 0x2a7   :  { %6017 = vmatpush1.bf16.msra.mxu1 %v11763_v55  ;;  %6081 = vmatpush1.bf16.msra.mxu0 %v11764_v40  ;;  %v11774_v55 = vld [vmem:[#allocation124_spill] sm:$0xff]  ;;  %v11775_v40 = vld [vmem:[#allocation125_spill] sm:$0xff] }
 0x2a8   :  { %6019 = vmatprep.subr.bf16.mxu1 %v11765_v31  ;;  %6083 = vmatprep.subr.bf16.mxu0 %v11766_v12  ;;  %v11776_v31 = vld [vmem:[#allocation126_spill] sm:$0xff]  ;;  %v11777_v12 = vld [vmem:[#allocation127_spill] sm:$0xff] }
 0x2ab   :  { %6021 = vmatpush1.bf16.msra.mxu1 %v11767_v6  ;;  %6085 = vmatpush1.bf16.msra.mxu0 %v11768_v29  ;;  %v11778_v6 = vld [vmem:[#allocation128_spill] sm:$0xff]  ;;  %v11779_v29 = vld [vmem:[#allocation129_spill] sm:$0xff] }
 0x2ac   :  { %6023 = vmatprep.subr.bf16.mxu1 %v11769_v32  ;;  %6087 = vmatprep.subr.bf16.mxu0 %v11770_v25  ;;  %v11780_v32 = vld [vmem:[#allocation130_spill] sm:$0xff]  ;;  %v11781_v25 = vld [vmem:[#allocation131_spill] sm:$0xff] }
 0x2af   :  { %6025 = vmatpush1.bf16.msra.mxu1 %v11771_v58  ;;  %6089 = vmatpush1.bf16.msra.mxu0 %v11772_v62  ;;  %v11782_v58 = vld [vmem:[#allocation132_spill] sm:$0xff]  ;;  %v11783_v62 = vld [vmem:[#allocation133_spill] sm:$0xff] }
 0x2b0   :  { %6027 = vmatprep.subr.bf16.mxu1 %v11773_v17  ;;  %6091 = vmatprep.subr.bf16.mxu0 %v11774_v55  ;;  %v11784_v17 = vld [vmem:[#allocation134_spill] sm:$0xff]  ;;  %v11785_v55 = vld [vmem:[#allocation135_spill] sm:$0xff] }
 0x2b3   :  { %6029 = vmatpush1.bf16.msra.mxu1 %v11775_v40  ;;  %6093 = vmatpush1.bf16.msra.mxu0 %v11776_v31  ;;  %v11786_v40 = vld [vmem:[#allocation136_spill] sm:$0xff] }
 0x2b4   :  { %6031 = vmatprep.subr.bf16.mxu1 %v11777_v12  ;;  %6095 = vmatprep.subr.bf16.mxu0 %v11778_v6  ;;  %v11787_v12 = vld [vmem:[#allocation138_spill] sm:$0xff] }
 0x2b7   :  { %6033 = vmatpush1.bf16.msra.mxu1 %v11779_v29  ;;  %6097 = vmatpush1.bf16.msra.mxu0 %v11780_v32  ;;  %v11788_v32 = vld [vmem:[#allocation141_spill] sm:$0xff] }
 0x2b8   :  { %6035 = vmatprep.subr.bf16.mxu1 %v11781_v25  ;;  %6099 = vmatprep.subr.bf16.mxu0 %v11782_v58 }
 0x2bb   :  { %6037 = vmatpush1.bf16.msra.mxu1 %v11783_v62  ;;  %6101 = vmatpush1.bf16.msra.mxu0 %v11784_v17  ;;  %v11789_v62 = vld [vmem:[#allocation144_spill] sm:$0xff] }
 0x2bc   :  { %6039 = vmatprep.subr.bf16.mxu1 %v11785_v55  ;;  %6103 = vmatprep.subr.bf16.mxu0 %v11786_v40  ;;  %v11790_v55 = vld [vmem:[#allocation146_spill] sm:$0xff]  ;;  %v11791_v40 = vld [vmem:[#allocation147_spill] sm:$0xff] }
 0x2bf   :  { %6041 = vmatpush1.bf16.msra.mxu1 %v9504_v21  ;;  %6105 = vmatpush1.bf16.msra.mxu0 %v11787_v12 }
 0x2c0   :  { %6043 = vmatprep.subr.bf16.mxu1 %v9516_v49  ;;  %6107 = vmatprep.subr.bf16.mxu0 %v9518_v0 }
 0x2c3   :  { %6045 = vmatpush1.bf16.msra.mxu1 %v11788_v32  ;;  %6109 = vmatpush1.bf16.msra.mxu0 %v9542_v39  ;;  %v11792_v39 = vld [vmem:[#allocation149_spill] sm:$0xff] }
 0x2c4   :  { %6047 = vmatprep.subr.bf16.mxu1 %v9549_v63  ;;  %6111 = vmatprep.subr.bf16.mxu0 %v11789_v62  ;;  %v11793_v63 = vld [vmem:[#allocation16_spill] sm:$0xff] }
 0x2c7   :  { %6049 = vmatpush1.bf16.msra.mxu1 %v9570_v19  ;;  %6113 = vmatpush1.bf16.msra.mxu0 %v11790_v55  ;;  %v11795_v55 = vld [vmem:[#allocation19_spill] sm:$0xff] }
 0x2c8   :  { %6115 = vmatprep.subr.bf16.mxu1 %v11791_v40  ;;  %6162 = vmatprep.subr.bf16.mxu0 %v11678_v10  ;;  %v11794_v40 = vld [vmem:[#allocation150_spill] sm:$0xff]  ;;  %v11799_v19 = vld [vmem:[#allocation23_spill] sm:$0xff] }
 0x2ca   :  { %1322 = vmatmul.mubr.f32.vlgmr.msra.gmra.mrb[12].mxu1 %v9843_v11  ;;  %1393 = vmatmul.mubr.f32.vlgmr.msra.gmra.mrb[8].mxu0 %v9843_v11 }
 0x2cb   :  { %6117 = vmatpush3.bf16.msra.mxu1 %v9592_v37  ;;  %1463 = vmatprep.mubr.f32.mxu1 %v9836_v22  ;;  %v11796_v37 = vld [vmem:[#allocation152_spill] sm:$0xff] }
 0x2cc   :  { %6119 = vmatprep.subr.bf16.mxu1 %v11792_v39  ;;  %6164 = vmatpush3.bf16.msra.mxu0 %v11793_v63  ;;  %v11797_v39 = vld [vmem:[#allocation22_spill] sm:$0xff] }
 0x2cd   :  { %6165 = vmatprep.subr.bf16.mxu0 %v11678_v10  ;;  %5374 = vmatprep.mubr.msk.f32.mxu0 %vm8202_vm1, %v11620_v54  ;;  %v11798_v63 = vld [vmem:[#allocation154_spill] sm:$0xff] }
 0x2cf   :  { %6121 = vmatpush3.bf16.msra.mxu1 %v11794_v40  ;;  %v11800_v40 = vld [vmem:[#allocation10_spill] sm:$0xff] }
 0x2d0   :  { %6123 = vmatprep.subr.bf16.mxu1 %v9617_v35  ;;  %6167 = vmatpush3.bf16.msra.mxu0 %v11795_v55  ;;  %v4901_v55 = vld [vmem:[%s11146_s0 + $0x4] sm:$0x3] }
 0x2d1   :  { %6168 = vmatprep.subr.bf16.mxu0 %v11678_v10 }
 0x2d3   :  { %6125 = vmatpush3.bf16.msra.mxu1 %v11796_v37 }
 0x2d4   :  { %6127 = vmatprep.subr.bf16.mxu1 %v9639_v43  ;;  %6170 = vmatpush3.bf16.msra.mxu0 %v11797_v39  ;;  %v11801_v43 = vld [vmem:[#allocation157_spill] sm:$0xff]  ;;  %v11802_v39 = vld [vmem:[#allocation11_spill] sm:$0xff] }
 0x2d5   :  { %6171 = vmatprep.subr.bf16.mxu0 %v11678_v10 }
 0x2d7   :  { %6129 = vmatpush3.bf16.msra.mxu1 %v11798_v63 }
 0x2d8   :  { %6131 = vmatprep.subr.bf16.mxu1 %v9659_v27  ;;  %6173 = vmatpush3.bf16.msra.mxu0 %v11799_v19 }
 0x2d9   :  { %6175 = vmatprep.subr.bf16.mxu0 %v11800_v40 }
 0x2db   :  { %6133 = vmatpush3.bf16.msra.mxu1 %v9676_v36  ;;  %5375 = vmatmul.mubr.msk.f32.vlgmr.msra.gmra.mrb[10].mxu0 %vm85_vm0, %v4901_v55 }
 0x2dc   :  { %6135 = vmatprep.subr.bf16.mxu1 %v11801_v43  ;;  %6177 = vmatpush1.bf16.msra.mxu0 %v11802_v39 }
 0x2dd   :  { %6179 = vmatprep.subr.bf16.mxu0 %v8358_v33 }
 0x2df   :  { %6137 = vmatpush3.bf16.msra.mxu1 %v9699_v48 }
 0x2e0   :  { %6139 = vmatprep.subr.bf16.mxu1 %v9703_v45  ;;  %6181 = vmatpush1.bf16.msra.mxu0 %v8374_v38 }
 0x2e1   :  { %6183 = vmatprep.subr.bf16.mxu0 %v8383_v41 }
 0x2e3   :  { %6141 = vmatpush3.bf16.msra.mxu1 %v9720_v7 }
 0x2e4   :  { %6143 = vmatprep.subr.bf16.mxu1 %v9723_v57  ;;  %6185 = vmatpush1.bf16.msra.mxu0 %v8411_v51 }
 0x2e5   :  { %6187 = vmatprep.subr.bf16.mxu0 %v8414_v52 }
 0x2e7   :  { %6145 = vmatpush3.bf16.msra.mxu1 %v9734_v26 }
 0x2e8   :  { %6147 = vmatprep.subr.bf16.mxu1 %v8274_v4  ;;  %6189 = vmatpush1.bf16.msra.mxu0 %v8442_v60 }
 0x2e9   :  { %6191 = vmatprep.subr.bf16.mxu0 %v8445_v61  ;;  %v11856_v61 = vld [vmem:[#allocation163_spill] sm:$0xff] }
 0x2ea   :  { %1464 = vmatmul.mubr.f32.vlgmr.msra.gmra.mrb[14].mxu1 %v9843_v11 }
 0x2eb   :  { %6149 = vmatpush1.bf16.msra.mxu1 %v8285_v8  ;;  %1541 = vmatprep.mubr.f32.mxu1 %v11620_v54 }
 0x2ec   :  { %6151 = vmatprep.subr.bf16.mxu1 %v8287_v9  ;;  %6193 = vmatpush1.bf16.msra.mxu0 %v8556_v47  ;;  %v11803_v9 = vld [vmem:[#allocation12_spill] sm:$0xff] }
 0x2ed   :  { %6195 = vmatprep.subr.bf16.mxu0 %v8574_v56  ;;  %v11804_v47 = vld [vmem:[#allocation24_spill] sm:$0xff]  ;;  %v11805_v56 = vld [vmem:[#allocation45_spill] sm:$0xff] }
 0x2ef   :  { %6153 = vmatpush1.bf16.msra.mxu1 %v8303_v14  ;;  %v11806_v14 = vld [vmem:[#allocation47_spill] sm:$0xff] }
 0x2f0   :  { %6155 = vmatprep.subr.bf16.mxu1 %v8306_v15  ;;  %6197 = vmatpush1.bf16.msra.mxu0 %v8587_v1  ;;  %v11807_v1 = vld [vmem:[#allocation25_spill] sm:$0xff] }
 0x2f1   :  { %6199 = vmatprep.subr.bf16.mxu0 %v8610_v18  ;;  %v11808_v18 = vld [vmem:[#allocation26_spill] sm:$0xff]  ;;  %v11855_v15 = vld [vmem:[#allocation81_spill] sm:$0xff] }
 0x2f3   :  { %6157 = vmatpush1.bf16.msra.mxu1 %v8321_v20  ;;  %v11809_v20 = vld [vmem:[#allocation49_spill] sm:$0xff] }
 0x2f4   :  { %6159 = vmatprep.subr.bf16.mxu1 %v8330_v23  ;;  %6201 = vmatpush1.bf16.msra.mxu0 %v8623_v28  ;;  %v11810_v23 = vld [vmem:[#allocation51_spill] sm:$0xff] }
 0x2f5   :  { %6203 = vmatprep.subr.bf16.mxu0 %v8646_v44  ;;  %v11811_v28 = vld [vmem:[#allocation27_spill] sm:$0xff]  ;;  %v11812_v44 = vld [vmem:[#allocation28_spill] sm:$0xff] }
 0x2f7   :  { %6161 = vmatpush1.bf16.msra.mxu1 %v11803_v9  ;;  %v11813_v9 = vld [vmem:[#allocation53_spill] sm:$0xff] }
 0x2f8   :  { %6239 = vmatprep.subr.bf16.mxu1 %v11804_v47  ;;  %6205 = vmatpush1.bf16.msra.mxu0 %v11805_v56  ;;  %v11814_v47 = vld [vmem:[#allocation55_spill] sm:$0xff]  ;;  %v11815_v56 = vld [vmem:[#allocation29_spill] sm:$0xff] }
 0x2f9   :  { %6207 = vmatprep.subr.bf16.mxu0 %v11806_v14  ;;  %v11816_v14 = vld [vmem:[#allocation30_spill] sm:$0xff] }
 0x2fa   :  { %4902 = vmatmul.mubr.msk.f32.vlgmr.msra.gmra.mrb[10].mxu1 %vm85_vm0, %v4901_v55  ;;  %v11817_v55 = vld [vmem:[#allocation57_spill] sm:$0xff] }
 0x2fb   :  { %6241 = vmatpush1.bf16.msra.mxu1 %v11807_v1  ;;  %v11818_v1 = vld [vmem:[#allocation59_spill] sm:$0xff] }
 0x2fc   :  { %6243 = vmatprep.subr.bf16.mxu1 %v11808_v18  ;;  %6209 = vmatpush1.bf16.msra.mxu0 %v11809_v20  ;;  %v11819_v18 = vld [vmem:[#allocation31_spill] sm:$0xff]  ;;  %v11820_v20 = vld [vmem:[#allocation32_spill] sm:$0xff] }
 0x2fd   :  { %6211 = vmatprep.subr.bf16.mxu0 %v11810_v23  ;;  %v11821_v23 = vld [vmem:[#allocation61_spill] sm:$0xff] }
 0x2ff   :  { %6245 = vmatpush1.bf16.msra.mxu1 %v11811_v28  ;;  %v11822_v28 = vld [vmem:[#allocation63_spill] sm:$0xff] }
 0x300   :  { %6247 = vmatprep.subr.bf16.mxu1 %v11812_v44  ;;  %6213 = vmatpush1.bf16.msra.mxu0 %v11813_v9  ;;  %v11823_v44 = vld [vmem:[#allocation34_spill] sm:$0xff]  ;;  %v11824_v9 = vld [vmem:[#allocation36_spill] sm:$0xff] }
 0x301   :  { %6215 = vmatprep.subr.bf16.mxu0 %v11814_v47  ;;  %v11825_v47 = vld [vmem:[#allocation65_spill] sm:$0xff] }
 0x303   :  { %6249 = vmatpush1.bf16.msra.mxu1 %v11815_v56  ;;  %v11826_v56 = vld [vmem:[#allocation67_spill] sm:$0xff] }
 0x304   :  { %6251 = vmatprep.subr.bf16.mxu1 %v11816_v14  ;;  %6217 = vmatpush1.bf16.msra.mxu0 %v11817_v55  ;;  %v11827_v14 = vld [vmem:[#allocation38_spill] sm:$0xff]  ;;  %v11828_v55 = vld [vmem:[#allocation40_spill] sm:$0xff] }
 0x305   :  { %6219 = vmatprep.subr.bf16.mxu0 %v11818_v1  ;;  %v11829_v1 = vld [vmem:[#allocation69_spill] sm:$0xff] }
 0x307   :  { %6253 = vmatpush1.bf16.msra.mxu1 %v11819_v18  ;;  %v11830_v18 = vld [vmem:[#allocation71_spill] sm:$0xff] }
 0x308   :  { %6255 = vmatprep.subr.bf16.mxu1 %v11820_v20  ;;  %6221 = vmatpush1.bf16.msra.mxu0 %v11821_v23  ;;  %v11831_v20 = vld [vmem:[#allocation42_spill] sm:$0xff]  ;;  %v11832_v23 = vld [vmem:[#allocation44_spill] sm:$0xff] }
 0x309   :  { %6223 = vmatprep.subr.bf16.mxu0 %v11822_v28  ;;  %v11833_v28 = vld [vmem:[#allocation73_spill] sm:$0xff] }
 0x30b   :  { %6257 = vmatpush1.bf16.msra.mxu1 %v11823_v44  ;;  %v11834_v44 = vld [vmem:[#allocation75_spill] sm:$0xff] }
 0x30c   :  { %6259 = vmatprep.subr.bf16.mxu1 %v11824_v9  ;;  %6225 = vmatpush1.bf16.msra.mxu0 %v11825_v47  ;;  %v11835_v9 = vld [vmem:[#allocation46_spill] sm:$0xff]  ;;  %v11836_v47 = vld [vmem:[#allocation48_spill] sm:$0xff] }
 0x30d   :  { %6227 = vmatprep.subr.bf16.mxu0 %v11826_v56  ;;  %v11837_v56 = vld [vmem:[#allocation77_spill] sm:$0xff] }
 0x30f   :  { %6261 = vmatpush1.bf16.msra.mxu1 %v11827_v14  ;;  %v11838_v14 = vld [vmem:[#allocation79_spill] sm:$0xff] }
 0x310   :  { %6263 = vmatprep.subr.bf16.mxu1 %v11828_v55  ;;  %6229 = vmatpush1.bf16.msra.mxu0 %v11829_v1  ;;  %v11839_v55 = vld [vmem:[#allocation50_spill] sm:$0xff]  ;;  %v11840_v1 = vld [vmem:[#allocation52_spill] sm:$0xff] }
 0x311   :  { %6231 = vmatprep.subr.bf16.mxu0 %v11830_v18  ;;  %v11841_v18 = vld [vmem:[#allocation54_spill] sm:$0xff] }
 0x313   :  { %6265 = vmatpush1.bf16.msra.mxu1 %v11831_v20  ;;  %v11842_v20 = vld [vmem:[#allocation56_spill] sm:$0xff] }
 0x314   :  { %6267 = vmatprep.subr.bf16.mxu1 %v11832_v23  ;;  %6233 = vmatpush1.bf16.msra.mxu0 %v11833_v28  ;;  %v11843_v23 = vld [vmem:[#allocation58_spill] sm:$0xff]  ;;  %v11844_v28 = vld [vmem:[#allocation60_spill] sm:$0xff] }
 0x315   :  { %6235 = vmatprep.subr.bf16.mxu0 %v11834_v44  ;;  %v11845_v44 = vld [vmem:[#allocation62_spill] sm:$0xff] }
 0x317   :  { %6269 = vmatpush1.bf16.msra.mxu1 %v11835_v9  ;;  %v11846_v9 = vld [vmem:[#allocation64_spill] sm:$0xff] }
 0x318   :  { %6271 = vmatprep.subr.bf16.mxu1 %v11836_v47  ;;  %6237 = vmatpush1.bf16.msra.mxu0 %v11837_v56  ;;  %v11847_v47 = vld [vmem:[#allocation66_spill] sm:$0xff]  ;;  %v11848_v56 = vld [vmem:[#allocation68_spill] sm:$0xff] }
 0x319   :  { %6303 = vmatprep.subr.bf16.mxu0 %v11838_v14  ;;  %v11849_v14 = vld [vmem:[#allocation70_spill] sm:$0xff] }
 0x31b   :  { %6273 = vmatpush1.bf16.msra.mxu1 %v11839_v55  ;;  %v11850_v55 = vld [vmem:[#allocation72_spill] sm:$0xff] }
 0x31c   :  { %6275 = vmatprep.subr.bf16.mxu1 %v11840_v1  ;;  %v11851_v1 = vld [vmem:[#allocation74_spill] sm:$0xff] }
 0x31f   :  { %6277 = vmatpush1.bf16.msra.mxu1 %v11841_v18  ;;  %v11852_v18 = vld [vmem:[#allocation76_spill] sm:$0xff] }
 0x320   :  { %6279 = vmatprep.subr.bf16.mxu1 %v11842_v20  ;;  %v11853_v20 = vld [vmem:[#allocation78_spill] sm:$0xff] }
 0x323   :  { %6281 = vmatpush1.bf16.msra.mxu1 %v11843_v23  ;;  %v11854_v23 = vld [vmem:[#allocation80_spill] sm:$0xff] }
 0x324   :  { %6283 = vmatprep.subr.bf16.mxu1 %v11844_v28 }
 0x327   :  { %6285 = vmatpush1.bf16.msra.mxu1 %v11845_v44 }
 0x328   :  { %6287 = vmatprep.subr.bf16.mxu1 %v11846_v9 }
 0x32b   :  { %6289 = vmatpush1.bf16.msra.mxu1 %v11847_v47 }
 0x32c   :  { %6291 = vmatprep.subr.bf16.mxu1 %v11848_v56 }
 0x32f   :  { %6293 = vmatpush1.bf16.msra.mxu1 %v11849_v14 }
 0x330   :  { %6295 = vmatprep.subr.bf16.mxu1 %v11850_v55 }
 0x333   :  { %6297 = vmatpush1.bf16.msra.mxu1 %v11851_v1 }
 0x334   :  { %6299 = vmatprep.subr.bf16.mxu1 %v11852_v18 }
 0x337   :  { %6301 = vmatpush1.bf16.msra.mxu1 %v11853_v20 }
 0x338   :  { %6367 = vmatprep.subr.bf16.mxu1 %v11854_v23 }
 0x35d   :  { %v1252_v28 = vpop.f32.mrb[6].mxu0 }
 0x35e   :  { %v1254_v44 = vpop.f32.mrb[7].mxu0 }
 0x35f   :  { %v1469_v9 = vadd.f32 %v1254_v44, %v11855_v15 }
 0x39d   :  { %v1323_v8 = vpop.f32.mrb[12].mxu1  ;;  %v1394_v47 = vpop.f32.mrb[8].mxu0 }
 0x39e   :  { %v1470_v56 = vadd.f32 %v1323_v8, %v11856_v61  ;;  %v1640_v60 = vadd.f32 %v1469_v9, %v1394_v47  ;;  %v1325_v14 = vpop.f32.mrb[13].mxu1  ;;  %v1396_v4 = vpop.f32.mrb[9].mxu0 }
 0x39f   :  { %v1471_v47 = vadd.f32 %v1325_v14, %v9830_v24 }
 0x3a0   :  { %v1641_v55 = vadd.f32 %v1470_v56, %v1396_v4  ;;  %v4906_v26 = vmul.f32 -1.442695, %v1640_v60 }
 0x3a2   :  { %8066 = vpow2.f32 %v4906_v26  ;;  %v4907_v1 = vmul.f32 -1.442695, %v1641_v55 }
 0x3a4   :  { %8068 = vpow2.f32 %v4907_v1 }
 0x3ac   :  { %v8067_v20 = vpop.eup %8066 }
 0x3ad   :  { %v1648_v23 = vadd.f32 1.0, %v8067_v20 }
 0x3ae   :  { %v1614_v18 = vpop.f32.mrb[10].mxu0  ;;  %v8069_v51 = vpop.eup %8068 }
 0x3af   :  { %v5376_v52 = vpop.f32.mrb[11].mxu0  ;;  %8070 = vrcp.f32 %v1648_v23  ;;  %v1649_v15 = vadd.f32 1.0, %v8069_v51 }
 0x3b1   :  { %8072 = vrcp.f32 %v1649_v15 }
 0x3b9   :  { %v8071_v9 = vpop.eup %8070 }
 0x3bb   :  { %v8073_v56 = vpop.eup %8072 }
 0x3bc   :  { %v1658_v23 = vsub.f32 1.0, %v8073_v56 }
 0x3bd   :  { %v5033_v57 = vpop.f32.mrb[14].mxu1 }
 0x3be   :  { %v5034_v44 = vpop.f32.mrb[15].mxu1 }
 0x3bf   :  { %v5035_v7 = vadd.f32 %v5034_v44, %v5033_v57  ;;  %v1660_v57 = vmul.f32 %v8073_v56, %v9836_v22 }
 0x3c1   :  { %v1654_v8 = vadd.f32 %v5035_v7, %v9826_v2 }
 0x3c3   :  { %v1655_v4 = vmul.f32 %v8071_v9, %v1654_v8 }
 0x3c5   :  { %v1656_v60 = vadd.f32 %v1655_v4, %v1471_v47  ;;  %v10035_v4 = vld [vmem:[%s11148_s3] ss:$0 sm:$0xff] }
 0x3c6   :  { %v1632_v22 = vadd.f32 %v10035_v4, %v1252_v28  ;;  %v11858_v28 = vld [vmem:[#allocation94_spill] sm:$0xff] }
 0x3c7   :  { %8074 = vtanh.f32 %v1656_v60  ;;  %v1615_v60 = vadd.f32 %v1614_v18, %v11735_v30  ;;  %v11857_v18 = vld [vmem:[#allocation93_spill] sm:$0xff] }
 0x3cd   :  { %v1543_v52 = vpop.f32.mrb[10].mxu1 }
 0x3ce   :  { %v1544_v1 = vadd.f32 %v1543_v52, %v11732_v34  ;;  %v1545_v20 = vpop.f32.mrb[11].mxu1 }
 0x3cf   :  { %v1546_v51 = vadd.f32 %v1545_v20, %v11733_v42 }
 0x3d0   :  { %v4904_v26 = vmul.f32 -1.442695, %v1544_v1 }
 0x3d1   :  { %v8075_v55 = vpop.eup %8074  ;;  %v4905_v14 = vmul.f32 -1.442695, %v1546_v51 }
 0x3d2   :  { %v1659_v7 = vmul.f32 %v8075_v55, %v1658_v23  ;;  %8076 = vpow2.f32 %v4904_v26 }
 0x3d3   :  { %8078 = vpow2.f32 %v4905_v14  ;;  %v11861_v14 = vld [vmem:[#allocation97_spill] sm:$0xff] }
 0x3d4   :  { %v10028_v44 = vadd.f32 %v1660_v57, %v1659_v7  ;;  %v11860_v7 = vld [vmem:[#allocation96_spill] sm:$0xff] }
 0x3d6   :  { %1726 = vmatprep.mubr.f32.mxu0 %v10028_v44  ;;  %1797 = vmatprep.mubr.f32.mxu1 %v10028_v44 }
 0x3dc   :  { %v8077_v15 = vpop.eup %8076 }
 0x3dd   :  { %v1626_v8 = vadd.f32 1.0, %v8077_v15  ;;  %v8079_v9 = vpop.eup %8078  ;;  %v11862_v15 = vld [vmem:[#allocation98_spill] sm:$0xff] }
 0x3de   :  { %v1627_v47 = vadd.f32 1.0, %v8079_v9  ;;  %v11864_v9 = vld [vmem:[#allocation100_spill] sm:$0xff] }
 0x3df   :  { %8080 = vrcp.f32 %v1626_v8  ;;  %v11863_v8 = vld [vmem:[#allocation99_spill] sm:$0xff] }
 0x3e0   :  { %8082 = vrcp.f32 %v1627_v47  ;;  %v11865_v47 = vld [vmem:[#allocation101_spill] sm:$0xff] }
 0x3e9   :  { %v8081_v56 = vpop.eup %8080 }
 0x3ea   :  { %v1633_v52 = vmul.f32 %v8081_v56, %v1632_v22  ;;  %v8083_v20 = vpop.eup %8082  ;;  %v11866_v22 = vld [vmem:[#allocation102_spill] sm:$0xff]  ;;  %v11868_v56 = vld [vmem:[#allocation104_spill] sm:$0xff] }
 0x3eb   :  { %v1636_v23 = vsub.f32 1.0, %v8083_v20  ;;  %v1638_v55 = vmul.f32 %v8083_v20, %v9843_v11  ;;  %v11859_v11 = vld [vmem:[#allocation95_spill] sm:$0xff] }
 0x3ec   :  { %v1634_v1 = vadd.f32 %v1633_v52, %v1615_v60  ;;  %v11867_v60 = vld [vmem:[#allocation103_spill] sm:$0xff]  ;;  %v11869_v52 = vld [vmem:[#allocation105_spill] sm:$0xff] }
 0x3ed   :  { %v11871_v20 = vld [vmem:[#allocation107_spill] sm:$0xff] }
 0x3ee   :  { %8084 = vtanh.f32 %v1634_v1  ;;  %v11870_v1 = vld [vmem:[#allocation106_spill] sm:$0xff] }
 0x3f8   :  { %v8085_v26 = vpop.eup %8084 }
 0x3f9   :  { %v1637_v51 = vmul.f32 %v8085_v26, %v1636_v23  ;;  %v11872_v23 = vld [vmem:[#allocation108_spill] sm:$0xff]  ;;  %v11873_v26 = vld [vmem:[#allocation109_spill] sm:$0xff] }
 0x3fb   :  { %v10040_v57 = vadd.f32 %v1638_v55, %v1637_v51  ;;  %v11874_v55 = vld [vmem:[#allocation110_spill] sm:$0xff]  ;;  %v11875_v51 = vld [vmem:[#allocation111_spill] sm:$0xff] }
 0x3fd   :  { %1727 = vmatmul.mubr.f32.vlgmr.msra.gmra.mrb[12].mxu0 %v10040_v57  ;;  %1798 = vmatmul.mubr.f32.vlgmr.msra.gmra.mrb[16].mxu1 %v10040_v57 }
 0x3fe   :  { %6305 = vmatpush1.bf16.msra.mxu0 %v9032_v3  ;;  %6369 = vmatpush1.bf16.msra.mxu1 %v11736_v16 }
 0x3ff   :  { %1868 = vmatprep.mubr.f32.mxu0 %v10028_v44  ;;  %1939 = vmatprep.mubr.f32.mxu1 %v10028_v44 }
 0x400   :  { %6307 = vmatprep.subr.bf16.mxu0 %v11737_v5  ;;  %6371 = vmatprep.subr.bf16.mxu1 %v11738_v53 }
 0x402   :  { %6309 = vmatpush1.bf16.msra.mxu0 %v11739_v50  ;;  %6373 = vmatpush1.bf16.msra.mxu1 %v11740_v46 }
 0x403   :  { %6311 = vmatprep.subr.bf16.mxu0 %v11741_v59  ;;  %6375 = vmatprep.subr.bf16.mxu1 %v11742_v13 }
 0x406   :  { %6313 = vmatpush1.bf16.msra.mxu0 %v11857_v18  ;;  %6377 = vmatpush1.bf16.msra.mxu1 %v11858_v28 }
 0x407   :  { %6315 = vmatprep.subr.bf16.mxu0 %v11859_v11  ;;  %6379 = vmatprep.subr.bf16.mxu1 %v11860_v7 }
 0x40a   :  { %6317 = vmatpush1.bf16.msra.mxu0 %v11861_v14  ;;  %6381 = vmatpush1.bf16.msra.mxu1 %v11862_v15 }
 0x40b   :  { %6319 = vmatprep.subr.bf16.mxu0 %v11863_v8  ;;  %6383 = vmatprep.subr.bf16.mxu1 %v11864_v9 }
 0x40e   :  { %6321 = vmatpush1.bf16.msra.mxu0 %v11865_v47  ;;  %6385 = vmatpush1.bf16.msra.mxu1 %v11866_v22  ;;  %v11876_v47 = vld [vmem:[#allocation112_spill] sm:$0xff]  ;;  %v11877_v22 = vld [vmem:[#allocation113_spill] sm:$0xff] }
 0x40f   :  { %6323 = vmatprep.subr.bf16.mxu0 %v11867_v60  ;;  %6387 = vmatprep.subr.bf16.mxu1 %v11868_v56  ;;  %v11878_v60 = vld [vmem:[#allocation114_spill] sm:$0xff]  ;;  %v11879_v56 = vld [vmem:[#allocation115_spill] sm:$0xff] }
 0x412   :  { %6325 = vmatpush1.bf16.msra.mxu0 %v11869_v52  ;;  %6389 = vmatpush1.bf16.msra.mxu1 %v11870_v1  ;;  %v11880_v52 = vld [vmem:[#allocation116_spill] sm:$0xff]  ;;  %v11881_v1 = vld [vmem:[#allocation117_spill] sm:$0xff] }
 0x413   :  { %6327 = vmatprep.subr.bf16.mxu0 %v11871_v20  ;;  %6391 = vmatprep.subr.bf16.mxu1 %v11872_v23  ;;  %v11882_v20 = vld [vmem:[#allocation118_spill] sm:$0xff]  ;;  %v11883_v23 = vld [vmem:[#allocation119_spill] sm:$0xff] }
 0x416   :  { %6329 = vmatpush1.bf16.msra.mxu0 %v11873_v26  ;;  %6393 = vmatpush1.bf16.msra.mxu1 %v11874_v55  ;;  %v11884_v26 = vld [vmem:[#allocation120_spill] sm:$0xff]  ;;  %v11885_v55 = vld [vmem:[#allocation121_spill] sm:$0xff] }
 0x417   :  { %6331 = vmatprep.subr.bf16.mxu0 %v11875_v51  ;;  %6395 = vmatprep.subr.bf16.mxu1 %v11876_v47  ;;  %v11886_v51 = vld [vmem:[#allocation122_spill] sm:$0xff]  ;;  %v11887_v47 = vld [vmem:[#allocation123_spill] sm:$0xff] }
 0x41a   :  { %6333 = vmatpush1.bf16.msra.mxu0 %v11877_v22  ;;  %6397 = vmatpush1.bf16.msra.mxu1 %v11878_v60  ;;  %v11888_v22 = vld [vmem:[#allocation124_spill] sm:$0xff]  ;;  %v11889_v60 = vld [vmem:[#allocation125_spill] sm:$0xff] }
 0x41b   :  { %6335 = vmatprep.subr.bf16.mxu0 %v11879_v56  ;;  %6399 = vmatprep.subr.bf16.mxu1 %v11880_v52  ;;  %v11890_v52 = vld [vmem:[#allocation127_spill] sm:$0xff] }
 0x41e   :  { %6337 = vmatpush1.bf16.msra.mxu0 %v11881_v1  ;;  %6401 = vmatpush1.bf16.msra.mxu1 %v11882_v20 }
 0x41f   :  { %6339 = vmatprep.subr.bf16.mxu0 %v11883_v23  ;;  %6403 = vmatprep.subr.bf16.mxu1 %v11884_v26  ;;  %v11891_v23 = vld [vmem:[#allocation130_spill] sm:$0xff] }
 0x422   :  { %6341 = vmatpush1.bf16.msra.mxu0 %v11885_v55  ;;  %6405 = vmatpush1.bf16.msra.mxu1 %v11886_v51  ;;  %v11892_v51 = vld [vmem:[#allocation133_spill] sm:$0xff] }
 0x423   :  { %6343 = vmatprep.subr.bf16.mxu0 %v11887_v47  ;;  %6407 = vmatprep.subr.bf16.mxu1 %v11888_v22  ;;  %v11893_v22 = vld [vmem:[#allocation135_spill] sm:$0xff] }
 0x426   :  { %6345 = vmatpush1.bf16.msra.mxu0 %v11889_v60  ;;  %6409 = vmatpush1.bf16.msra.mxu1 %v11776_v31  ;;  %v11894_v60 = vld [vmem:[#allocation136_spill] sm:$0xff] }
 0x427   :  { %6347 = vmatprep.subr.bf16.mxu0 %v11890_v52  ;;  %6411 = vmatprep.subr.bf16.mxu1 %v11778_v6 }
 0x42a   :  { %6349 = vmatpush1.bf16.msra.mxu0 %v11779_v29  ;;  %6413 = vmatpush1.bf16.msra.mxu1 %v11891_v23 }
 0x42b   :  { %6351 = vmatprep.subr.bf16.mxu0 %v11781_v25  ;;  %6415 = vmatprep.subr.bf16.mxu1 %v11782_v58  ;;  %v11895_v25 = vld [vmem:[#allocation142_spill] sm:$0xff]  ;;  %v11896_v58 = vld [vmem:[#allocation143_spill] sm:$0xff] }
 0x42e   :  { %6353 = vmatpush1.bf16.msra.mxu0 %v11892_v51  ;;  %6417 = vmatpush1.bf16.msra.mxu1 %v11784_v17  ;;  %v11897_v17 = vld [vmem:[#allocation145_spill] sm:$0xff] }
 0x42f   :  { %6355 = vmatprep.subr.bf16.mxu0 %v11893_v22  ;;  %6419 = vmatprep.subr.bf16.mxu1 %v11894_v60  ;;  %v11898_v22 = vld [vmem:[#allocation146_spill] sm:$0xff]  ;;  %v11899_v60 = vld [vmem:[#allocation147_spill] sm:$0xff] }
 0x432   :  { %6357 = vmatpush1.bf16.msra.mxu0 %v9504_v21  ;;  %6421 = vmatpush1.bf16.msra.mxu1 %v11787_v12 }
 0x433   :  { %6359 = vmatprep.subr.bf16.mxu0 %v9516_v49  ;;  %6423 = vmatprep.subr.bf16.mxu1 %v9518_v0  ;;  %v11900_v0 = vld [vmem:[#allocation148_spill] sm:$0xff] }
 0x436   :  { %6361 = vmatpush1.bf16.msra.mxu0 %v11788_v32  ;;  %6425 = vmatpush1.bf16.msra.mxu1 %v11895_v25  ;;  %v11901_v25 = vld [vmem:[#allocation149_spill] sm:$0xff] }
 0x437   :  { %6363 = vmatprep.subr.bf16.mxu0 %v11896_v58  ;;  %6427 = vmatprep.subr.bf16.mxu1 %v11789_v62  ;;  %v11902_v58 = vld [vmem:[#allocation16_spill] sm:$0xff] }
 0x43a   :  { %6365 = vmatpush1.bf16.msra.mxu0 %v11897_v17  ;;  %6429 = vmatpush1.bf16.msra.mxu1 %v11898_v22  ;;  %v11904_v22 = vld [vmem:[#allocation19_spill] sm:$0xff] }
 0x43b   :  { %6431 = vmatprep.subr.bf16.mxu0 %v11899_v60  ;;  %6478 = vmatprep.subr.bf16.mxu1 %v11678_v10  ;;  %v11903_v60 = vld [vmem:[#allocation150_spill] sm:$0xff] }
 0x43d   :  { %1869 = vmatmul.mubr.f32.vlgmr.msra.gmra.mrb[14].mxu0 %v10040_v57  ;;  %1940 = vmatmul.mubr.f32.vlgmr.msra.gmra.mrb[18].mxu1 %v10040_v57 }
 0x43e   :  { %6433 = vmatpush3.bf16.msra.mxu0 %v11900_v0  ;;  %2010 = vmatprep.mubr.f32.mxu0 %v10028_v44  ;;  %v11905_v0 = vld [vmem:[#allocation153_spill] sm:$0xff] }
 0x43f   :  { %6435 = vmatprep.subr.bf16.mxu0 %v11901_v25  ;;  %6480 = vmatpush3.bf16.msra.mxu1 %v11902_v58  ;;  %v11906_v25 = vld [vmem:[#allocation22_spill] sm:$0xff] }
 0x440   :  { %6481 = vmatprep.subr.bf16.mxu1 %v11678_v10  ;;  %5393 = vmatprep.mubr.msk.f32.mxu1 %vm8202_vm1, %v11620_v54 }
 0x442   :  { %6437 = vmatpush3.bf16.msra.mxu0 %v11903_v60 }
 0x443   :  { %6439 = vmatprep.subr.bf16.mxu0 %v9617_v35  ;;  %6483 = vmatpush3.bf16.msra.mxu1 %v11904_v22  ;;  %v4908_v22 = vld [vmem:[%s11146_s0 + $0x6] sm:$0x3] }
 0x444   :  { %6484 = vmatprep.subr.bf16.mxu1 %v11678_v10 }
 0x446   :  { %6441 = vmatpush3.bf16.msra.mxu0 %v11796_v37 }
 0x447   :  { %6443 = vmatprep.subr.bf16.mxu0 %v11905_v0  ;;  %6486 = vmatpush3.bf16.msra.mxu1 %v11906_v25 }
 0x448   :  { %6487 = vmatprep.subr.bf16.mxu1 %v11678_v10 }
 0x44a   :  { %6445 = vmatpush3.bf16.msra.mxu0 %v11798_v63 }
 0x44b   :  { %6447 = vmatprep.subr.bf16.mxu0 %v9659_v27  ;;  %6489 = vmatpush3.bf16.msra.mxu1 %v11799_v19  ;;  %v11908_v19 = vld [vmem:[#allocation161_spill] sm:$0xff]  ;;  %v11910_v27 = vld [vmem:[#allocation18_spill] sm:$0xff] }
 0x44c   :  { %6491 = vmatprep.subr.bf16.mxu1 %v11800_v40  ;;  %v11907_v40 = vld [vmem:[#allocation160_spill] sm:$0xff] }
 0x44e   :  { %6449 = vmatpush3.bf16.msra.mxu0 %v9676_v36  ;;  %5394 = vmatmul.mubr.msk.f32.vlgmr.msra.gmra.mrb[20].mxu1 %vm85_vm0, %v4908_v22  ;;  %v11909_v36 = vld [vmem:[#allocation17_spill] sm:$0xff] }
 0x44f   :  { %6451 = vmatprep.subr.bf16.mxu0 %v11801_v43  ;;  %6493 = vmatpush1.bf16.msra.mxu1 %v11802_v39  ;;  %v11911_v43 = vld [vmem:[#allocation162_spill] sm:$0xff]  ;;  %v11912_v39 = vld [vmem:[#allocation3_spill] sm:$0xff] }
 0x450   :  { %6495 = vmatprep.subr.bf16.mxu1 %v8358_v33  ;;  %v11913_v33 = vld [vmem:[#allocation20_spill] sm:$0xff] }
 0x452   :  { %6453 = vmatpush3.bf16.msra.mxu0 %v9699_v48  ;;  %v11914_v48 = vld [vmem:[#allocation21_spill] sm:$0xff] }
 0x453   :  { %6455 = vmatprep.subr.bf16.mxu0 %v9703_v45  ;;  %6497 = vmatpush1.bf16.msra.mxu1 %v8374_v38  ;;  %v11915_v38 = vld [vmem:[#allocation4_spill] sm:$0xff]  ;;  %v11926_v45 = vld [vmem:[#allocation43_spill] sm:$0xff] }
 0x454   :  { %6499 = vmatprep.subr.bf16.mxu1 %v8383_v41  ;;  %v11924_v41 = vld [vmem:[#allocation9_spill] sm:$0xff] }
 0x456   :  { %6457 = vmatpush3.bf16.msra.mxu0 %v11907_v40  ;;  %v11916_v40 = vld [vmem:[#allocation5_spill] sm:$0xff] }
 0x457   :  { %6459 = vmatprep.subr.bf16.mxu0 %v11908_v19  ;;  %6501 = vmatpush1.bf16.msra.mxu1 %v11909_v36  ;;  %v11917_v19 = vld [vmem:[#allocation33_spill] sm:$0xff]  ;;  %v11918_v36 = vld [vmem:[#allocation35_spill] sm:$0xff] }
 0x458   :  { %6503 = vmatprep.subr.bf16.mxu1 %v11910_v27  ;;  %v11919_v27 = vld [vmem:[#allocation6_spill] sm:$0xff] }
 0x45a   :  { %6461 = vmatpush3.bf16.msra.mxu0 %v11911_v43  ;;  %v11920_v43 = vld [vmem:[#allocation7_spill] sm:$0xff] }
 0x45b   :  { %6463 = vmatprep.subr.bf16.mxu0 %v11912_v39  ;;  %6505 = vmatpush1.bf16.msra.mxu1 %v11913_v33  ;;  %v11921_v39 = vld [vmem:[#allocation37_spill] sm:$0xff]  ;;  %v11922_v33 = vld [vmem:[#allocation39_spill] sm:$0xff] }
 0x45c   :  { %6507 = vmatprep.subr.bf16.mxu1 %v11914_v48  ;;  %v11923_v48 = vld [vmem:[#allocation8_spill] sm:$0xff] }
 0x45d   :  { %2011 = vmatmul.mubr.f32.vlgmr.msra.gmra.mrb[16].mxu0 %v10040_v57 }
 0x45e   :  { %6465 = vmatpush1.bf16.msra.mxu0 %v11915_v38  ;;  %2088 = vmatprep.mubr.f32.mxu0 %v11620_v54  ;;  %v11925_v38 = vld [vmem:[#allocation41_spill] sm:$0xff] }
 0x45f   :  { %6467 = vmatprep.subr.bf16.mxu0 %v11916_v40  ;;  %6509 = vmatpush1.bf16.msra.mxu1 %v11917_v19  ;;  %v11927_v40 = vld [vmem:[#allocation12_spill] sm:$0xff] }
 0x460   :  { %6511 = vmatprep.subr.bf16.mxu1 %v11918_v36  ;;  %v11928_v19 = vld [vmem:[#allocation24_spill] sm:$0xff]  ;;  %v11929_v36 = vld [vmem:[#allocation45_spill] sm:$0xff] }
 0x462   :  { %6469 = vmatpush1.bf16.msra.mxu0 %v11919_v27  ;;  %v11930_v27 = vld [vmem:[#allocation47_spill] sm:$0xff] }
 0x463   :  { %6471 = vmatprep.subr.bf16.mxu0 %v11920_v43  ;;  %6513 = vmatpush1.bf16.msra.mxu1 %v11921_v39  ;;  %v11931_v39 = vld [vmem:[#allocation25_spill] sm:$0xff] }
 0x464   :  { %6515 = vmatprep.subr.bf16.mxu1 %v11922_v33  ;;  %v11932_v33 = vld [vmem:[#allocation26_spill] sm:$0xff]  ;;  %v11979_v43 = vld [vmem:[#allocation81_spill] sm:$0xff] }
 0x466   :  { %6473 = vmatpush1.bf16.msra.mxu0 %v11923_v48  ;;  %v11933_v48 = vld [vmem:[#allocation49_spill] sm:$0xff] }
 0x467   :  { %6475 = vmatprep.subr.bf16.mxu0 %v11924_v41  ;;  %6517 = vmatpush1.bf16.msra.mxu1 %v11925_v38  ;;  %v11934_v41 = vld [vmem:[#allocation51_spill] sm:$0xff] }
 0x468   :  { %6519 = vmatprep.subr.bf16.mxu1 %v11926_v45  ;;  %v11935_v38 = vld [vmem:[#allocation27_spill] sm:$0xff]  ;;  %v11936_v45 = vld [vmem:[#allocation28_spill] sm:$0xff] }
 0x46a   :  { %6477 = vmatpush1.bf16.msra.mxu0 %v11927_v40  ;;  %v11937_v40 = vld [vmem:[#allocation53_spill] sm:$0xff] }
 0x46b   :  { %6555 = vmatprep.subr.bf16.mxu0 %v11928_v19  ;;  %6521 = vmatpush1.bf16.msra.mxu1 %v11929_v36  ;;  %v11938_v19 = vld [vmem:[#allocation55_spill] sm:$0xff]  ;;  %v11939_v36 = vld [vmem:[#allocation29_spill] sm:$0xff] }
 0x46c   :  { %6523 = vmatprep.subr.bf16.mxu1 %v11930_v27  ;;  %v11940_v27 = vld [vmem:[#allocation30_spill] sm:$0xff] }
 0x46d   :  { %4909 = vmatmul.mubr.msk.f32.vlgmr.msra.gmra.mrb[12].mxu0 %vm85_vm0, %v4908_v22  ;;  %v11941_v22 = vld [vmem:[#allocation57_spill] sm:$0xff] }
 0x46e   :  { %6557 = vmatpush1.bf16.msra.mxu0 %v11931_v39  ;;  %v11942_v39 = vld [vmem:[#allocation59_spill] sm:$0xff] }
 0x46f   :  { %6559 = vmatprep.subr.bf16.mxu0 %v11932_v33  ;;  %6525 = vmatpush1.bf16.msra.mxu1 %v11933_v48  ;;  %v11943_v33 = vld [vmem:[#allocation31_spill] sm:$0xff]  ;;  %v11944_v48 = vld [vmem:[#allocation32_spill] sm:$0xff] }
 0x470   :  { %6527 = vmatprep.subr.bf16.mxu1 %v11934_v41  ;;  %v11945_v41 = vld [vmem:[#allocation61_spill] sm:$0xff] }
 0x472   :  { %6561 = vmatpush1.bf16.msra.mxu0 %v11935_v38  ;;  %v11946_v38 = vld [vmem:[#allocation63_spill] sm:$0xff] }
 0x473   :  { %6563 = vmatprep.subr.bf16.mxu0 %v11936_v45  ;;  %6529 = vmatpush1.bf16.msra.mxu1 %v11937_v40  ;;  %v11947_v45 = vld [vmem:[#allocation34_spill] sm:$0xff]  ;;  %v11948_v40 = vld [vmem:[#allocation36_spill] sm:$0xff] }
 0x474   :  { %6531 = vmatprep.subr.bf16.mxu1 %v11938_v19  ;;  %v11949_v19 = vld [vmem:[#allocation65_spill] sm:$0xff] }
 0x476   :  { %6565 = vmatpush1.bf16.msra.mxu0 %v11939_v36  ;;  %v11950_v36 = vld [vmem:[#allocation67_spill] sm:$0xff] }
 0x477   :  { %6567 = vmatprep.subr.bf16.mxu0 %v11940_v27  ;;  %6533 = vmatpush1.bf16.msra.mxu1 %v11941_v22  ;;  %v11951_v27 = vld [vmem:[#allocation38_spill] sm:$0xff]  ;;  %v11952_v22 = vld [vmem:[#allocation40_spill] sm:$0xff] }
 0x478   :  { %6535 = vmatprep.subr.bf16.mxu1 %v11942_v39  ;;  %v11953_v39 = vld [vmem:[#allocation69_spill] sm:$0xff] }
 0x47a   :  { %6569 = vmatpush1.bf16.msra.mxu0 %v11943_v33  ;;  %v11954_v33 = vld [vmem:[#allocation71_spill] sm:$0xff] }
 0x47b   :  { %6571 = vmatprep.subr.bf16.mxu0 %v11944_v48  ;;  %6537 = vmatpush1.bf16.msra.mxu1 %v11945_v41  ;;  %v11955_v48 = vld [vmem:[#allocation42_spill] sm:$0xff]  ;;  %v11956_v41 = vld [vmem:[#allocation44_spill] sm:$0xff] }
 0x47c   :  { %6539 = vmatprep.subr.bf16.mxu1 %v11946_v38  ;;  %v11957_v38 = vld [vmem:[#allocation73_spill] sm:$0xff] }
 0x47e   :  { %6573 = vmatpush1.bf16.msra.mxu0 %v11947_v45  ;;  %v11958_v45 = vld [vmem:[#allocation75_spill] sm:$0xff] }
 0x47f   :  { %6575 = vmatprep.subr.bf16.mxu0 %v11948_v40  ;;  %6541 = vmatpush1.bf16.msra.mxu1 %v11949_v19  ;;  %v11959_v40 = vld [vmem:[#allocation46_spill] sm:$0xff]  ;;  %v11960_v19 = vld [vmem:[#allocation48_spill] sm:$0xff] }
 0x480   :  { %6543 = vmatprep.subr.bf16.mxu1 %v11950_v36  ;;  %v11961_v36 = vld [vmem:[#allocation77_spill] sm:$0xff] }
 0x482   :  { %6577 = vmatpush1.bf16.msra.mxu0 %v11951_v27  ;;  %v11962_v27 = vld [vmem:[#allocation79_spill] sm:$0xff] }
 0x483   :  { %6579 = vmatprep.subr.bf16.mxu0 %v11952_v22  ;;  %6545 = vmatpush1.bf16.msra.mxu1 %v11953_v39  ;;  %v11963_v22 = vld [vmem:[#allocation50_spill] sm:$0xff]  ;;  %v11964_v39 = vld [vmem:[#allocation52_spill] sm:$0xff] }
 0x484   :  { %6547 = vmatprep.subr.bf16.mxu1 %v11954_v33  ;;  %v11965_v33 = vld [vmem:[#allocation54_spill] sm:$0xff] }
 0x486   :  { %6581 = vmatpush1.bf16.msra.mxu0 %v11955_v48  ;;  %v11966_v48 = vld [vmem:[#allocation56_spill] sm:$0xff] }
 0x487   :  { %6583 = vmatprep.subr.bf16.mxu0 %v11956_v41  ;;  %6549 = vmatpush1.bf16.msra.mxu1 %v11957_v38  ;;  %v11967_v41 = vld [vmem:[#allocation58_spill] sm:$0xff]  ;;  %v11968_v38 = vld [vmem:[#allocation60_spill] sm:$0xff] }
 0x488   :  { %6551 = vmatprep.subr.bf16.mxu1 %v11958_v45  ;;  %v11969_v45 = vld [vmem:[#allocation62_spill] sm:$0xff] }
 0x48a   :  { %6585 = vmatpush1.bf16.msra.mxu0 %v11959_v40  ;;  %v11970_v40 = vld [vmem:[#allocation64_spill] sm:$0xff] }
 0x48b   :  { %6587 = vmatprep.subr.bf16.mxu0 %v11960_v19  ;;  %6553 = vmatpush1.bf16.msra.mxu1 %v11961_v36  ;;  %v11971_v19 = vld [vmem:[#allocation66_spill] sm:$0xff]  ;;  %v11972_v36 = vld [vmem:[#allocation68_spill] sm:$0xff] }
 0x48c   :  { %6619 = vmatprep.subr.bf16.mxu1 %v11962_v27  ;;  %v11973_v27 = vld [vmem:[#allocation70_spill] sm:$0xff] }
 0x48e   :  { %6589 = vmatpush1.bf16.msra.mxu0 %v11963_v22  ;;  %v11974_v22 = vld [vmem:[#allocation72_spill] sm:$0xff] }
 0x48f   :  { %6591 = vmatprep.subr.bf16.mxu0 %v11964_v39  ;;  %v11975_v39 = vld [vmem:[#allocation74_spill] sm:$0xff] }
 0x492   :  { %6593 = vmatpush1.bf16.msra.mxu0 %v11965_v33  ;;  %v11976_v33 = vld [vmem:[#allocation76_spill] sm:$0xff] }
 0x493   :  { %6595 = vmatprep.subr.bf16.mxu0 %v11966_v48  ;;  %v11977_v48 = vld [vmem:[#allocation78_spill] sm:$0xff] }
 0x496   :  { %6597 = vmatpush1.bf16.msra.mxu0 %v11967_v41  ;;  %v11978_v41 = vld [vmem:[#allocation80_spill] sm:$0xff] }
 0x497   :  { %6599 = vmatprep.subr.bf16.mxu0 %v11968_v38 }
 0x49a   :  { %6601 = vmatpush1.bf16.msra.mxu0 %v11969_v45 }
 0x49b   :  { %6603 = vmatprep.subr.bf16.mxu0 %v11970_v40 }
 0x49e   :  { %6605 = vmatpush1.bf16.msra.mxu0 %v11971_v19 }
 0x49f   :  { %6607 = vmatprep.subr.bf16.mxu0 %v11972_v36 }
 0x4a2   :  { %6609 = vmatpush1.bf16.msra.mxu0 %v11973_v27 }
 0x4a3   :  { %6611 = vmatprep.subr.bf16.mxu0 %v11974_v22 }
 0x4a6   :  { %6613 = vmatpush1.bf16.msra.mxu0 %v11975_v39 }
 0x4a7   :  { %6615 = vmatprep.subr.bf16.mxu0 %v11976_v33 }
 0x4aa   :  { %6617 = vmatpush1.bf16.msra.mxu0 %v11977_v48 }
 0x4ab   :  { %6683 = vmatprep.subr.bf16.mxu0 %v11978_v41 }
 0x4d0   :  { %v1799_v38 = vpop.f32.mrb[16].mxu1 }
 0x4d1   :  { %v1801_v45 = vpop.f32.mrb[17].mxu1 }
 0x4d2   :  { %v2016_v40 = vadd.f32 %v1801_v45, %v11979_v43 }
 0x510   :  { %v1870_v63 = vpop.f32.mrb[14].mxu0  ;;  %v1941_v19 = vpop.f32.mrb[18].mxu1 }
 0x511   :  { %v2017_v36 = vadd.f32 %v1870_v63, %v11856_v61  ;;  %v2187_v25 = vadd.f32 %v2016_v40, %v1941_v19  ;;  %v1872_v27 = vpop.f32.mrb[15].mxu0  ;;  %v1943_v0 = vpop.f32.mrb[19].mxu1 }
 0x512   :  { %v2018_v40 = vadd.f32 %v1872_v27, %v9830_v24 }
 0x513   :  { %v2188_v22 = vadd.f32 %v2017_v36, %v1943_v0  ;;  %v4913_v37 = vmul.f32 -1.442695, %v2187_v25 }
 0x515   :  { %8086 = vpow2.f32 %v4913_v37  ;;  %v4914_v39 = vmul.f32 -1.442695, %v2188_v22 }
 0x517   :  { %8088 = vpow2.f32 %v4914_v39 }
 0x51f   :  { %v8087_v48 = vpop.eup %8086 }
 0x520   :  { %v2195_v41 = vadd.f32 1.0, %v8087_v48 }
 0x521   :  { %v2161_v33 = vpop.f32.mrb[20].mxu1  ;;  %v8089_v60 = vpop.eup %8088 }
 0x522   :  { %v5395_v35 = vpop.f32.mrb[21].mxu1  ;;  %8090 = vrcp.f32 %v2195_v41  ;;  %v2196_v43 = vadd.f32 1.0, %v8089_v60 }
 0x524   :  { %8092 = vrcp.f32 %v2196_v43 }
 0x52c   :  { %v8091_v19 = vpop.eup %8090 }
 0x52e   :  { %v8093_v36 = vpop.eup %8092 }
 0x52f   :  { %v2205_v41 = vsub.f32 1.0, %v8093_v36 }
 0x530   :  { %v5077_v54 = vpop.f32.mrb[16].mxu0 }
 0x531   :  { %v5078_v45 = vpop.f32.mrb[17].mxu0 }
 0x532   :  { %v5079_v58 = vadd.f32 %v5078_v45, %v5077_v54  ;;  %v2207_v54 = vmul.f32 %v8093_v36, %v10028_v44 }
 0x534   :  { %v2201_v63 = vadd.f32 %v5079_v58, %v9826_v2 }
 0x536   :  { %v2202_v0 = vmul.f32 %v8091_v19, %v2201_v63 }
 0x538   :  { %v2203_v37 = vadd.f32 %v2202_v0, %v2018_v40  ;;  %v2179_v40 = vadd.f32 %v10035_v4, %v1799_v38  ;;  %v2162_v0 = vadd.f32 %v2161_v33, %v11735_v30  ;;  %v11980_v33 = vld [vmem:[#allocation101_spill] sm:$0xff]  ;;  %v11981_v38 = vld [vmem:[#allocation102_spill] sm:$0xff] }
 0x53a   :  { %8094 = vtanh.f32 %v2203_v37 }
 0x540   :  { %v2090_v35 = vpop.f32.mrb[12].mxu0 }
 0x541   :  { %v2091_v39 = vadd.f32 %v2090_v35, %v11732_v34  ;;  %v2092_v48 = vpop.f32.mrb[13].mxu0 }
 0x542   :  { %v2093_v60 = vadd.f32 %v2092_v48, %v11733_v42 }
 0x543   :  { %v4911_v25 = vmul.f32 -1.442695, %v2091_v39 }
 0x544   :  { %v8095_v22 = vpop.eup %8094  ;;  %v4912_v43 = vmul.f32 -1.442695, %v2093_v60  ;;  %v11983_v60 = vld [vmem:[#allocation104_spill] sm:$0xff] }
 0x545   :  { %v2206_v2 = vmul.f32 %v8095_v22, %v2205_v41  ;;  %8096 = vpow2.f32 %v4911_v25 }
 0x546   :  { %8098 = vpow2.f32 %v4912_v43  ;;  %v11986_v43 = vld [vmem:[#allocation107_spill] sm:$0xff] }
 0x547   :  { %v10225_v58 = vadd.f32 %v2207_v54, %v2206_v2  ;;  %v11984_v54 = vld [vmem:[#allocation105_spill] sm:$0xff]  ;;  %v11985_v2 = vld [vmem:[#allocation106_spill] sm:$0xff] }
 0x549   :  { %2273 = vmatprep.mubr.f32.mxu1 %v10225_v58  ;;  %2344 = vmatprep.mubr.f32.mxu0 %v10225_v58 }
 0x54f   :  { %v8097_v27 = vpop.eup %8096 }
 0x550   :  { %v2173_v45 = vadd.f32 1.0, %v8097_v27  ;;  %v8099_v63 = vpop.eup %8098  ;;  %v11987_v27 = vld [vmem:[#allocation108_spill] sm:$0xff] }
 0x551   :  { %v2174_v19 = vadd.f32 1.0, %v8099_v63  ;;  %v11989_v63 = vld [vmem:[#allocation110_spill] sm:$0xff] }
 0x552   :  { %8100 = vrcp.f32 %v2173_v45  ;;  %v11988_v45 = vld [vmem:[#allocation109_spill] sm:$0xff] }
 0x553   :  { %8102 = vrcp.f32 %v2174_v19  ;;  %v11990_v19 = vld [vmem:[#allocation111_spill] sm:$0xff] }
 0x55c   :  { %v8101_v44 = vpop.eup %8100 }
 0x55d   :  { %v2180_v37 = vmul.f32 %v8101_v44, %v2179_v40  ;;  %v8103_v35 = vpop.eup %8102  ;;  %v11991_v40 = vld [vmem:[#allocation112_spill] sm:$0xff]  ;;  %v11993_v44 = vld [vmem:[#allocation114_spill] sm:$0xff] }
 0x55e   :  { %v2183_v39 = vsub.f32 1.0, %v8103_v35  ;;  %v2185_v41 = vmul.f32 %v8103_v35, %v10040_v57  ;;  %v11982_v57 = vld [vmem:[#allocation103_spill] sm:$0xff]  ;;  %v11996_v35 = vld [vmem:[#allocation122_spill] sm:$0xff] }
 0x55f   :  { %v2181_v36 = vadd.f32 %v2180_v37, %v2162_v0  ;;  %v11992_v0 = vld [vmem:[#allocation113_spill] sm:$0xff]  ;;  %v11994_v37 = vld [vmem:[#allocation116_spill] sm:$0xff] }
 0x561   :  { %8104 = vtanh.f32 %v2181_v36  ;;  %v11995_v36 = vld [vmem:[#allocation119_spill] sm:$0xff] }
 0x56b   :  { %v8105_v48 = vpop.eup %8104 }
 0x56c   :  { %v2184_v25 = vmul.f32 %v8105_v48, %v2183_v39  ;;  %v11997_v39 = vld [vmem:[#allocation124_spill] sm:$0xff]  ;;  %v11998_v48 = vld [vmem:[#allocation125_spill] sm:$0xff] }
 0x56e   :  { %v10232_v22 = vadd.f32 %v2185_v41, %v2184_v25  ;;  %v11999_v41 = vld [vmem:[#allocation131_spill] sm:$0xff]  ;;  %v12000_v25 = vld [vmem:[#allocation132_spill] sm:$0xff] }
 0x570   :  { %2274 = vmatmul.mubr.f32.vlgmr.msra.gmra.mrb[22].mxu1 %v10232_v22  ;;  %2345 = vmatmul.mubr.f32.vlgmr.msra.gmra.mrb[18].mxu0 %v10232_v22 }
 0x571   :  { %6621 = vmatpush1.bf16.msra.mxu1 %v9032_v3  ;;  %6685 = vmatpush1.bf16.msra.mxu0 %v11736_v16 }
 0x572   :  { %2415 = vmatprep.mubr.f32.mxu1 %v10225_v58  ;;  %2486 = vmatprep.mubr.f32.mxu0 %v10225_v58 }
 0x573   :  { %6623 = vmatprep.subr.bf16.mxu1 %v11737_v5  ;;  %6687 = vmatprep.subr.bf16.mxu0 %v11738_v53 }
 0x575   :  { %6625 = vmatpush1.bf16.msra.mxu1 %v11739_v50  ;;  %6689 = vmatpush1.bf16.msra.mxu0 %v11740_v46 }
 0x576   :  { %6627 = vmatprep.subr.bf16.mxu1 %v11741_v59  ;;  %6691 = vmatprep.subr.bf16.mxu0 %v11742_v13 }
 0x579   :  { %6629 = vmatpush1.bf16.msra.mxu1 %v11857_v18  ;;  %6693 = vmatpush1.bf16.msra.mxu0 %v11858_v28 }
 0x57a   :  { %6631 = vmatprep.subr.bf16.mxu1 %v11859_v11  ;;  %6695 = vmatprep.subr.bf16.mxu0 %v11860_v7 }
 0x57d   :  { %6633 = vmatpush1.bf16.msra.mxu1 %v11861_v14  ;;  %6697 = vmatpush1.bf16.msra.mxu0 %v11862_v15 }
 0x57e   :  { %6635 = vmatprep.subr.bf16.mxu1 %v11863_v8  ;;  %6699 = vmatprep.subr.bf16.mxu0 %v11864_v9 }
 0x581   :  { %6637 = vmatpush1.bf16.msra.mxu1 %v11980_v33  ;;  %6701 = vmatpush1.bf16.msra.mxu0 %v11981_v38 }
 0x582   :  { %6639 = vmatprep.subr.bf16.mxu1 %v11982_v57  ;;  %6703 = vmatprep.subr.bf16.mxu0 %v11983_v60 }
 0x585   :  { %6641 = vmatpush1.bf16.msra.mxu1 %v11984_v54  ;;  %6705 = vmatpush1.bf16.msra.mxu0 %v11985_v2 }
 0x586   :  { %6643 = vmatprep.subr.bf16.mxu1 %v11986_v43  ;;  %6707 = vmatprep.subr.bf16.mxu0 %v11987_v27 }
 0x589   :  { %6645 = vmatpush1.bf16.msra.mxu1 %v11988_v45  ;;  %6709 = vmatpush1.bf16.msra.mxu0 %v11989_v63 }
 0x58a   :  { %6647 = vmatprep.subr.bf16.mxu1 %v11990_v19  ;;  %6711 = vmatprep.subr.bf16.mxu0 %v11991_v40 }
 0x58d   :  { %6649 = vmatpush1.bf16.msra.mxu1 %v11992_v0  ;;  %6713 = vmatpush1.bf16.msra.mxu0 %v11993_v44 }
 0x58e   :  { %6651 = vmatprep.subr.bf16.mxu1 %v11879_v56  ;;  %6715 = vmatprep.subr.bf16.mxu0 %v11994_v37 }
 0x591   :  { %6653 = vmatpush1.bf16.msra.mxu1 %v11881_v1  ;;  %6717 = vmatpush1.bf16.msra.mxu0 %v11882_v20 }
 0x592   :  { %6655 = vmatprep.subr.bf16.mxu1 %v11995_v36  ;;  %6719 = vmatprep.subr.bf16.mxu0 %v11884_v26 }
 0x595   :  { %6657 = vmatpush1.bf16.msra.mxu1 %v11885_v55  ;;  %6721 = vmatpush1.bf16.msra.mxu0 %v11996_v35 }
 0x596   :  { %6659 = vmatprep.subr.bf16.mxu1 %v11887_v47  ;;  %6723 = vmatprep.subr.bf16.mxu0 %v11997_v39  ;;  %v12001_v47 = vld [vmem:[#allocation134_spill] sm:$0xff]  ;;  %v12002_v39 = vld [vmem:[#allocation135_spill] sm:$0xff] }
 0x599   :  { %6661 = vmatpush1.bf16.msra.mxu1 %v11998_v48  ;;  %6725 = vmatpush1.bf16.msra.mxu0 %v11776_v31  ;;  %v12003_v48 = vld [vmem:[#allocation136_spill] sm:$0xff] }
 0x59a   :  { %6663 = vmatprep.subr.bf16.mxu1 %v11890_v52  ;;  %6727 = vmatprep.subr.bf16.mxu0 %v11778_v6 }
 0x59d   :  { %6665 = vmatpush1.bf16.msra.mxu1 %v11779_v29  ;;  %6729 = vmatpush1.bf16.msra.mxu0 %v11891_v23  ;;  %v12004_v29 = vld [vmem:[#allocation140_spill] sm:$0xff] }
 0x59e   :  { %6667 = vmatprep.subr.bf16.mxu1 %v11999_v41  ;;  %6731 = vmatprep.subr.bf16.mxu0 %v12000_v25  ;;  %v12005_v41 = vld [vmem:[#allocation142_spill] sm:$0xff]  ;;  %v12006_v25 = vld [vmem:[#allocation143_spill] sm:$0xff] }
 0x5a1   :  { %6669 = vmatpush1.bf16.msra.mxu1 %v11892_v51  ;;  %6733 = vmatpush1.bf16.msra.mxu0 %v12001_v47  ;;  %v12034_v47 = vld [vmem:[#allocation18_spill] sm:$0xff] }
 0x5a2   :  { %6671 = vmatprep.subr.bf16.mxu1 %v12002_v39  ;;  %6735 = vmatprep.subr.bf16.mxu0 %v12003_v48  ;;  %v12007_v39 = vld [vmem:[#allocation146_spill] sm:$0xff]  ;;  %v12008_v48 = vld [vmem:[#allocation147_spill] sm:$0xff] }
 0x5a5   :  { %6673 = vmatpush1.bf16.msra.mxu1 %v9504_v21  ;;  %6737 = vmatpush1.bf16.msra.mxu0 %v11787_v12  ;;  %v12021_v12 = vld [vmem:[#allocation23_spill] sm:$0xff]  ;;  %v12032_v21 = vld [vmem:[#allocation161_spill] sm:$0xff] }
 0x5a6   :  { %6675 = vmatprep.subr.bf16.mxu1 %v9516_v49  ;;  %6739 = vmatprep.subr.bf16.mxu0 %v12004_v29  ;;  %v12009_v29 = vld [vmem:[#allocation148_spill] sm:$0xff]  ;;  %v12020_v49 = vld [vmem:[#allocation155_spill] sm:$0xff] }
 0x5a9   :  { %6677 = vmatpush1.bf16.msra.mxu1 %v11788_v32  ;;  %6741 = vmatpush1.bf16.msra.mxu0 %v12005_v41  ;;  %v12010_v41 = vld [vmem:[#allocation149_spill] sm:$0xff] }
 0x5aa   :  { %6679 = vmatprep.subr.bf16.mxu1 %v12006_v25  ;;  %6743 = vmatprep.subr.bf16.mxu0 %v11789_v62  ;;  %v12011_v25 = vld [vmem:[#allocation16_spill] sm:$0xff]  ;;  %v12015_v62 = vld [vmem:[#allocation19_spill] sm:$0xff]  ;;  %v12017_v32 = vld [vmem:[#allocation153_spill] sm:$0xff] }
 0x5ad   :  { %6681 = vmatpush1.bf16.msra.mxu1 %v11897_v17  ;;  %6745 = vmatpush1.bf16.msra.mxu0 %v12007_v39  ;;  %v12012_v17 = vmov 0.0   ;;  %v12014_v39 = vld [vmem:[#allocation151_spill] sm:$0xff] }
 0x5ae   :  { %6747 = vmatprep.subr.bf16.mxu1 %v12008_v48  ;;  %6794 = vmatprep.subr.bf16.mxu0 %v11678_v10  ;;  %v12013_v48 = vld [vmem:[#allocation150_spill] sm:$0xff] }
 0x5b0   :  { %2416 = vmatmul.mubr.f32.vlgmr.msra.gmra.mrb[24].mxu1 %v10232_v22  ;;  %2487 = vmatmul.mubr.f32.vlgmr.msra.gmra.mrb[20].mxu0 %v10232_v22 }
 0x5b1   :  { %6749 = vmatpush3.bf16.msra.mxu1 %v12009_v29  ;;  %2557 = vmatprep.mubr.f32.mxu1 %v10225_v58  ;;  %v12016_v29 = vld [vmem:[#allocation152_spill] sm:$0xff] }
 0x5b2   :  { %6751 = vmatprep.subr.bf16.mxu1 %v12010_v41  ;;  %6796 = vmatpush3.bf16.msra.mxu0 %v12011_v25  ;;  %v12018_v41 = vld [vmem:[#allocation22_spill] sm:$0xff] }
 0x5b3   :  { %6797 = vmatprep.subr.bf16.mxu0 %v11678_v10  ;;  %5412 = vmatprep.mubr.msk.f32.mxu0 %vm8202_vm1, %v12012_v17  ;;  %v12019_v25 = vld [vmem:[#allocation154_spill] sm:$0xff] }
 0x5b5   :  { %6753 = vmatpush3.bf16.msra.mxu1 %v12013_v48  ;;  %v12022_v48 = vld [vmem:[#allocation10_spill] sm:$0xff] }
 0x5b6   :  { %6755 = vmatprep.subr.bf16.mxu1 %v12014_v39  ;;  %6799 = vmatpush3.bf16.msra.mxu0 %v12015_v62  ;;  %v4915_v62 = vld [vmem:[%s11146_s0 + $0x8] sm:$0x3] }
 0x5b7   :  { %6800 = vmatprep.subr.bf16.mxu0 %v11678_v10  ;;  %v12023_v39 = vld [vmem:[#allocation156_spill] sm:$0xff] }
 0x5b9   :  { %6757 = vmatpush3.bf16.msra.mxu1 %v12016_v29  ;;  %v12026_v29 = vld [vmem:[#allocation13_spill] sm:$0xff] }
 0x5ba   :  { %6759 = vmatprep.subr.bf16.mxu1 %v12017_v32  ;;  %6802 = vmatpush3.bf16.msra.mxu0 %v12018_v41  ;;  %v12024_v32 = vld [vmem:[#allocation157_spill] sm:$0xff]  ;;  %v12025_v41 = vld [vmem:[#allocation11_spill] sm:$0xff] }
 0x5bb   :  { %6803 = vmatprep.subr.bf16.mxu0 %v11678_v10  ;;  %v12031_v10 = vld [vmem:[#allocation160_spill] sm:$0xff] }
 0x5bd   :  { %6761 = vmatpush3.bf16.msra.mxu1 %v12019_v25  ;;  %v12027_v25 = vld [vmem:[#allocation158_spill] sm:$0xff] }
 0x5be   :  { %6763 = vmatprep.subr.bf16.mxu1 %v12020_v49  ;;  %6805 = vmatpush3.bf16.msra.mxu0 %v12021_v12  ;;  %v12028_v49 = vld [vmem:[#allocation159_spill] sm:$0xff]  ;;  %v12029_v12 = vld [vmem:[#allocation14_spill] sm:$0xff] }
 0x5bf   :  { %6807 = vmatprep.subr.bf16.mxu0 %v12022_v48  ;;  %v12030_v48 = vld [vmem:[#allocation15_spill] sm:$0xff] }
 0x5c1   :  { %6765 = vmatpush3.bf16.msra.mxu1 %v12023_v39  ;;  %5413 = vmatmul.mubr.msk.f32.vlgmr.msra.gmra.mrb[22].mxu0 %vm85_vm0, %v4915_v62  ;;  %v12033_v39 = vld [vmem:[#allocation17_spill] sm:$0xff] }
 0x5c2   :  { %6767 = vmatprep.subr.bf16.mxu1 %v12024_v32  ;;  %6809 = vmatpush1.bf16.msra.mxu0 %v12025_v41  ;;  %v12035_v32 = vld [vmem:[#allocation162_spill] sm:$0xff]  ;;  %v12036_v41 = vld [vmem:[#allocation3_spill] sm:$0xff] }
 0x5c3   :  { %6811 = vmatprep.subr.bf16.mxu0 %v12026_v29  ;;  %v12037_v29 = vld [vmem:[#allocation20_spill] sm:$0xff] }
 0x5c5   :  { %6769 = vmatpush3.bf16.msra.mxu1 %v12027_v25  ;;  %v12038_v25 = vld [vmem:[#allocation21_spill] sm:$0xff] }
 0x5c6   :  { %6771 = vmatprep.subr.bf16.mxu1 %v12028_v49  ;;  %6813 = vmatpush1.bf16.msra.mxu0 %v12029_v12  ;;  %v12039_v12 = vld [vmem:[#allocation4_spill] sm:$0xff]  ;;  %v12050_v49 = vld [vmem:[#allocation43_spill] sm:$0xff] }
 0x5c7   :  { %6815 = vmatprep.subr.bf16.mxu0 %v12030_v48  ;;  %v12048_v48 = vld [vmem:[#allocation9_spill] sm:$0xff] }
 0x5c9   :  { %6773 = vmatpush3.bf16.msra.mxu1 %v12031_v10  ;;  %v12040_v10 = vld [vmem:[#allocation5_spill] sm:$0xff] }
 0x5ca   :  { %6775 = vmatprep.subr.bf16.mxu1 %v12032_v21  ;;  %6817 = vmatpush1.bf16.msra.mxu0 %v12033_v39  ;;  %v12041_v21 = vld [vmem:[#allocation33_spill] sm:$0xff]  ;;  %v12042_v39 = vld [vmem:[#allocation35_spill] sm:$0xff] }
 0x5cb   :  { %6819 = vmatprep.subr.bf16.mxu0 %v12034_v47  ;;  %v12043_v47 = vld [vmem:[#allocation6_spill] sm:$0xff] }
 0x5cd   :  { %6777 = vmatpush3.bf16.msra.mxu1 %v12035_v32  ;;  %v12044_v32 = vld [vmem:[#allocation7_spill] sm:$0xff] }
 0x5ce   :  { %6779 = vmatprep.subr.bf16.mxu1 %v12036_v41  ;;  %6821 = vmatpush1.bf16.msra.mxu0 %v12037_v29  ;;  %v12045_v41 = vld [vmem:[#allocation37_spill] sm:$0xff]  ;;  %v12046_v29 = vld [vmem:[#allocation39_spill] sm:$0xff] }
 0x5cf   :  { %6823 = vmatprep.subr.bf16.mxu0 %v12038_v25  ;;  %v12047_v25 = vld [vmem:[#allocation8_spill] sm:$0xff] }
 0x5d0   :  { %2558 = vmatmul.mubr.f32.vlgmr.msra.gmra.mrb[26].mxu1 %v10232_v22 }
 0x5d1   :  { %6781 = vmatpush1.bf16.msra.mxu1 %v12039_v12  ;;  %2635 = vmatprep.mubr.f32.mxu1 %v12012_v17  ;;  %v12049_v12 = vld [vmem:[#allocation41_spill] sm:$0xff] }
 0x5d2   :  { %6783 = vmatprep.subr.bf16.mxu1 %v12040_v10  ;;  %6825 = vmatpush1.bf16.msra.mxu0 %v12041_v21  ;;  %v12051_v10 = vld [vmem:[#allocation12_spill] sm:$0xff] }
 0x5d3   :  { %6827 = vmatprep.subr.bf16.mxu0 %v12042_v39  ;;  %v12052_v21 = vld [vmem:[#allocation24_spill] sm:$0xff]  ;;  %v12053_v39 = vld [vmem:[#allocation45_spill] sm:$0xff] }
 0x5d5   :  { %6785 = vmatpush1.bf16.msra.mxu1 %v12043_v47  ;;  %v12054_v47 = vld [vmem:[#allocation47_spill] sm:$0xff] }
 0x5d6   :  { %6787 = vmatprep.subr.bf16.mxu1 %v12044_v32  ;;  %6829 = vmatpush1.bf16.msra.mxu0 %v12045_v41  ;;  %v12055_v41 = vld [vmem:[#allocation25_spill] sm:$0xff] }
 0x5d7   :  { %6831 = vmatprep.subr.bf16.mxu0 %v12046_v29  ;;  %v12056_v29 = vld [vmem:[#allocation26_spill] sm:$0xff]  ;;  %v12103_v32 = vld [vmem:[#allocation81_spill] sm:$0xff] }
 0x5d9   :  { %6789 = vmatpush1.bf16.msra.mxu1 %v12047_v25  ;;  %v12057_v25 = vld [vmem:[#allocation49_spill] sm:$0xff] }
 0x5da   :  { %6791 = vmatprep.subr.bf16.mxu1 %v12048_v48  ;;  %6833 = vmatpush1.bf16.msra.mxu0 %v12049_v12  ;;  %v12058_v48 = vld [vmem:[#allocation51_spill] sm:$0xff] }
 0x5db   :  { %6835 = vmatprep.subr.bf16.mxu0 %v12050_v49  ;;  %v12059_v12 = vld [vmem:[#allocation27_spill] sm:$0xff]  ;;  %v12060_v49 = vld [vmem:[#allocation28_spill] sm:$0xff] }
 0x5dd   :  { %6793 = vmatpush1.bf16.msra.mxu1 %v12051_v10  ;;  %v12061_v10 = vld [vmem:[#allocation53_spill] sm:$0xff] }
 0x5de   :  { %6871 = vmatprep.subr.bf16.mxu1 %v12052_v21  ;;  %6837 = vmatpush1.bf16.msra.mxu0 %v12053_v39  ;;  %v12062_v21 = vld [vmem:[#allocation55_spill] sm:$0xff]  ;;  %v12063_v39 = vld [vmem:[#allocation29_spill] sm:$0xff] }
 0x5df   :  { %6839 = vmatprep.subr.bf16.mxu0 %v12054_v47  ;;  %v12064_v47 = vld [vmem:[#allocation30_spill] sm:$0xff] }
 0x5e0   :  { %4916 = vmatmul.mubr.msk.f32.vlgmr.msra.gmra.mrb[22].mxu1 %vm85_vm0, %v4915_v62  ;;  %v12065_v62 = vld [vmem:[#allocation57_spill] sm:$0xff] }
 0x5e1   :  { %6873 = vmatpush1.bf16.msra.mxu1 %v12055_v41  ;;  %v12066_v41 = vld [vmem:[#allocation59_spill] sm:$0xff] }
 0x5e2   :  { %6875 = vmatprep.subr.bf16.mxu1 %v12056_v29  ;;  %6841 = vmatpush1.bf16.msra.mxu0 %v12057_v25  ;;  %v12067_v29 = vld [vmem:[#allocation31_spill] sm:$0xff]  ;;  %v12068_v25 = vld [vmem:[#allocation32_spill] sm:$0xff] }
 0x5e3   :  { %6843 = vmatprep.subr.bf16.mxu0 %v12058_v48  ;;  %v12069_v48 = vld [vmem:[#allocation61_spill] sm:$0xff] }
 0x5e5   :  { %6877 = vmatpush1.bf16.msra.mxu1 %v12059_v12  ;;  %v12070_v12 = vld [vmem:[#allocation63_spill] sm:$0xff] }
 0x5e6   :  { %6879 = vmatprep.subr.bf16.mxu1 %v12060_v49  ;;  %6845 = vmatpush1.bf16.msra.mxu0 %v12061_v10  ;;  %v12071_v49 = vld [vmem:[#allocation34_spill] sm:$0xff]  ;;  %v12072_v10 = vld [vmem:[#allocation36_spill] sm:$0xff] }
 0x5e7   :  { %6847 = vmatprep.subr.bf16.mxu0 %v12062_v21  ;;  %v12073_v21 = vld [vmem:[#allocation65_spill] sm:$0xff] }
 0x5e9   :  { %6881 = vmatpush1.bf16.msra.mxu1 %v12063_v39  ;;  %v12074_v39 = vld [vmem:[#allocation67_spill] sm:$0xff] }
 0x5ea   :  { %6883 = vmatprep.subr.bf16.mxu1 %v12064_v47  ;;  %6849 = vmatpush1.bf16.msra.mxu0 %v12065_v62  ;;  %v12075_v47 = vld [vmem:[#allocation38_spill] sm:$0xff]  ;;  %v12076_v62 = vld [vmem:[#allocation40_spill] sm:$0xff] }
 0x5eb   :  { %6851 = vmatprep.subr.bf16.mxu0 %v12066_v41  ;;  %v12077_v41 = vld [vmem:[#allocation69_spill] sm:$0xff] }
 0x5ed   :  { %6885 = vmatpush1.bf16.msra.mxu1 %v12067_v29  ;;  %v12078_v29 = vld [vmem:[#allocation71_spill] sm:$0xff] }
 0x5ee   :  { %6887 = vmatprep.subr.bf16.mxu1 %v12068_v25  ;;  %6853 = vmatpush1.bf16.msra.mxu0 %v12069_v48  ;;  %v12079_v25 = vld [vmem:[#allocation42_spill] sm:$0xff]  ;;  %v12080_v48 = vld [vmem:[#allocation44_spill] sm:$0xff] }
 0x5ef   :  { %6855 = vmatprep.subr.bf16.mxu0 %v12070_v12  ;;  %v12081_v12 = vld [vmem:[#allocation73_spill] sm:$0xff] }
 0x5f1   :  { %6889 = vmatpush1.bf16.msra.mxu1 %v12071_v49  ;;  %v12082_v49 = vld [vmem:[#allocation75_spill] sm:$0xff] }
 0x5f2   :  { %6891 = vmatprep.subr.bf16.mxu1 %v12072_v10  ;;  %6857 = vmatpush1.bf16.msra.mxu0 %v12073_v21  ;;  %v12083_v10 = vld [vmem:[#allocation46_spill] sm:$0xff]  ;;  %v12084_v21 = vld [vmem:[#allocation48_spill] sm:$0xff] }
 0x5f3   :  { %6859 = vmatprep.subr.bf16.mxu0 %v12074_v39  ;;  %v12085_v39 = vld [vmem:[#allocation77_spill] sm:$0xff] }
 0x5f5   :  { %6893 = vmatpush1.bf16.msra.mxu1 %v12075_v47  ;;  %v12086_v47 = vld [vmem:[#allocation79_spill] sm:$0xff] }
 0x5f6   :  { %6895 = vmatprep.subr.bf16.mxu1 %v12076_v62  ;;  %6861 = vmatpush1.bf16.msra.mxu0 %v12077_v41  ;;  %v12087_v62 = vld [vmem:[#allocation50_spill] sm:$0xff]  ;;  %v12088_v41 = vld [vmem:[#allocation52_spill] sm:$0xff] }
 0x5f7   :  { %6863 = vmatprep.subr.bf16.mxu0 %v12078_v29  ;;  %v12089_v29 = vld [vmem:[#allocation54_spill] sm:$0xff] }
 0x5f9   :  { %6897 = vmatpush1.bf16.msra.mxu1 %v12079_v25  ;;  %v12090_v25 = vld [vmem:[#allocation56_spill] sm:$0xff] }
 0x5fa   :  { %6899 = vmatprep.subr.bf16.mxu1 %v12080_v48  ;;  %6865 = vmatpush1.bf16.msra.mxu0 %v12081_v12  ;;  %v12091_v48 = vld [vmem:[#allocation58_spill] sm:$0xff]  ;;  %v12092_v12 = vld [vmem:[#allocation60_spill] sm:$0xff] }
 0x5fb   :  { %6867 = vmatprep.subr.bf16.mxu0 %v12082_v49  ;;  %v12093_v49 = vld [vmem:[#allocation62_spill] sm:$0xff] }
 0x5fd   :  { %6901 = vmatpush1.bf16.msra.mxu1 %v12083_v10  ;;  %v12094_v10 = vld [vmem:[#allocation64_spill] sm:$0xff] }
 0x5fe   :  { %6903 = vmatprep.subr.bf16.mxu1 %v12084_v21  ;;  %6869 = vmatpush1.bf16.msra.mxu0 %v12085_v39  ;;  %v12095_v21 = vld [vmem:[#allocation66_spill] sm:$0xff]  ;;  %v12096_v39 = vld [vmem:[#allocation68_spill] sm:$0xff] }
 0x5ff   :  { %6935 = vmatprep.subr.bf16.mxu0 %v12086_v47  ;;  %v12097_v47 = vld [vmem:[#allocation70_spill] sm:$0xff] }
 0x601   :  { %6905 = vmatpush1.bf16.msra.mxu1 %v12087_v62  ;;  %v12098_v62 = vld [vmem:[#allocation72_spill] sm:$0xff] }
 0x602   :  { %6907 = vmatprep.subr.bf16.mxu1 %v12088_v41  ;;  %v12099_v41 = vld [vmem:[#allocation74_spill] sm:$0xff] }
 0x605   :  { %6909 = vmatpush1.bf16.msra.mxu1 %v12089_v29  ;;  %v12100_v29 = vld [vmem:[#allocation76_spill] sm:$0xff] }
 0x606   :  { %6911 = vmatprep.subr.bf16.mxu1 %v12090_v25  ;;  %v12101_v25 = vld [vmem:[#allocation78_spill] sm:$0xff] }
 0x609   :  { %6913 = vmatpush1.bf16.msra.mxu1 %v12091_v48  ;;  %v12102_v48 = vld [vmem:[#allocation80_spill] sm:$0xff] }
 0x60a   :  { %6915 = vmatprep.subr.bf16.mxu1 %v12092_v12 }
 0x60d   :  { %6917 = vmatpush1.bf16.msra.mxu1 %v12093_v49 }
 0x60e   :  { %6919 = vmatprep.subr.bf16.mxu1 %v12094_v10 }
 0x611   :  { %6921 = vmatpush1.bf16.msra.mxu1 %v12095_v21 }
 0x612   :  { %6923 = vmatprep.subr.bf16.mxu1 %v12096_v39 }
 0x615   :  { %6925 = vmatpush1.bf16.msra.mxu1 %v12097_v47 }
 0x616   :  { %6927 = vmatprep.subr.bf16.mxu1 %v12098_v62 }
 0x619   :  { %6929 = vmatpush1.bf16.msra.mxu1 %v12099_v41 }
 0x61a   :  { %6931 = vmatprep.subr.bf16.mxu1 %v12100_v29 }
 0x61d   :  { %6933 = vmatpush1.bf16.msra.mxu1 %v12101_v25 }
 0x61e   :  { %6999 = vmatprep.subr.bf16.mxu1 %v12102_v48 }
 0x643   :  { %v2346_v12 = vpop.f32.mrb[18].mxu0 }
 0x644   :  { %v2348_v49 = vpop.f32.mrb[19].mxu0 }
 0x645   :  { %v2563_v10 = vadd.f32 %v2348_v49, %v12103_v32 }
 0x683   :  { %v2417_v17 = vpop.f32.mrb[24].mxu1  ;;  %v2488_v21 = vpop.f32.mrb[20].mxu0 }
 0x684   :  { %v2564_v39 = vadd.f32 %v2417_v17, %v11856_v61  ;;  %v2734_v51 = vadd.f32 %v2563_v10, %v2488_v21  ;;  %v2419_v47 = vpop.f32.mrb[25].mxu1  ;;  %v2490_v23 = vpop.f32.mrb[21].mxu0  ;;  %v10415_v10 = vld [vmem:[%s11150_s6] ss:$0 sm:$0xff] }
 0x685   :  { %12104 = vst [vmem:[#allocation82_spill] sm:$0xff] %v10415_v10  ;;  %v2565_v17 = vadd.f32 %v2419_v47, %v9830_v24 }
 0x686   :  { %v2735_v62 = vadd.f32 %v2564_v39, %v2490_v23  ;;  %v4920_v6 = vmul.f32 -1.442695, %v2734_v51 }
 0x688   :  { %8106 = vpow2.f32 %v4920_v6  ;;  %v4921_v41 = vmul.f32 -1.442695, %v2735_v62 }
 0x68a   :  { %8108 = vpow2.f32 %v4921_v41 }
 0x692   :  { %v8107_v25 = vpop.eup %8106 }
 0x693   :  { %v2742_v48 = vadd.f32 1.0, %v8107_v25 }
 0x694   :  { %v2708_v29 = vpop.f32.mrb[22].mxu0  ;;  %v8109_v31 = vpop.eup %8108 }
 0x695   :  { %v5414_v52 = vpop.f32.mrb[23].mxu0  ;;  %8110 = vrcp.f32 %v2742_v48  ;;  %v2743_v32 = vadd.f32 1.0, %v8109_v31 }
 0x697   :  { %8112 = vrcp.f32 %v2743_v32 }
 0x69f   :  { %v8111_v6 = vpop.eup %8110 }
 0x6a1   :  { %v8113_v51 = vpop.eup %8112 }
 0x6a3   :  { %v5121_v35 = vpop.f32.mrb[26].mxu1 }
 0x6a4   :  { %v5122_v49 = vpop.f32.mrb[27].mxu1 }
 0x6a5   :  { %v5123_v55 = vadd.f32 %v5122_v49, %v5121_v35  ;;  %v2752_v35 = vsub.f32 1.0, %v8113_v51  ;;  %v2754_v49 = vmul.f32 %v8113_v51, %v10225_v58 }
 0x6a7   :  { %v2748_v21 = vadd.f32 %v10415_v10, %v5123_v55 }
 0x6a9   :  { %v2749_v52 = vmul.f32 %v8111_v6, %v2748_v21 }
 0x6ab   :  { %v2750_v23 = vadd.f32 %v2749_v52, %v2565_v17  ;;  %v2726_v52 = vadd.f32 %v10035_v4, %v2346_v12  ;;  %v12105_v12 = vld [vmem:[#allocation121_spill] sm:$0xff]  ;;  %v12107_v4 = vld [vmem:[#allocation123_spill] sm:$0xff] }
 0x6ad   :  { %8114 = vtanh.f32 %v2750_v23  ;;  %v2709_v23 = vadd.f32 %v2708_v29, %v11735_v30  ;;  %v12106_v29 = vld [vmem:[#allocation122_spill] sm:$0xff] }
 0x6b3   :  { %v2637_v39 = vpop.f32.mrb[22].mxu1 }
 0x6b4   :  { %v2638_v48 = vadd.f32 %v2637_v39, %v11732_v34  ;;  %v2639_v31 = vpop.f32.mrb[23].mxu1 }
 0x6b5   :  { %v2640_v62 = vadd.f32 %v2639_v31, %v11733_v42 }
 0x6b6   :  { %v4918_v41 = vmul.f32 -1.442695, %v2638_v48 }
 0x6b7   :  { %v8115_v25 = vpop.eup %8114  ;;  %v4919_v32 = vmul.f32 -1.442695, %v2640_v62 }
 0x6b8   :  { %v2753_v55 = vmul.f32 %v8115_v25, %v2752_v35  ;;  %8116 = vpow2.f32 %v4918_v41 }
 0x6b9   :  { %8118 = vpow2.f32 %v4919_v32  ;;  %v12111_v32 = vld [vmem:[#allocation127_spill] sm:$0xff] }
 0x6ba   :  { %v10422_v10 = vadd.f32 %v2754_v49, %v2753_v55  ;;  %v12109_v49 = vld [vmem:[#allocation125_spill] sm:$0xff]  ;;  %v12110_v55 = vld [vmem:[#allocation126_spill] sm:$0xff] }
 0x6bc   :  { %2820 = vmatprep.mubr.f32.mxu0 %v10422_v10  ;;  %2891 = vmatprep.mubr.f32.mxu1 %v10422_v10 }
 0x6c2   :  { %v8117_v47 = vpop.eup %8116 }
 0x6c3   :  { %v2720_v21 = vadd.f32 1.0, %v8117_v47  ;;  %v8119_v6 = vpop.eup %8118  ;;  %v12112_v47 = vld [vmem:[#allocation128_spill] sm:$0xff] }
 0x6c4   :  { %v2721_v17 = vadd.f32 1.0, %v8119_v6  ;;  %v12114_v6 = vld [vmem:[#allocation130_spill] sm:$0xff] }
 0x6c5   :  { %8120 = vrcp.f32 %v2720_v21  ;;  %v12113_v21 = vld [vmem:[#allocation129_spill] sm:$0xff] }
 0x6c6   :  { %8122 = vrcp.f32 %v2721_v17  ;;  %v12115_v17 = vld [vmem:[#allocation131_spill] sm:$0xff] }
 0x6cf   :  { %v8121_v58 = vpop.eup %8120 }
 0x6d0   :  { %v2727_v51 = vmul.f32 %v8121_v58, %v2726_v52  ;;  %v8123_v48 = vpop.eup %8122  ;;  %v12116_v52 = vld [vmem:[#allocation132_spill] sm:$0xff]  ;;  %v12118_v58 = vld [vmem:[#allocation134_spill] sm:$0xff] }
 0x6d1   :  { %v2730_v31 = vsub.f32 1.0, %v8123_v48  ;;  %v2732_v41 = vmul.f32 %v8123_v48, %v10232_v22  ;;  %v12108_v22 = vld [vmem:[#allocation124_spill] sm:$0xff]  ;;  %v12121_v48 = vld [vmem:[#allocation137_spill] sm:$0xff] }
 0x6d2   :  { %v2728_v39 = vadd.f32 %v2727_v51, %v2709_v23  ;;  %v12117_v23 = vld [vmem:[#allocation133_spill] sm:$0xff]  ;;  %v12119_v51 = vld [vmem:[#allocation135_spill] sm:$0xff] }
 0x6d4   :  { %8124 = vtanh.f32 %v2728_v39  ;;  %v12120_v39 = vld [vmem:[#allocation136_spill] sm:$0xff] }
 0x6de   :  { %v8125_v35 = vpop.eup %8124 }
 0x6df   :  { %v2731_v25 = vmul.f32 %v8125_v35, %v2730_v31  ;;  %v12122_v31 = vld [vmem:[#allocation138_spill] sm:$0xff]  ;;  %v12123_v35 = vld [vmem:[#allocation139_spill] sm:$0xff] }
 0x6e1   :  { %v10429_v62 = vadd.f32 %v2732_v41, %v2731_v25  ;;  %v12124_v41 = vld [vmem:[#allocation140_spill] sm:$0xff]  ;;  %v12125_v25 = vld [vmem:[#allocation141_spill] sm:$0xff] }
 0x6e3   :  { %2821 = vmatmul.mubr.f32.vlgmr.msra.gmra.mrb[24].mxu0 %v10429_v62  ;;  %2892 = vmatmul.mubr.f32.vlgmr.msra.gmra.mrb[28].mxu1 %v10429_v62 }
 0x6e4   :  { %6937 = vmatpush1.bf16.msra.mxu0 %v9032_v3  ;;  %7001 = vmatpush1.bf16.msra.mxu1 %v11736_v16 }
 0x6e5   :  { %2962 = vmatprep.mubr.f32.mxu0 %v10422_v10  ;;  %3033 = vmatprep.mubr.f32.mxu1 %v10422_v10 }
 0x6e6   :  { %6939 = vmatprep.subr.bf16.mxu0 %v11737_v5  ;;  %7003 = vmatprep.subr.bf16.mxu1 %v11738_v53 }
 0x6e8   :  { %6941 = vmatpush1.bf16.msra.mxu0 %v11739_v50  ;;  %7005 = vmatpush1.bf16.msra.mxu1 %v11740_v46 }
 0x6e9   :  { %6943 = vmatprep.subr.bf16.mxu0 %v11741_v59  ;;  %7007 = vmatprep.subr.bf16.mxu1 %v11742_v13 }
 0x6ec   :  { %6945 = vmatpush1.bf16.msra.mxu0 %v11857_v18  ;;  %7009 = vmatpush1.bf16.msra.mxu1 %v11858_v28 }
 0x6ed   :  { %6947 = vmatprep.subr.bf16.mxu0 %v11859_v11  ;;  %7011 = vmatprep.subr.bf16.mxu1 %v11860_v7 }
 0x6f0   :  { %6949 = vmatpush1.bf16.msra.mxu0 %v11861_v14  ;;  %7013 = vmatpush1.bf16.msra.mxu1 %v11862_v15 }
 0x6f1   :  { %6951 = vmatprep.subr.bf16.mxu0 %v11863_v8  ;;  %7015 = vmatprep.subr.bf16.mxu1 %v11864_v9 }
 0x6f4   :  { %6953 = vmatpush1.bf16.msra.mxu0 %v11980_v33  ;;  %7017 = vmatpush1.bf16.msra.mxu1 %v11981_v38 }
 0x6f5   :  { %6955 = vmatprep.subr.bf16.mxu0 %v11982_v57  ;;  %7019 = vmatprep.subr.bf16.mxu1 %v11983_v60 }
 0x6f8   :  { %6957 = vmatpush1.bf16.msra.mxu0 %v11984_v54  ;;  %7021 = vmatpush1.bf16.msra.mxu1 %v11985_v2 }
 0x6f9   :  { %6959 = vmatprep.subr.bf16.mxu0 %v11986_v43  ;;  %7023 = vmatprep.subr.bf16.mxu1 %v11987_v27 }
 0x6fc   :  { %6961 = vmatpush1.bf16.msra.mxu0 %v11988_v45  ;;  %7025 = vmatpush1.bf16.msra.mxu1 %v11989_v63 }
 0x6fd   :  { %6963 = vmatprep.subr.bf16.mxu0 %v11990_v19  ;;  %7027 = vmatprep.subr.bf16.mxu1 %v11991_v40 }
 0x700   :  { %6965 = vmatpush1.bf16.msra.mxu0 %v11992_v0  ;;  %7029 = vmatpush1.bf16.msra.mxu1 %v11993_v44 }
 0x701   :  { %6967 = vmatprep.subr.bf16.mxu0 %v11879_v56  ;;  %7031 = vmatprep.subr.bf16.mxu1 %v11994_v37 }
 0x704   :  { %6969 = vmatpush1.bf16.msra.mxu0 %v11881_v1  ;;  %7033 = vmatpush1.bf16.msra.mxu1 %v11882_v20 }
 0x705   :  { %6971 = vmatprep.subr.bf16.mxu0 %v11995_v36  ;;  %7035 = vmatprep.subr.bf16.mxu1 %v11884_v26 }
 0x708   :  { %6973 = vmatpush1.bf16.msra.mxu0 %v12105_v12  ;;  %7037 = vmatpush1.bf16.msra.mxu1 %v12106_v29  ;;  %v12228_v12 = vld [vmem:[#allocation82_spill] sm:$0xff] }
 0x709   :  { %6975 = vmatprep.subr.bf16.mxu0 %v12107_v4  ;;  %7039 = vmatprep.subr.bf16.mxu1 %v12108_v22 }
 0x70c   :  { %6977 = vmatpush1.bf16.msra.mxu0 %v12109_v49  ;;  %7041 = vmatpush1.bf16.msra.mxu1 %v12110_v55 }
 0x70d   :  { %6979 = vmatprep.subr.bf16.mxu0 %v12111_v32  ;;  %7043 = vmatprep.subr.bf16.mxu1 %v12112_v47 }
 0x710   :  { %6981 = vmatpush1.bf16.msra.mxu0 %v12113_v21  ;;  %7045 = vmatpush1.bf16.msra.mxu1 %v12114_v6  ;;  %v12156_v6 = vld [vmem:[#allocation161_spill] sm:$0xff]  ;;  %v12158_v21 = vld [vmem:[#allocation18_spill] sm:$0xff] }
 0x711   :  { %6983 = vmatprep.subr.bf16.mxu0 %v12115_v17  ;;  %7047 = vmatprep.subr.bf16.mxu1 %v12116_v52  ;;  %v12126_v17 = vld [vmem:[#allocation142_spill] sm:$0xff]  ;;  %v12127_v52 = vld [vmem:[#allocation143_spill] sm:$0xff] }
 0x714   :  { %6985 = vmatpush1.bf16.msra.mxu0 %v12117_v23  ;;  %7049 = vmatpush1.bf16.msra.mxu1 %v12118_v58  ;;  %v12128_v23 = vld [vmem:[#allocation144_spill] sm:$0xff]  ;;  %v12129_v58 = vld [vmem:[#allocation145_spill] sm:$0xff] }
 0x715   :  { %6987 = vmatprep.subr.bf16.mxu0 %v12119_v51  ;;  %7051 = vmatprep.subr.bf16.mxu1 %v12120_v39  ;;  %v12130_v51 = vld [vmem:[#allocation146_spill] sm:$0xff]  ;;  %v12131_v39 = vld [vmem:[#allocation147_spill] sm:$0xff] }
 0x718   :  { %6989 = vmatpush1.bf16.msra.mxu0 %v12121_v48  ;;  %7053 = vmatpush1.bf16.msra.mxu1 %v12122_v31  ;;  %v12132_v48 = vmov 0.0|0.0   ;;  %v12145_v31 = vld [vmem:[#allocation23_spill] sm:$0xff] }
 0x719   :  { %6991 = vmatprep.subr.bf16.mxu0 %v12123_v35  ;;  %7055 = vmatprep.subr.bf16.mxu1 %v12124_v41  ;;  %v12133_v41 = vld [vmem:[#allocation148_spill] sm:$0xff]  ;;  %v12144_v35 = vld [vmem:[#allocation155_spill] sm:$0xff] }
 0x71c   :  { %6993 = vmatpush1.bf16.msra.mxu0 %v12125_v25  ;;  %7057 = vmatpush1.bf16.msra.mxu1 %v12126_v17  ;;  %v12134_v17 = vld [vmem:[#allocation149_spill] sm:$0xff] }
 0x71d   :  { %6995 = vmatprep.subr.bf16.mxu0 %v12127_v52  ;;  %7059 = vmatprep.subr.bf16.mxu1 %v12128_v23  ;;  %v12135_v52 = vld [vmem:[#allocation16_spill] sm:$0xff]  ;;  %v12139_v23 = vld [vmem:[#allocation19_spill] sm:$0xff]  ;;  %v12141_v25 = vld [vmem:[#allocation153_spill] sm:$0xff] }
 0x720   :  { %6997 = vmatpush1.bf16.msra.mxu0 %v12129_v58  ;;  %7061 = vmatpush1.bf16.msra.mxu1 %v12130_v51  ;;  %v12136_v58 = vmov 0.0   ;;  %v12138_v51 = vld [vmem:[#allocation151_spill] sm:$0xff] }
 0x721   :  { %7063 = vmatprep.subr.bf16.mxu0 %v12131_v39  ;;  %7110 = vmatprep.subr.bf16.mxu1 %v12132_v48  ;;  %v12137_v39 = vld [vmem:[#allocation150_spill] sm:$0xff] }
 0x723   :  { %2963 = vmatmul.mubr.f32.vlgmr.msra.gmra.mrb[26].mxu0 %v10429_v62  ;;  %3034 = vmatmul.mubr.f32.vlgmr.msra.gmra.mrb[30].mxu1 %v10429_v62 }
 0x724   :  { %7065 = vmatpush3.bf16.msra.mxu0 %v12133_v41  ;;  %3104 = vmatprep.mubr.f32.mxu0 %v10422_v10  ;;  %v12140_v41 = vld [vmem:[#allocation152_spill] sm:$0xff] }
 0x725   :  { %7067 = vmatprep.subr.bf16.mxu0 %v12134_v17  ;;  %7112 = vmatpush3.bf16.msra.mxu1 %v12135_v52  ;;  %v12142_v17 = vld [vmem:[#allocation22_spill] sm:$0xff] }
 0x726   :  { %7113 = vmatprep.subr.bf16.mxu1 %v12132_v48  ;;  %5431 = vmatprep.mubr.msk.f32.mxu1 %vm8202_vm1, %v12136_v58  ;;  %v12143_v52 = vld [vmem:[#allocation154_spill] sm:$0xff] }
 0x728   :  { %7069 = vmatpush3.bf16.msra.mxu0 %v12137_v39  ;;  %v12146_v39 = vld [vmem:[#allocation10_spill] sm:$0xff] }
 0x729   :  { %7071 = vmatprep.subr.bf16.mxu0 %v12138_v51  ;;  %7115 = vmatpush3.bf16.msra.mxu1 %v12139_v23  ;;  %v4922_v23 = vld [vmem:[%s11146_s0 + $0xa] sm:$0x3] }
 0x72a   :  { %7116 = vmatprep.subr.bf16.mxu1 %v12132_v48  ;;  %v12147_v51 = vld [vmem:[#allocation156_spill] sm:$0xff] }
 0x72c   :  { %7073 = vmatpush3.bf16.msra.mxu0 %v12140_v41  ;;  %v12150_v41 = vld [vmem:[#allocation13_spill] sm:$0xff] }
 0x72d   :  { %7075 = vmatprep.subr.bf16.mxu0 %v12141_v25  ;;  %7118 = vmatpush3.bf16.msra.mxu1 %v12142_v17  ;;  %v12148_v25 = vld [vmem:[#allocation157_spill] sm:$0xff]  ;;  %v12149_v17 = vld [vmem:[#allocation11_spill] sm:$0xff] }
 0x72e   :  { %7119 = vmatprep.subr.bf16.mxu1 %v12132_v48  ;;  %v12155_v48 = vld [vmem:[#allocation160_spill] sm:$0xff] }
 0x730   :  { %7077 = vmatpush3.bf16.msra.mxu0 %v12143_v52  ;;  %v12151_v52 = vld [vmem:[#allocation158_spill] sm:$0xff] }
 0x731   :  { %7079 = vmatprep.subr.bf16.mxu0 %v12144_v35  ;;  %7121 = vmatpush3.bf16.msra.mxu1 %v12145_v31  ;;  %v12152_v35 = vld [vmem:[#allocation159_spill] sm:$0xff]  ;;  %v12153_v31 = vld [vmem:[#allocation14_spill] sm:$0xff] }
 0x732   :  { %7123 = vmatprep.subr.bf16.mxu1 %v12146_v39  ;;  %v12154_v39 = vld [vmem:[#allocation15_spill] sm:$0xff] }
 0x734   :  { %7081 = vmatpush3.bf16.msra.mxu0 %v12147_v51  ;;  %5432 = vmatmul.mubr.msk.f32.vlgmr.msra.gmra.mrb[32].mxu1 %vm85_vm0, %v4922_v23  ;;  %v12157_v51 = vld [vmem:[#allocation17_spill] sm:$0xff] }
 0x735   :  { %7083 = vmatprep.subr.bf16.mxu0 %v12148_v25  ;;  %7125 = vmatpush1.bf16.msra.mxu1 %v12149_v17  ;;  %v12159_v25 = vld [vmem:[#allocation162_spill] sm:$0xff]  ;;  %v12160_v17 = vld [vmem:[#allocation3_spill] sm:$0xff] }
 0x736   :  { %7127 = vmatprep.subr.bf16.mxu1 %v12150_v41  ;;  %v12161_v41 = vld [vmem:[#allocation20_spill] sm:$0xff] }
 0x738   :  { %7085 = vmatpush3.bf16.msra.mxu0 %v12151_v52  ;;  %v12162_v52 = vld [vmem:[#allocation21_spill] sm:$0xff] }
 0x739   :  { %7087 = vmatprep.subr.bf16.mxu0 %v12152_v35  ;;  %7129 = vmatpush1.bf16.msra.mxu1 %v12153_v31  ;;  %v12163_v31 = vld [vmem:[#allocation4_spill] sm:$0xff]  ;;  %v12174_v35 = vld [vmem:[#allocation43_spill] sm:$0xff] }
 0x73a   :  { %7131 = vmatprep.subr.bf16.mxu1 %v12154_v39  ;;  %v12172_v39 = vld [vmem:[#allocation9_spill] sm:$0xff] }
 0x73c   :  { %7089 = vmatpush3.bf16.msra.mxu0 %v12155_v48  ;;  %v12164_v48 = vld [vmem:[#allocation5_spill] sm:$0xff] }
 0x73d   :  { %7091 = vmatprep.subr.bf16.mxu0 %v12156_v6  ;;  %7133 = vmatpush1.bf16.msra.mxu1 %v12157_v51  ;;  %v12165_v6 = vld [vmem:[#allocation33_spill] sm:$0xff]  ;;  %v12166_v51 = vld [vmem:[#allocation35_spill] sm:$0xff] }
 0x73e   :  { %7135 = vmatprep.subr.bf16.mxu1 %v12158_v21  ;;  %v12167_v21 = vld [vmem:[#allocation6_spill] sm:$0xff] }
 0x740   :  { %7093 = vmatpush3.bf16.msra.mxu0 %v12159_v25  ;;  %v12168_v25 = vld [vmem:[#allocation7_spill] sm:$0xff] }
 0x741   :  { %7095 = vmatprep.subr.bf16.mxu0 %v12160_v17  ;;  %7137 = vmatpush1.bf16.msra.mxu1 %v12161_v41  ;;  %v12169_v17 = vld [vmem:[#allocation37_spill] sm:$0xff]  ;;  %v12170_v41 = vld [vmem:[#allocation39_spill] sm:$0xff] }
 0x742   :  { %7139 = vmatprep.subr.bf16.mxu1 %v12162_v52  ;;  %v12171_v52 = vld [vmem:[#allocation8_spill] sm:$0xff] }
 0x743   :  { %3105 = vmatmul.mubr.f32.vlgmr.msra.gmra.mrb[28].mxu0 %v10429_v62 }
 0x744   :  { %7097 = vmatpush1.bf16.msra.mxu0 %v12163_v31  ;;  %3182 = vmatprep.mubr.f32.mxu0 %v12136_v58  ;;  %v12173_v31 = vld [vmem:[#allocation41_spill] sm:$0xff] }
 0x745   :  { %7099 = vmatprep.subr.bf16.mxu0 %v12164_v48  ;;  %7141 = vmatpush1.bf16.msra.mxu1 %v12165_v6  ;;  %v12175_v48 = vld [vmem:[#allocation12_spill] sm:$0xff] }
 0x746   :  { %7143 = vmatprep.subr.bf16.mxu1 %v12166_v51  ;;  %v12176_v6 = vld [vmem:[#allocation24_spill] sm:$0xff]  ;;  %v12177_v51 = vld [vmem:[#allocation45_spill] sm:$0xff] }
 0x748   :  { %7101 = vmatpush1.bf16.msra.mxu0 %v12167_v21  ;;  %v12178_v21 = vld [vmem:[#allocation47_spill] sm:$0xff] }
 0x749   :  { %7103 = vmatprep.subr.bf16.mxu0 %v12168_v25  ;;  %7145 = vmatpush1.bf16.msra.mxu1 %v12169_v17  ;;  %v12179_v17 = vld [vmem:[#allocation25_spill] sm:$0xff] }
 0x74a   :  { %7147 = vmatprep.subr.bf16.mxu1 %v12170_v41  ;;  %v12180_v41 = vld [vmem:[#allocation26_spill] sm:$0xff]  ;;  %v12227_v25 = vld [vmem:[#allocation81_spill] sm:$0xff] }
 0x74c   :  { %7105 = vmatpush1.bf16.msra.mxu0 %v12171_v52  ;;  %v12181_v52 = vld [vmem:[#allocation49_spill] sm:$0xff] }
 0x74d   :  { %7107 = vmatprep.subr.bf16.mxu0 %v12172_v39  ;;  %7149 = vmatpush1.bf16.msra.mxu1 %v12173_v31  ;;  %v12182_v39 = vld [vmem:[#allocation51_spill] sm:$0xff] }
 0x74e   :  { %7151 = vmatprep.subr.bf16.mxu1 %v12174_v35  ;;  %v12183_v31 = vld [vmem:[#allocation27_spill] sm:$0xff]  ;;  %v12184_v35 = vld [vmem:[#allocation28_spill] sm:$0xff] }
 0x750   :  { %7109 = vmatpush1.bf16.msra.mxu0 %v12175_v48  ;;  %v12185_v48 = vld [vmem:[#allocation53_spill] sm:$0xff] }
 0x751   :  { %7187 = vmatprep.subr.bf16.mxu0 %v12176_v6  ;;  %7153 = vmatpush1.bf16.msra.mxu1 %v12177_v51  ;;  %v12186_v6 = vld [vmem:[#allocation55_spill] sm:$0xff]  ;;  %v12187_v51 = vld [vmem:[#allocation29_spill] sm:$0xff] }
 0x752   :  { %7155 = vmatprep.subr.bf16.mxu1 %v12178_v21  ;;  %v12188_v21 = vld [vmem:[#allocation30_spill] sm:$0xff] }
 0x753   :  { %4923 = vmatmul.mubr.msk.f32.vlgmr.msra.gmra.mrb[24].mxu0 %vm85_vm0, %v4922_v23  ;;  %v12189_v23 = vld [vmem:[#allocation57_spill] sm:$0xff] }
 0x754   :  { %7189 = vmatpush1.bf16.msra.mxu0 %v12179_v17  ;;  %v12190_v17 = vld [vmem:[#allocation59_spill] sm:$0xff] }
 0x755   :  { %7191 = vmatprep.subr.bf16.mxu0 %v12180_v41  ;;  %7157 = vmatpush1.bf16.msra.mxu1 %v12181_v52  ;;  %v12191_v41 = vld [vmem:[#allocation31_spill] sm:$0xff]  ;;  %v12192_v52 = vld [vmem:[#allocation32_spill] sm:$0xff] }
 0x756   :  { %7159 = vmatprep.subr.bf16.mxu1 %v12182_v39  ;;  %v12193_v39 = vld [vmem:[#allocation61_spill] sm:$0xff] }
 0x758   :  { %7193 = vmatpush1.bf16.msra.mxu0 %v12183_v31  ;;  %v12194_v31 = vld [vmem:[#allocation63_spill] sm:$0xff] }
 0x759   :  { %7195 = vmatprep.subr.bf16.mxu0 %v12184_v35  ;;  %7161 = vmatpush1.bf16.msra.mxu1 %v12185_v48  ;;  %v12195_v35 = vld [vmem:[#allocation34_spill] sm:$0xff]  ;;  %v12196_v48 = vld [vmem:[#allocation36_spill] sm:$0xff] }
 0x75a   :  { %7163 = vmatprep.subr.bf16.mxu1 %v12186_v6  ;;  %v12197_v6 = vld [vmem:[#allocation65_spill] sm:$0xff] }
 0x75c   :  { %7197 = vmatpush1.bf16.msra.mxu0 %v12187_v51  ;;  %v12198_v51 = vld [vmem:[#allocation67_spill] sm:$0xff] }
 0x75d   :  { %7199 = vmatprep.subr.bf16.mxu0 %v12188_v21  ;;  %7165 = vmatpush1.bf16.msra.mxu1 %v12189_v23  ;;  %v12199_v21 = vld [vmem:[#allocation38_spill] sm:$0xff]  ;;  %v12200_v23 = vld [vmem:[#allocation40_spill] sm:$0xff] }
 0x75e   :  { %7167 = vmatprep.subr.bf16.mxu1 %v12190_v17  ;;  %v12201_v17 = vld [vmem:[#allocation69_spill] sm:$0xff] }
 0x760   :  { %7201 = vmatpush1.bf16.msra.mxu0 %v12191_v41  ;;  %v12202_v41 = vld [vmem:[#allocation71_spill] sm:$0xff] }
 0x761   :  { %7203 = vmatprep.subr.bf16.mxu0 %v12192_v52  ;;  %7169 = vmatpush1.bf16.msra.mxu1 %v12193_v39  ;;  %v12203_v52 = vld [vmem:[#allocation42_spill] sm:$0xff]  ;;  %v12204_v39 = vld [vmem:[#allocation44_spill] sm:$0xff] }
 0x762   :  { %7171 = vmatprep.subr.bf16.mxu1 %v12194_v31  ;;  %v12205_v31 = vld [vmem:[#allocation73_spill] sm:$0xff] }
 0x764   :  { %7205 = vmatpush1.bf16.msra.mxu0 %v12195_v35  ;;  %v12206_v35 = vld [vmem:[#allocation75_spill] sm:$0xff] }
 0x765   :  { %7207 = vmatprep.subr.bf16.mxu0 %v12196_v48  ;;  %7173 = vmatpush1.bf16.msra.mxu1 %v12197_v6  ;;  %v12207_v48 = vld [vmem:[#allocation46_spill] sm:$0xff]  ;;  %v12208_v6 = vld [vmem:[#allocation48_spill] sm:$0xff] }
 0x766   :  { %7175 = vmatprep.subr.bf16.mxu1 %v12198_v51  ;;  %v12209_v51 = vld [vmem:[#allocation77_spill] sm:$0xff] }
 0x768   :  { %7209 = vmatpush1.bf16.msra.mxu0 %v12199_v21  ;;  %v12210_v21 = vld [vmem:[#allocation79_spill] sm:$0xff] }
 0x769   :  { %7211 = vmatprep.subr.bf16.mxu0 %v12200_v23  ;;  %7177 = vmatpush1.bf16.msra.mxu1 %v12201_v17  ;;  %v12211_v23 = vld [vmem:[#allocation50_spill] sm:$0xff]  ;;  %v12212_v17 = vld [vmem:[#allocation52_spill] sm:$0xff] }
 0x76a   :  { %7179 = vmatprep.subr.bf16.mxu1 %v12202_v41  ;;  %v12213_v41 = vld [vmem:[#allocation54_spill] sm:$0xff] }
 0x76c   :  { %7213 = vmatpush1.bf16.msra.mxu0 %v12203_v52  ;;  %v12214_v52 = vld [vmem:[#allocation56_spill] sm:$0xff] }
 0x76d   :  { %7215 = vmatprep.subr.bf16.mxu0 %v12204_v39  ;;  %7181 = vmatpush1.bf16.msra.mxu1 %v12205_v31  ;;  %v12215_v39 = vld [vmem:[#allocation58_spill] sm:$0xff]  ;;  %v12216_v31 = vld [vmem:[#allocation60_spill] sm:$0xff] }
 0x76e   :  { %7183 = vmatprep.subr.bf16.mxu1 %v12206_v35  ;;  %v12217_v35 = vld [vmem:[#allocation62_spill] sm:$0xff] }
 0x770   :  { %7217 = vmatpush1.bf16.msra.mxu0 %v12207_v48  ;;  %v12218_v48 = vld [vmem:[#allocation64_spill] sm:$0xff] }
 0x771   :  { %7219 = vmatprep.subr.bf16.mxu0 %v12208_v6  ;;  %7185 = vmatpush1.bf16.msra.mxu1 %v12209_v51  ;;  %v12219_v6 = vld [vmem:[#allocation66_spill] sm:$0xff]  ;;  %v12220_v51 = vld [vmem:[#allocation68_spill] sm:$0xff] }
 0x772   :  { %7251 = vmatprep.subr.bf16.mxu1 %v12210_v21  ;;  %v12221_v21 = vld [vmem:[#allocation70_spill] sm:$0xff] }
 0x774   :  { %7221 = vmatpush1.bf16.msra.mxu0 %v12211_v23  ;;  %v12222_v23 = vld [vmem:[#allocation72_spill] sm:$0xff] }
 0x775   :  { %7223 = vmatprep.subr.bf16.mxu0 %v12212_v17  ;;  %v12223_v17 = vld [vmem:[#allocation74_spill] sm:$0xff] }
 0x778   :  { %7225 = vmatpush1.bf16.msra.mxu0 %v12213_v41  ;;  %v12224_v41 = vld [vmem:[#allocation76_spill] sm:$0xff] }
 0x779   :  { %7227 = vmatprep.subr.bf16.mxu0 %v12214_v52  ;;  %v12225_v52 = vld [vmem:[#allocation78_spill] sm:$0xff] }
 0x77c   :  { %7229 = vmatpush1.bf16.msra.mxu0 %v12215_v39  ;;  %v12226_v39 = vld [vmem:[#allocation80_spill] sm:$0xff] }
 0x77d   :  { %7231 = vmatprep.subr.bf16.mxu0 %v12216_v31 }
 0x780   :  { %7233 = vmatpush1.bf16.msra.mxu0 %v12217_v35 }
 0x781   :  { %7235 = vmatprep.subr.bf16.mxu0 %v12218_v48 }
 0x784   :  { %7237 = vmatpush1.bf16.msra.mxu0 %v12219_v6 }
 0x785   :  { %7239 = vmatprep.subr.bf16.mxu0 %v12220_v51 }
 0x788   :  { %7241 = vmatpush1.bf16.msra.mxu0 %v12221_v21 }
 0x789   :  { %7243 = vmatprep.subr.bf16.mxu0 %v12222_v23 }
 0x78c   :  { %7245 = vmatpush1.bf16.msra.mxu0 %v12223_v17 }
 0x78d   :  { %7247 = vmatprep.subr.bf16.mxu0 %v12224_v41 }
 0x790   :  { %7249 = vmatpush1.bf16.msra.mxu0 %v12225_v52 }
 0x791   :  { %7315 = vmatprep.subr.bf16.mxu0 %v12226_v39 }
 0x7b6   :  { %v2893_v31 = vpop.f32.mrb[28].mxu1 }
 0x7b7   :  { %v2895_v35 = vpop.f32.mrb[29].mxu1 }
 0x7b8   :  { %v3110_v48 = vadd.f32 %v2895_v35, %v12227_v25 }
 0x7f6   :  { %v2964_v58 = vpop.f32.mrb[26].mxu0  ;;  %v3035_v6 = vpop.f32.mrb[30].mxu1 }
 0x7f7   :  { %v3111_v51 = vadd.f32 %v2964_v58, %v11856_v61  ;;  %v3281_v47 = vadd.f32 %v3110_v48, %v3035_v6  ;;  %v2966_v21 = vpop.f32.mrb[27].mxu0  ;;  %v3037_v32 = vpop.f32.mrb[31].mxu1 }
 0x7f8   :  { %v3112_v48 = vadd.f32 %v2966_v21, %v9830_v24 }
 0x7f9   :  { %v3282_v23 = vadd.f32 %v3111_v51, %v3037_v32  ;;  %v4927_v55 = vmul.f32 -1.442695, %v3281_v47 }
 0x7fb   :  { %8126 = vpow2.f32 %v4927_v55  ;;  %v4928_v17 = vmul.f32 -1.442695, %v3282_v23 }
 0x7fd   :  { %8128 = vpow2.f32 %v4928_v17 }
 0x805   :  { %v8127_v52 = vpop.eup %8126 }
 0x806   :  { %v3289_v39 = vadd.f32 1.0, %v8127_v52 }
 0x807   :  { %v3255_v41 = vpop.f32.mrb[32].mxu1  ;;  %v8129_v22 = vpop.eup %8128 }
 0x808   :  { %v5433_v49 = vpop.f32.mrb[33].mxu1  ;;  %8130 = vrcp.f32 %v3289_v39  ;;  %v3290_v25 = vadd.f32 1.0, %v8129_v22 }
 0x80a   :  { %8132 = vrcp.f32 %v3290_v25 }
 0x812   :  { %v8131_v6 = vpop.eup %8130 }
 0x814   :  { %v8133_v47 = vpop.eup %8132 }
 0x815   :  { %v3299_v51 = vsub.f32 1.0, %v8133_v47 }
 0x816   :  { %v5165_v4 = vpop.f32.mrb[28].mxu0 }
 0x817   :  { %v5166_v35 = vpop.f32.mrb[29].mxu0 }
 0x818   :  { %v5167_v29 = vadd.f32 %v5166_v35, %v5165_v4  ;;  %v3301_v4 = vmul.f32 %v8133_v47, %v10422_v10 }
 0x81a   :  { %v3295_v58 = vadd.f32 %v12228_v12, %v5167_v29 }
 0x81c   :  { %v3296_v32 = vmul.f32 %v8131_v6, %v3295_v58 }
 0x81e   :  { %v3297_v55 = vadd.f32 %v3296_v32, %v3112_v48  ;;  %v10621_v32 = vld [vmem:[%s11148_s3] ss:$0 sm:$0xff] }
 0x81f   :  { %v3273_v10 = vadd.f32 %v10621_v32, %v2893_v31  ;;  %v12230_v31 = vld [vmem:[#allocation122_spill] sm:$0xff] }
 0x820   :  { %8134 = vtanh.f32 %v3297_v55  ;;  %v3256_v55 = vadd.f32 %v3255_v41, %v11735_v30  ;;  %v12231_v41 = vld [vmem:[#allocation123_spill] sm:$0xff] }
 0x826   :  { %v3184_v49 = vpop.f32.mrb[24].mxu0 }
 0x827   :  { %v3185_v17 = vadd.f32 %v3184_v49, %v11732_v34  ;;  %v3186_v52 = vpop.f32.mrb[25].mxu0 }
 0x828   :  { %v3187_v22 = vadd.f32 %v3186_v52, %v11733_v42 }
 0x829   :  { %v4925_v39 = vmul.f32 -1.442695, %v3185_v17 }
 0x82a   :  { %v8135_v23 = vpop.eup %8134  ;;  %v4926_v21 = vmul.f32 -1.442695, %v3187_v22 }
 0x82b   :  { %v3300_v29 = vmul.f32 %v8135_v23, %v3299_v51  ;;  %8136 = vpow2.f32 %v4925_v39 }
 0x82c   :  { %8138 = vpow2.f32 %v4926_v21  ;;  %v12233_v21 = vld [vmem:[#allocation125_spill] sm:$0xff] }
 0x82d   :  { %v10614_v35 = vadd.f32 %v3301_v4, %v3300_v29  ;;  %v12232_v29 = vld [vmem:[#allocation124_spill] sm:$0xff] }
 0x82f   :  { %3367 = vmatprep.mubr.f32.mxu1 %v10614_v35  ;;  %3438 = vmatprep.mubr.f32.mxu0 %v10614_v35 }
 0x835   :  { %v8137_v25 = vpop.eup %8136 }
 0x836   :  { %v3267_v58 = vadd.f32 1.0, %v8137_v25  ;;  %v8139_v6 = vpop.eup %8138  ;;  %v12234_v25 = vld [vmem:[#allocation126_spill] sm:$0xff] }
 0x837   :  { %v3268_v48 = vadd.f32 1.0, %v8139_v6  ;;  %v12236_v6 = vld [vmem:[#allocation128_spill] sm:$0xff] }
 0x838   :  { %8140 = vrcp.f32 %v3267_v58  ;;  %v12235_v58 = vld [vmem:[#allocation127_spill] sm:$0xff] }
 0x839   :  { %8142 = vrcp.f32 %v3268_v48  ;;  %v12237_v48 = vld [vmem:[#allocation129_spill] sm:$0xff] }
 0x842   :  { %v8141_v47 = vpop.eup %8140 }
 0x843   :  { %v3274_v49 = vmul.f32 %v8141_v47, %v3273_v10  ;;  %v8143_v52 = vpop.eup %8142  ;;  %v12238_v10 = vld [vmem:[#allocation130_spill] sm:$0xff]  ;;  %v12240_v47 = vld [vmem:[#allocation132_spill] sm:$0xff] }
 0x844   :  { %v3277_v51 = vsub.f32 1.0, %v8143_v52  ;;  %v3279_v23 = vmul.f32 %v8143_v52, %v10429_v62  ;;  %v12229_v62 = vld [vmem:[#allocation121_spill] sm:$0xff]  ;;  %v12243_v52 = vld [vmem:[#allocation135_spill] sm:$0xff] }
 0x845   :  { %v3275_v17 = vadd.f32 %v3274_v49, %v3256_v55  ;;  %v12239_v55 = vld [vmem:[#allocation131_spill] sm:$0xff]  ;;  %v12241_v49 = vld [vmem:[#allocation133_spill] sm:$0xff] }
 0x847   :  { %8144 = vtanh.f32 %v3275_v17  ;;  %v12242_v17 = vld [vmem:[#allocation134_spill] sm:$0xff] }
 0x851   :  { %v8145_v39 = vpop.eup %8144 }
 0x852   :  { %v3278_v22 = vmul.f32 %v8145_v39, %v3277_v51  ;;  %v12244_v51 = vld [vmem:[#allocation136_spill] sm:$0xff]  ;;  %v12245_v39 = vld [vmem:[#allocation137_spill] sm:$0xff] }
 0x854   :  { %v10626_v4 = vadd.f32 %v3279_v23, %v3278_v22  ;;  %v12246_v23 = vld [vmem:[#allocation138_spill] sm:$0xff]  ;;  %v12247_v22 = vld [vmem:[#allocation139_spill] sm:$0xff] }
 0x856   :  { %3368 = vmatmul.mubr.f32.vlgmr.msra.gmra.mrb[34].mxu1 %v10626_v4  ;;  %3439 = vmatmul.mubr.f32.vlgmr.msra.gmra.mrb[30].mxu0 %v10626_v4 }
 0x857   :  { %7253 = vmatpush1.bf16.msra.mxu1 %v9032_v3  ;;  %7317 = vmatpush1.bf16.msra.mxu0 %v11736_v16 }
 0x858   :  { %3509 = vmatprep.mubr.f32.mxu1 %v10614_v35  ;;  %3580 = vmatprep.mubr.f32.mxu0 %v10614_v35 }
 0x859   :  { %7255 = vmatprep.subr.bf16.mxu1 %v11737_v5  ;;  %7319 = vmatprep.subr.bf16.mxu0 %v11738_v53 }
 0x85b   :  { %7257 = vmatpush1.bf16.msra.mxu1 %v11739_v50  ;;  %7321 = vmatpush1.bf16.msra.mxu0 %v11740_v46 }
 0x85c   :  { %7259 = vmatprep.subr.bf16.mxu1 %v11741_v59  ;;  %7323 = vmatprep.subr.bf16.mxu0 %v11742_v13 }
 0x85f   :  { %7261 = vmatpush1.bf16.msra.mxu1 %v11857_v18  ;;  %7325 = vmatpush1.bf16.msra.mxu0 %v11858_v28 }
 0x860   :  { %7263 = vmatprep.subr.bf16.mxu1 %v11859_v11  ;;  %7327 = vmatprep.subr.bf16.mxu0 %v11860_v7 }
 0x863   :  { %7265 = vmatpush1.bf16.msra.mxu1 %v11861_v14  ;;  %7329 = vmatpush1.bf16.msra.mxu0 %v11862_v15 }
 0x864   :  { %7267 = vmatprep.subr.bf16.mxu1 %v11863_v8  ;;  %7331 = vmatprep.subr.bf16.mxu0 %v11864_v9 }
 0x867   :  { %7269 = vmatpush1.bf16.msra.mxu1 %v11980_v33  ;;  %7333 = vmatpush1.bf16.msra.mxu0 %v11981_v38 }
 0x868   :  { %7271 = vmatprep.subr.bf16.mxu1 %v11982_v57  ;;  %7335 = vmatprep.subr.bf16.mxu0 %v11983_v60 }
 0x86b   :  { %7273 = vmatpush1.bf16.msra.mxu1 %v11984_v54  ;;  %7337 = vmatpush1.bf16.msra.mxu0 %v11985_v2 }
 0x86c   :  { %7275 = vmatprep.subr.bf16.mxu1 %v11986_v43  ;;  %7339 = vmatprep.subr.bf16.mxu0 %v11987_v27 }
 0x86f   :  { %7277 = vmatpush1.bf16.msra.mxu1 %v11988_v45  ;;  %7341 = vmatpush1.bf16.msra.mxu0 %v11989_v63 }
 0x870   :  { %7279 = vmatprep.subr.bf16.mxu1 %v11990_v19  ;;  %7343 = vmatprep.subr.bf16.mxu0 %v11991_v40 }
 0x873   :  { %7281 = vmatpush1.bf16.msra.mxu1 %v11992_v0  ;;  %7345 = vmatpush1.bf16.msra.mxu0 %v11993_v44 }
 0x874   :  { %7283 = vmatprep.subr.bf16.mxu1 %v11879_v56  ;;  %7347 = vmatprep.subr.bf16.mxu0 %v11994_v37 }
 0x877   :  { %7285 = vmatpush1.bf16.msra.mxu1 %v11881_v1  ;;  %7349 = vmatpush1.bf16.msra.mxu0 %v11882_v20 }
 0x878   :  { %7287 = vmatprep.subr.bf16.mxu1 %v11995_v36  ;;  %7351 = vmatprep.subr.bf16.mxu0 %v11884_v26 }
 0x87b   :  { %7289 = vmatpush1.bf16.msra.mxu1 %v12229_v62  ;;  %7353 = vmatpush1.bf16.msra.mxu0 %v12230_v31 }
 0x87c   :  { %7291 = vmatprep.subr.bf16.mxu1 %v12231_v41  ;;  %7355 = vmatprep.subr.bf16.mxu0 %v12232_v29 }
 0x87f   :  { %7293 = vmatpush1.bf16.msra.mxu1 %v12233_v21  ;;  %7357 = vmatpush1.bf16.msra.mxu0 %v12234_v25 }
 0x880   :  { %7295 = vmatprep.subr.bf16.mxu1 %v12235_v58  ;;  %7359 = vmatprep.subr.bf16.mxu0 %v12236_v6  ;;  %v12280_v6 = vld [vmem:[#allocation161_spill] sm:$0xff]  ;;  %v12282_v58 = vld [vmem:[#allocation18_spill] sm:$0xff] }
 0x883   :  { %7297 = vmatpush1.bf16.msra.mxu1 %v12237_v48  ;;  %7361 = vmatpush1.bf16.msra.mxu0 %v12238_v10  ;;  %v12248_v48 = vld [vmem:[#allocation140_spill] sm:$0xff]  ;;  %v12249_v10 = vld [vmem:[#allocation141_spill] sm:$0xff] }
 0x884   :  { %7299 = vmatprep.subr.bf16.mxu1 %v12239_v55  ;;  %7363 = vmatprep.subr.bf16.mxu0 %v12240_v47  ;;  %v12250_v55 = vld [vmem:[#allocation142_spill] sm:$0xff]  ;;  %v12251_v47 = vld [vmem:[#allocation143_spill] sm:$0xff] }
 0x887   :  { %7301 = vmatpush1.bf16.msra.mxu1 %v12241_v49  ;;  %7365 = vmatpush1.bf16.msra.mxu0 %v12242_v17  ;;  %v12252_v49 = vld [vmem:[#allocation144_spill] sm:$0xff]  ;;  %v12253_v17 = vld [vmem:[#allocation145_spill] sm:$0xff] }
 0x888   :  { %7303 = vmatprep.subr.bf16.mxu1 %v12243_v52  ;;  %7367 = vmatprep.subr.bf16.mxu0 %v12244_v51  ;;  %v12254_v52 = vld [vmem:[#allocation146_spill] sm:$0xff]  ;;  %v12255_v51 = vld [vmem:[#allocation147_spill] sm:$0xff] }
 0x88b   :  { %7305 = vmatpush1.bf16.msra.mxu1 %v12245_v39  ;;  %7369 = vmatpush1.bf16.msra.mxu0 %v12246_v23  ;;  %v12256_v39 = vmov 0.0|0.0   ;;  %v12269_v23 = vld [vmem:[#allocation23_spill] sm:$0xff] }
 0x88c   :  { %7307 = vmatprep.subr.bf16.mxu1 %v12247_v22  ;;  %7371 = vmatprep.subr.bf16.mxu0 %v12248_v48  ;;  %v12257_v48 = vld [vmem:[#allocation148_spill] sm:$0xff]  ;;  %v12268_v22 = vld [vmem:[#allocation155_spill] sm:$0xff] }
 0x88f   :  { %7309 = vmatpush1.bf16.msra.mxu1 %v12249_v10  ;;  %7373 = vmatpush1.bf16.msra.mxu0 %v12250_v55  ;;  %v12258_v55 = vld [vmem:[#allocation149_spill] sm:$0xff] }
 0x890   :  { %7311 = vmatprep.subr.bf16.mxu1 %v12251_v47  ;;  %7375 = vmatprep.subr.bf16.mxu0 %v12252_v49  ;;  %v12259_v47 = vld [vmem:[#allocation16_spill] sm:$0xff]  ;;  %v12263_v49 = vld [vmem:[#allocation19_spill] sm:$0xff]  ;;  %v12265_v10 = vld [vmem:[#allocation153_spill] sm:$0xff] }
 0x893   :  { %7313 = vmatpush1.bf16.msra.mxu1 %v12253_v17  ;;  %7377 = vmatpush1.bf16.msra.mxu0 %v12254_v52  ;;  %v12260_v17 = vmov 0.0   ;;  %v12262_v52 = vld [vmem:[#allocation151_spill] sm:$0xff] }
 0x894   :  { %7379 = vmatprep.subr.bf16.mxu1 %v12255_v51  ;;  %7426 = vmatprep.subr.bf16.mxu0 %v12256_v39  ;;  %v12261_v51 = vld [vmem:[#allocation150_spill] sm:$0xff] }
 0x896   :  { %3510 = vmatmul.mubr.f32.vlgmr.msra.gmra.mrb[36].mxu1 %v10626_v4  ;;  %3581 = vmatmul.mubr.f32.vlgmr.msra.gmra.mrb[32].mxu0 %v10626_v4 }
 0x897   :  { %7381 = vmatpush3.bf16.msra.mxu1 %v12257_v48  ;;  %3651 = vmatprep.mubr.f32.mxu1 %v10614_v35  ;;  %v12264_v48 = vld [vmem:[#allocation152_spill] sm:$0xff] }
 0x898   :  { %7383 = vmatprep.subr.bf16.mxu1 %v12258_v55  ;;  %7428 = vmatpush3.bf16.msra.mxu0 %v12259_v47  ;;  %v12266_v55 = vld [vmem:[#allocation22_spill] sm:$0xff] }
 0x899   :  { %7429 = vmatprep.subr.bf16.mxu0 %v12256_v39  ;;  %5450 = vmatprep.mubr.msk.f32.mxu0 %vm8202_vm1, %v12260_v17  ;;  %v12267_v47 = vld [vmem:[#allocation154_spill] sm:$0xff] }
 0x89b   :  { %7385 = vmatpush3.bf16.msra.mxu1 %v12261_v51  ;;  %v12270_v51 = vld [vmem:[#allocation10_spill] sm:$0xff] }
 0x89c   :  { %7387 = vmatprep.subr.bf16.mxu1 %v12262_v52  ;;  %7431 = vmatpush3.bf16.msra.mxu0 %v12263_v49  ;;  %v4929_v49 = vld [vmem:[%s11146_s0 + $0xc] sm:$0x3] }
 0x89d   :  { %7432 = vmatprep.subr.bf16.mxu0 %v12256_v39  ;;  %v12271_v52 = vld [vmem:[#allocation156_spill] sm:$0xff] }
 0x89f   :  { %7389 = vmatpush3.bf16.msra.mxu1 %v12264_v48  ;;  %v12274_v48 = vld [vmem:[#allocation13_spill] sm:$0xff] }
 0x8a0   :  { %7391 = vmatprep.subr.bf16.mxu1 %v12265_v10  ;;  %7434 = vmatpush3.bf16.msra.mxu0 %v12266_v55  ;;  %v12272_v10 = vld [vmem:[#allocation157_spill] sm:$0xff]  ;;  %v12273_v55 = vld [vmem:[#allocation11_spill] sm:$0xff] }
 0x8a1   :  { %7435 = vmatprep.subr.bf16.mxu0 %v12256_v39  ;;  %v12279_v39 = vld [vmem:[#allocation160_spill] sm:$0xff] }
 0x8a3   :  { %7393 = vmatpush3.bf16.msra.mxu1 %v12267_v47  ;;  %v12275_v47 = vld [vmem:[#allocation158_spill] sm:$0xff] }
 0x8a4   :  { %7395 = vmatprep.subr.bf16.mxu1 %v12268_v22  ;;  %7437 = vmatpush3.bf16.msra.mxu0 %v12269_v23  ;;  %v12276_v22 = vld [vmem:[#allocation159_spill] sm:$0xff]  ;;  %v12277_v23 = vld [vmem:[#allocation14_spill] sm:$0xff] }
 0x8a5   :  { %7439 = vmatprep.subr.bf16.mxu0 %v12270_v51  ;;  %v12278_v51 = vld [vmem:[#allocation15_spill] sm:$0xff] }
 0x8a7   :  { %7397 = vmatpush3.bf16.msra.mxu1 %v12271_v52  ;;  %5451 = vmatmul.mubr.msk.f32.vlgmr.msra.gmra.mrb[34].mxu0 %vm85_vm0, %v4929_v49  ;;  %v12281_v52 = vld [vmem:[#allocation17_spill] sm:$0xff] }
 0x8a8   :  { %7399 = vmatprep.subr.bf16.mxu1 %v12272_v10  ;;  %7441 = vmatpush1.bf16.msra.mxu0 %v12273_v55  ;;  %v12283_v10 = vld [vmem:[#allocation162_spill] sm:$0xff]  ;;  %v12284_v55 = vld [vmem:[#allocation3_spill] sm:$0xff] }
 0x8a9   :  { %7443 = vmatprep.subr.bf16.mxu0 %v12274_v48  ;;  %v12285_v48 = vld [vmem:[#allocation20_spill] sm:$0xff] }
 0x8ab   :  { %7401 = vmatpush3.bf16.msra.mxu1 %v12275_v47  ;;  %v12286_v47 = vld [vmem:[#allocation21_spill] sm:$0xff] }
 0x8ac   :  { %7403 = vmatprep.subr.bf16.mxu1 %v12276_v22  ;;  %7445 = vmatpush1.bf16.msra.mxu0 %v12277_v23  ;;  %v12287_v23 = vld [vmem:[#allocation4_spill] sm:$0xff]  ;;  %v12298_v22 = vld [vmem:[#allocation43_spill] sm:$0xff] }
 0x8ad   :  { %7447 = vmatprep.subr.bf16.mxu0 %v12278_v51  ;;  %v12288_v51 = vld [vmem:[#allocation5_spill] sm:$0xff] }
 0x8af   :  { %7405 = vmatpush3.bf16.msra.mxu1 %v12279_v39  ;;  %v12296_v39 = vld [vmem:[#allocation9_spill] sm:$0xff] }
 0x8b0   :  { %7407 = vmatprep.subr.bf16.mxu1 %v12280_v6  ;;  %7449 = vmatpush1.bf16.msra.mxu0 %v12281_v52  ;;  %v12289_v6 = vld [vmem:[#allocation33_spill] sm:$0xff]  ;;  %v12290_v52 = vld [vmem:[#allocation35_spill] sm:$0xff] }
 0x8b1   :  { %7451 = vmatprep.subr.bf16.mxu0 %v12282_v58  ;;  %v12291_v58 = vld [vmem:[#allocation6_spill] sm:$0xff] }
 0x8b3   :  { %7409 = vmatpush3.bf16.msra.mxu1 %v12283_v10  ;;  %v12292_v10 = vld [vmem:[#allocation7_spill] sm:$0xff] }
 0x8b4   :  { %7411 = vmatprep.subr.bf16.mxu1 %v12284_v55  ;;  %7453 = vmatpush1.bf16.msra.mxu0 %v12285_v48  ;;  %v12293_v55 = vld [vmem:[#allocation37_spill] sm:$0xff]  ;;  %v12294_v48 = vld [vmem:[#allocation39_spill] sm:$0xff] }
 0x8b5   :  { %7455 = vmatprep.subr.bf16.mxu0 %v12286_v47  ;;  %v12295_v47 = vld [vmem:[#allocation8_spill] sm:$0xff] }
 0x8b6   :  { %3652 = vmatmul.mubr.f32.vlgmr.msra.gmra.mrb[38].mxu1 %v10626_v4 }
 0x8b7   :  { %7413 = vmatpush1.bf16.msra.mxu1 %v12287_v23  ;;  %3729 = vmatprep.mubr.f32.mxu1 %v12260_v17  ;;  %v12297_v23 = vld [vmem:[#allocation41_spill] sm:$0xff] }
 0x8b8   :  { %7415 = vmatprep.subr.bf16.mxu1 %v12288_v51  ;;  %7457 = vmatpush1.bf16.msra.mxu0 %v12289_v6  ;;  %v12299_v51 = vld [vmem:[#allocation12_spill] sm:$0xff] }
 0x8b9   :  { %7459 = vmatprep.subr.bf16.mxu0 %v12290_v52  ;;  %v12300_v6 = vld [vmem:[#allocation24_spill] sm:$0xff]  ;;  %v12301_v52 = vld [vmem:[#allocation45_spill] sm:$0xff] }
 0x8bb   :  { %7417 = vmatpush1.bf16.msra.mxu1 %v12291_v58  ;;  %v12302_v58 = vld [vmem:[#allocation47_spill] sm:$0xff] }
 0x8bc   :  { %7419 = vmatprep.subr.bf16.mxu1 %v12292_v10  ;;  %7461 = vmatpush1.bf16.msra.mxu0 %v12293_v55  ;;  %v12303_v55 = vld [vmem:[#allocation25_spill] sm:$0xff]  ;;  %v12310_v10 = vld [vmem:[#allocation55_spill] sm:$0xff] }
 0x8bd   :  { %7463 = vmatprep.subr.bf16.mxu0 %v12294_v48  ;;  %v12304_v48 = vld [vmem:[#allocation26_spill] sm:$0xff] }
 0x8bf   :  { %7421 = vmatpush1.bf16.msra.mxu1 %v12295_v47  ;;  %v12305_v47 = vld [vmem:[#allocation49_spill] sm:$0xff] }
 0x8c0   :  { %7423 = vmatprep.subr.bf16.mxu1 %v12296_v39  ;;  %7465 = vmatpush1.bf16.msra.mxu0 %v12297_v23  ;;  %v12306_v39 = vld [vmem:[#allocation51_spill] sm:$0xff] }
 0x8c1   :  { %7467 = vmatprep.subr.bf16.mxu0 %v12298_v22  ;;  %v12307_v23 = vld [vmem:[#allocation27_spill] sm:$0xff]  ;;  %v12308_v22 = vld [vmem:[#allocation28_spill] sm:$0xff] }
 0x8c3   :  { %7425 = vmatpush1.bf16.msra.mxu1 %v12299_v51  ;;  %v12309_v51 = vld [vmem:[#allocation53_spill] sm:$0xff] }
 0x8c4   :  { %7503 = vmatprep.subr.bf16.mxu1 %v12300_v6  ;;  %7469 = vmatpush1.bf16.msra.mxu0 %v12301_v52  ;;  %v12311_v52 = vld [vmem:[#allocation29_spill] sm:$0xff] }
 0x8c5   :  { %7471 = vmatprep.subr.bf16.mxu0 %v12302_v58  ;;  %v12312_v58 = vld [vmem:[#allocation30_spill] sm:$0xff]  ;;  %v12351_v6 = vld [vmem:[#allocation81_spill] sm:$0xff] }
 0x8c6   :  { %4930 = vmatmul.mubr.msk.f32.vlgmr.msra.gmra.mrb[34].mxu1 %vm85_vm0, %v4929_v49  ;;  %v12313_v49 = vld [vmem:[#allocation57_spill] sm:$0xff] }
 0x8c7   :  { %7505 = vmatpush1.bf16.msra.mxu1 %v12303_v55  ;;  %v12314_v55 = vld [vmem:[#allocation59_spill] sm:$0xff] }
 0x8c8   :  { %7507 = vmatprep.subr.bf16.mxu1 %v12304_v48  ;;  %7473 = vmatpush1.bf16.msra.mxu0 %v12305_v47  ;;  %v12315_v48 = vld [vmem:[#allocation31_spill] sm:$0xff]  ;;  %v12316_v47 = vld [vmem:[#allocation32_spill] sm:$0xff] }
 0x8c9   :  { %7475 = vmatprep.subr.bf16.mxu0 %v12306_v39  ;;  %v12317_v39 = vld [vmem:[#allocation61_spill] sm:$0xff] }
 0x8cb   :  { %7509 = vmatpush1.bf16.msra.mxu1 %v12307_v23  ;;  %v12318_v23 = vld [vmem:[#allocation63_spill] sm:$0xff] }
 0x8cc   :  { %7511 = vmatprep.subr.bf16.mxu1 %v12308_v22  ;;  %7477 = vmatpush1.bf16.msra.mxu0 %v12309_v51  ;;  %v12319_v22 = vld [vmem:[#allocation34_spill] sm:$0xff]  ;;  %v12320_v51 = vld [vmem:[#allocation36_spill] sm:$0xff] }
 0x8cd   :  { %7479 = vmatprep.subr.bf16.mxu0 %v12310_v10  ;;  %v12321_v10 = vld [vmem:[#allocation65_spill] sm:$0xff] }
 0x8cf   :  { %7513 = vmatpush1.bf16.msra.mxu1 %v12311_v52  ;;  %v12322_v52 = vld [vmem:[#allocation67_spill] sm:$0xff] }
 0x8d0   :  { %7515 = vmatprep.subr.bf16.mxu1 %v12312_v58  ;;  %7481 = vmatpush1.bf16.msra.mxu0 %v12313_v49  ;;  %v12323_v58 = vld [vmem:[#allocation38_spill] sm:$0xff]  ;;  %v12324_v49 = vld [vmem:[#allocation40_spill] sm:$0xff] }
 0x8d1   :  { %7483 = vmatprep.subr.bf16.mxu0 %v12314_v55  ;;  %v12325_v55 = vld [vmem:[#allocation69_spill] sm:$0xff] }
 0x8d3   :  { %7517 = vmatpush1.bf16.msra.mxu1 %v12315_v48  ;;  %v12326_v48 = vld [vmem:[#allocation71_spill] sm:$0xff] }
 0x8d4   :  { %7519 = vmatprep.subr.bf16.mxu1 %v12316_v47  ;;  %7485 = vmatpush1.bf16.msra.mxu0 %v12317_v39  ;;  %v12327_v47 = vld [vmem:[#allocation42_spill] sm:$0xff]  ;;  %v12328_v39 = vld [vmem:[#allocation44_spill] sm:$0xff] }
 0x8d5   :  { %7487 = vmatprep.subr.bf16.mxu0 %v12318_v23  ;;  %v12329_v23 = vld [vmem:[#allocation73_spill] sm:$0xff] }
 0x8d7   :  { %7521 = vmatpush1.bf16.msra.mxu1 %v12319_v22  ;;  %v12330_v22 = vld [vmem:[#allocation75_spill] sm:$0xff] }
 0x8d8   :  { %7523 = vmatprep.subr.bf16.mxu1 %v12320_v51  ;;  %7489 = vmatpush1.bf16.msra.mxu0 %v12321_v10  ;;  %v12331_v51 = vld [vmem:[#allocation46_spill] sm:$0xff]  ;;  %v12332_v10 = vld [vmem:[#allocation48_spill] sm:$0xff] }
 0x8d9   :  { %7491 = vmatprep.subr.bf16.mxu0 %v12322_v52  ;;  %v12333_v52 = vld [vmem:[#allocation77_spill] sm:$0xff] }
 0x8db   :  { %7525 = vmatpush1.bf16.msra.mxu1 %v12323_v58  ;;  %v12334_v58 = vld [vmem:[#allocation79_spill] sm:$0xff] }
 0x8dc   :  { %7527 = vmatprep.subr.bf16.mxu1 %v12324_v49  ;;  %7493 = vmatpush1.bf16.msra.mxu0 %v12325_v55  ;;  %v12335_v49 = vld [vmem:[#allocation50_spill] sm:$0xff]  ;;  %v12336_v55 = vld [vmem:[#allocation52_spill] sm:$0xff] }
 0x8dd   :  { %7495 = vmatprep.subr.bf16.mxu0 %v12326_v48  ;;  %v12337_v48 = vld [vmem:[#allocation54_spill] sm:$0xff] }
 0x8df   :  { %7529 = vmatpush1.bf16.msra.mxu1 %v12327_v47  ;;  %v12338_v47 = vld [vmem:[#allocation56_spill] sm:$0xff] }
 0x8e0   :  { %7531 = vmatprep.subr.bf16.mxu1 %v12328_v39  ;;  %7497 = vmatpush1.bf16.msra.mxu0 %v12329_v23  ;;  %v12339_v39 = vld [vmem:[#allocation58_spill] sm:$0xff]  ;;  %v12340_v23 = vld [vmem:[#allocation60_spill] sm:$0xff] }
 0x8e1   :  { %7499 = vmatprep.subr.bf16.mxu0 %v12330_v22  ;;  %v12341_v22 = vld [vmem:[#allocation62_spill] sm:$0xff] }
 0x8e3   :  { %7533 = vmatpush1.bf16.msra.mxu1 %v12331_v51  ;;  %v12342_v51 = vld [vmem:[#allocation64_spill] sm:$0xff] }
 0x8e4   :  { %7535 = vmatprep.subr.bf16.mxu1 %v12332_v10  ;;  %7501 = vmatpush1.bf16.msra.mxu0 %v12333_v52  ;;  %v12343_v10 = vld [vmem:[#allocation66_spill] sm:$0xff]  ;;  %v12344_v52 = vld [vmem:[#allocation68_spill] sm:$0xff] }
 0x8e5   :  { %7567 = vmatprep.subr.bf16.mxu0 %v12334_v58  ;;  %v12345_v58 = vld [vmem:[#allocation70_spill] sm:$0xff] }
 0x8e7   :  { %7537 = vmatpush1.bf16.msra.mxu1 %v12335_v49  ;;  %v12346_v49 = vld [vmem:[#allocation72_spill] sm:$0xff] }
 0x8e8   :  { %7539 = vmatprep.subr.bf16.mxu1 %v12336_v55  ;;  %v12347_v55 = vld [vmem:[#allocation74_spill] sm:$0xff] }
 0x8eb   :  { %7541 = vmatpush1.bf16.msra.mxu1 %v12337_v48  ;;  %v12348_v48 = vld [vmem:[#allocation76_spill] sm:$0xff] }
 0x8ec   :  { %7543 = vmatprep.subr.bf16.mxu1 %v12338_v47  ;;  %v12349_v47 = vld [vmem:[#allocation78_spill] sm:$0xff] }
 0x8ef   :  { %7545 = vmatpush1.bf16.msra.mxu1 %v12339_v39  ;;  %v12350_v39 = vld [vmem:[#allocation80_spill] sm:$0xff] }
 0x8f0   :  { %7547 = vmatprep.subr.bf16.mxu1 %v12340_v23 }
 0x8f3   :  { %7549 = vmatpush1.bf16.msra.mxu1 %v12341_v22 }
 0x8f4   :  { %7551 = vmatprep.subr.bf16.mxu1 %v12342_v51 }
 0x8f7   :  { %7553 = vmatpush1.bf16.msra.mxu1 %v12343_v10 }
 0x8f8   :  { %7555 = vmatprep.subr.bf16.mxu1 %v12344_v52 }
 0x8fb   :  { %7557 = vmatpush1.bf16.msra.mxu1 %v12345_v58 }
 0x8fc   :  { %7559 = vmatprep.subr.bf16.mxu1 %v12346_v49 }
 0x8ff   :  { %7561 = vmatpush1.bf16.msra.mxu1 %v12347_v55 }
 0x900   :  { %7563 = vmatprep.subr.bf16.mxu1 %v12348_v48 }
 0x903   :  { %7565 = vmatpush1.bf16.msra.mxu1 %v12349_v47 }
 0x904   :  { %7631 = vmatprep.subr.bf16.mxu1 %v12350_v39 }
 0x929   :  { %v3440_v23 = vpop.f32.mrb[30].mxu0 }
 0x92a   :  { %v3442_v22 = vpop.f32.mrb[31].mxu0 }
 0x92b   :  { %v3657_v51 = vadd.f32 %v3442_v22, %v12351_v6 }
 0x969   :  { %v3511_v17 = vpop.f32.mrb[36].mxu1  ;;  %v3582_v10 = vpop.f32.mrb[32].mxu0 }
 0x96a   :  { %v3658_v52 = vadd.f32 %v3511_v17, %v11856_v61  ;;  %v3828_v25 = vadd.f32 %v3657_v51, %v3582_v10  ;;  %v3513_v58 = vpop.f32.mrb[37].mxu1  ;;  %v3584_v21 = vpop.f32.mrb[33].mxu0 }
 0x96b   :  { %v3659_v10 = vadd.f32 %v3513_v58, %v9830_v24 }
 0x96c   :  { %v3829_v49 = vadd.f32 %v3658_v52, %v3584_v21  ;;  %v4934_v29 = vmul.f32 -1.442695, %v3828_v25 }
 0x96e   :  { %8146 = vpow2.f32 %v4934_v29  ;;  %v4935_v55 = vmul.f32 -1.442695, %v3829_v49 }
 0x970   :  { %8148 = vpow2.f32 %v4935_v55 }
 0x978   :  { %v8147_v47 = vpop.eup %8146 }
 0x979   :  { %v3836_v39 = vadd.f32 1.0, %v8147_v47 }
 0x97a   :  { %v3802_v48 = vpop.f32.mrb[34].mxu0  ;;  %v8149_v31 = vpop.eup %8148 }
 0x97b   :  { %v5452_v41 = vpop.f32.mrb[35].mxu0  ;;  %8150 = vrcp.f32 %v3836_v39  ;;  %v3837_v6 = vadd.f32 1.0, %v8149_v31 }
 0x97d   :  { %8152 = vrcp.f32 %v3837_v6 }
 0x985   :  { %v8151_v51 = vpop.eup %8150 }
 0x987   :  { %v8153_v25 = vpop.eup %8152 }
 0x988   :  { %v3846_v39 = vsub.f32 1.0, %v8153_v25 }
 0x989   :  { %v5209_v62 = vpop.f32.mrb[38].mxu1 }
 0x98a   :  { %v5210_v22 = vpop.f32.mrb[39].mxu1 }
 0x98b   :  { %v5211_v26 = vadd.f32 %v5210_v22, %v5209_v62  ;;  %v3848_v62 = vmul.f32 %v8153_v25, %v10614_v35 }
 0x98d   :  { %v3842_v17 = vadd.f32 %v12228_v12, %v5211_v26 }
 0x98f   :  { %v3843_v21 = vmul.f32 %v8151_v51, %v3842_v17 }
 0x991   :  { %v3844_v29 = vadd.f32 %v3843_v21, %v3659_v10  ;;  %v3820_v10 = vadd.f32 %v10621_v32, %v3440_v23  ;;  %v3803_v21 = vadd.f32 %v3802_v48, %v11735_v30  ;;  %v12353_v48 = vld [vmem:[#allocation121_spill] sm:$0xff]  ;;  %v12354_v23 = vld [vmem:[#allocation122_spill] sm:$0xff] }
 0x993   :  { %8154 = vtanh.f32 %v3844_v29 }
 0x999   :  { %v3731_v41 = vpop.f32.mrb[34].mxu1 }
 0x99a   :  { %v3732_v49 = vadd.f32 %v3731_v41, %v11732_v34  ;;  %v3733_v47 = vpop.f32.mrb[35].mxu1 }
 0x99b   :  { %v3734_v31 = vadd.f32 %v3733_v47, %v11733_v42 }
 0x99c   :  { %v4932_v55 = vmul.f32 -1.442695, %v3732_v49 }
 0x99d   :  { %v8155_v52 = vpop.eup %8154  ;;  %v4933_v6 = vmul.f32 -1.442695, %v3734_v31  ;;  %v12355_v31 = vld [vmem:[#allocation123_spill] sm:$0xff] }
 0x99e   :  { %v3847_v26 = vmul.f32 %v8155_v52, %v3846_v39  ;;  %8156 = vpow2.f32 %v4932_v55 }
 0x99f   :  { %8158 = vpow2.f32 %v4933_v6  ;;  %v12358_v6 = vld [vmem:[#allocation126_spill] sm:$0xff] }
 0x9a0   :  { %v10811_v12 = vadd.f32 %v3848_v62, %v3847_v26  ;;  %v12356_v62 = vld [vmem:[#allocation124_spill] sm:$0xff]  ;;  %v12357_v26 = vld [vmem:[#allocation125_spill] sm:$0xff] }
 0x9a2   :  { %3914 = vmatprep.mubr.f32.mxu0 %v10811_v12  ;;  %3985 = vmatprep.mubr.f32.mxu1 %v10811_v12 }
 0x9a8   :  { %v8157_v58 = vpop.eup %8156 }
 0x9a9   :  { %v3814_v22 = vadd.f32 1.0, %v8157_v58  ;;  %v8159_v17 = vpop.eup %8158  ;;  %v12359_v58 = vld [vmem:[#allocation127_spill] sm:$0xff] }
 0x9aa   :  { %v3815_v51 = vadd.f32 1.0, %v8159_v17  ;;  %v12361_v17 = vld [vmem:[#allocation129_spill] sm:$0xff] }
 0x9ab   :  { %8160 = vrcp.f32 %v3814_v22  ;;  %v12360_v22 = vld [vmem:[#allocation128_spill] sm:$0xff] }
 0x9ac   :  { %8162 = vrcp.f32 %v3815_v51  ;;  %v12362_v51 = vld [vmem:[#allocation130_spill] sm:$0xff] }
 0x9b5   :  { %v8161_v35 = vpop.eup %8160 }
 0x9b6   :  { %v3821_v29 = vmul.f32 %v8161_v35, %v3820_v10  ;;  %v8163_v41 = vpop.eup %8162  ;;  %v12363_v10 = vld [vmem:[#allocation131_spill] sm:$0xff]  ;;  %v12365_v35 = vld [vmem:[#allocation133_spill] sm:$0xff] }
 0x9b7   :  { %v3824_v49 = vsub.f32 1.0, %v8163_v41  ;;  %v3826_v39 = vmul.f32 %v8163_v41, %v10626_v4  ;;  %v12352_v4 = vld [vmem:[#allocation120_spill] sm:$0xff] }
 0x9b8   :  { %v3822_v25 = vadd.f32 %v3821_v29, %v3803_v21  ;;  %v12364_v21 = vld [vmem:[#allocation132_spill] sm:$0xff]  ;;  %v12366_v29 = vld [vmem:[#allocation134_spill] sm:$0xff] }
 0x9b9   :  { %v12368_v41 = vld [vmem:[#allocation136_spill] sm:$0xff] }
 0x9ba   :  { %8164 = vtanh.f32 %v3822_v25  ;;  %v12367_v25 = vld [vmem:[#allocation135_spill] sm:$0xff] }
 0x9c4   :  { %v8165_v47 = vpop.eup %8164 }
 0x9c5   :  { %v3825_v55 = vmul.f32 %v8165_v47, %v3824_v49  ;;  %v12369_v49 = vld [vmem:[#allocation137_spill] sm:$0xff]  ;;  %v12370_v47 = vld [vmem:[#allocation138_spill] sm:$0xff] }
 0x9c7   :  { %v10818_v52 = vadd.f32 %v3826_v39, %v3825_v55  ;;  %v12371_v39 = vld [vmem:[#allocation139_spill] sm:$0xff]  ;;  %v12372_v55 = vld [vmem:[#allocation140_spill] sm:$0xff] }
 0x9c9   :  { %3915 = vmatmul.mubr.f32.vlgmr.msra.gmra.mrb[36].mxu0 %v10818_v52  ;;  %3986 = vmatmul.mubr.f32.vlgmr.msra.gmra.mrb[40].mxu1 %v10818_v52 }
 0x9ca   :  { %7569 = vmatpush1.bf16.msra.mxu0 %v9032_v3  ;;  %7633 = vmatpush1.bf16.msra.mxu1 %v11736_v16 }
 0x9cb   :  { %4056 = vmatprep.mubr.f32.mxu0 %v10811_v12  ;;  %4127 = vmatprep.mubr.f32.mxu1 %v10811_v12 }
 0x9cc   :  { %7571 = vmatprep.subr.bf16.mxu0 %v11737_v5  ;;  %7635 = vmatprep.subr.bf16.mxu1 %v11738_v53 }
 0x9ce   :  { %7573 = vmatpush1.bf16.msra.mxu0 %v11739_v50  ;;  %7637 = vmatpush1.bf16.msra.mxu1 %v11740_v46 }
 0x9cf   :  { %7575 = vmatprep.subr.bf16.mxu0 %v11741_v59  ;;  %7639 = vmatprep.subr.bf16.mxu1 %v11742_v13 }
 0x9d2   :  { %7577 = vmatpush1.bf16.msra.mxu0 %v11857_v18  ;;  %7641 = vmatpush1.bf16.msra.mxu1 %v11858_v28 }
 0x9d3   :  { %7579 = vmatprep.subr.bf16.mxu0 %v11859_v11  ;;  %7643 = vmatprep.subr.bf16.mxu1 %v11860_v7 }
 0x9d6   :  { %7581 = vmatpush1.bf16.msra.mxu0 %v11861_v14  ;;  %7645 = vmatpush1.bf16.msra.mxu1 %v11862_v15  ;;  %v12404_v15 = vld [vmem:[#allocation161_spill] sm:$0xff] }
 0x9d7   :  { %7583 = vmatprep.subr.bf16.mxu0 %v11863_v8  ;;  %7647 = vmatprep.subr.bf16.mxu1 %v11864_v9  ;;  %v12399_v9 = vld [vmem:[#allocation158_spill] sm:$0xff] }
 0x9da   :  { %7585 = vmatpush1.bf16.msra.mxu0 %v11980_v33  ;;  %7649 = vmatpush1.bf16.msra.mxu1 %v11981_v38  ;;  %v12396_v38 = vld [vmem:[#allocation157_spill] sm:$0xff] }
 0x9db   :  { %7587 = vmatprep.subr.bf16.mxu0 %v11982_v57  ;;  %7651 = vmatprep.subr.bf16.mxu1 %v11983_v60  ;;  %v12395_v60 = vld [vmem:[#allocation156_spill] sm:$0xff] }
 0x9de   :  { %7589 = vmatpush1.bf16.msra.mxu0 %v11984_v54  ;;  %7653 = vmatpush1.bf16.msra.mxu1 %v11985_v2  ;;  %v12394_v2 = vld [vmem:[#allocation24_spill] sm:$0xff] }
 0x9df   :  { %7591 = vmatprep.subr.bf16.mxu0 %v11986_v43  ;;  %7655 = vmatprep.subr.bf16.mxu1 %v11987_v27  ;;  %v12393_v27 = vld [vmem:[#allocation23_spill] sm:$0xff] }
 0x9e2   :  { %7593 = vmatpush1.bf16.msra.mxu0 %v11988_v45  ;;  %7657 = vmatpush1.bf16.msra.mxu1 %v11989_v63  ;;  %v12392_v63 = vld [vmem:[#allocation155_spill] sm:$0xff] }
 0x9e3   :  { %7595 = vmatprep.subr.bf16.mxu0 %v11990_v19  ;;  %7659 = vmatprep.subr.bf16.mxu1 %v11991_v40  ;;  %v12390_v40 = vld [vmem:[#allocation22_spill] sm:$0xff] }
 0x9e6   :  { %7597 = vmatpush1.bf16.msra.mxu0 %v11992_v0  ;;  %7661 = vmatpush1.bf16.msra.mxu1 %v11993_v44  ;;  %v12389_v44 = vld [vmem:[#allocation153_spill] sm:$0xff] }
 0x9e7   :  { %7599 = vmatprep.subr.bf16.mxu0 %v11879_v56  ;;  %7663 = vmatprep.subr.bf16.mxu1 %v11994_v37  ;;  %v12388_v37 = vld [vmem:[#allocation152_spill] sm:$0xff] }
 0x9ea   :  { %7601 = vmatpush1.bf16.msra.mxu0 %v11881_v1  ;;  %7665 = vmatpush1.bf16.msra.mxu1 %v11882_v20  ;;  %v12387_v20 = vld [vmem:[#allocation19_spill] sm:$0xff] }
 0x9eb   :  { %7603 = vmatprep.subr.bf16.mxu0 %v11995_v36  ;;  %7667 = vmatprep.subr.bf16.mxu1 %v12352_v4  ;;  %v12386_v4 = vld [vmem:[#allocation151_spill] sm:$0xff] }
 0x9ee   :  { %7605 = vmatpush1.bf16.msra.mxu0 %v12353_v48  ;;  %7669 = vmatpush1.bf16.msra.mxu1 %v12354_v23  ;;  %v12380_v23 = vmov 0.0|0.0  }
 0x9ef   :  { %7607 = vmatprep.subr.bf16.mxu0 %v12355_v31  ;;  %7671 = vmatprep.subr.bf16.mxu1 %v12356_v62  ;;  %v12378_v62 = vld [vmem:[#allocation146_spill] sm:$0xff] }
 0x9f2   :  { %7609 = vmatpush1.bf16.msra.mxu0 %v12357_v26  ;;  %7673 = vmatpush1.bf16.msra.mxu1 %v12358_v6  ;;  %v12376_v6 = vld [vmem:[#allocation144_spill] sm:$0xff] }
 0x9f3   :  { %7611 = vmatprep.subr.bf16.mxu0 %v12359_v58  ;;  %7675 = vmatprep.subr.bf16.mxu1 %v12360_v22  ;;  %v12374_v22 = vld [vmem:[#allocation142_spill] sm:$0xff] }
 0x9f6   :  { %7613 = vmatpush1.bf16.msra.mxu0 %v12361_v17  ;;  %7677 = vmatpush1.bf16.msra.mxu1 %v12362_v51  ;;  %v12373_v51 = vld [vmem:[#allocation141_spill] sm:$0xff] }
 0x9f7   :  { %7615 = vmatprep.subr.bf16.mxu0 %v12363_v10  ;;  %7679 = vmatprep.subr.bf16.mxu1 %v12364_v21  ;;  %v12375_v21 = vld [vmem:[#allocation143_spill] sm:$0xff] }
 0x9fa   :  { %7617 = vmatpush1.bf16.msra.mxu0 %v12365_v35  ;;  %7681 = vmatpush1.bf16.msra.mxu1 %v12366_v29  ;;  %v12377_v29 = vld [vmem:[#allocation145_spill] sm:$0xff] }
 0x9fb   :  { %7619 = vmatprep.subr.bf16.mxu0 %v12367_v25  ;;  %7683 = vmatprep.subr.bf16.mxu1 %v12368_v41  ;;  %v12379_v41 = vld [vmem:[#allocation147_spill] sm:$0xff] }
 0x9fe   :  { %7621 = vmatpush1.bf16.msra.mxu0 %v12369_v49  ;;  %7685 = vmatpush1.bf16.msra.mxu1 %v12370_v47  ;;  %v12383_v47 = vld [vmem:[#allocation16_spill] sm:$0xff] }
 0x9ff   :  { %7623 = vmatprep.subr.bf16.mxu0 %v12371_v39  ;;  %7687 = vmatprep.subr.bf16.mxu1 %v12372_v55  ;;  %v12381_v55 = vld [vmem:[#allocation148_spill] sm:$0xff] }
 0xa02   :  { %7625 = vmatpush1.bf16.msra.mxu0 %v12373_v51  ;;  %7689 = vmatpush1.bf16.msra.mxu1 %v12374_v22  ;;  %v12382_v22 = vld [vmem:[#allocation149_spill] sm:$0xff] }
 0xa03   :  { %7627 = vmatprep.subr.bf16.mxu0 %v12375_v21  ;;  %7691 = vmatprep.subr.bf16.mxu1 %v12376_v6  ;;  %v12384_v6 = vmov 0.0  }
 0xa06   :  { %7629 = vmatpush1.bf16.msra.mxu0 %v12377_v29  ;;  %7693 = vmatpush1.bf16.msra.mxu1 %v12378_v62  ;;  %v12385_v62 = vld [vmem:[#allocation150_spill] sm:$0xff] }
 0xa07   :  { %7695 = vmatprep.subr.bf16.mxu0 %v12379_v41  ;;  %7742 = vmatprep.subr.bf16.mxu1 %v12380_v23 }
 0xa09   :  { %4057 = vmatmul.mubr.f32.vlgmr.msra.gmra.mrb[38].mxu0 %v10818_v52  ;;  %4128 = vmatmul.mubr.f32.vlgmr.msra.gmra.mrb[42].mxu1 %v10818_v52 }
 0xa0a   :  { %7697 = vmatpush3.bf16.msra.mxu0 %v12381_v55  ;;  %4198 = vmatprep.mubr.f32.mxu0 %v10811_v12 }
 0xa0b   :  { %7699 = vmatprep.subr.bf16.mxu0 %v12382_v22  ;;  %7744 = vmatpush3.bf16.msra.mxu1 %v12383_v47  ;;  %v12391_v47 = vld [vmem:[#allocation154_spill] sm:$0xff] }
 0xa0c   :  { %7745 = vmatprep.subr.bf16.mxu1 %v12380_v23  ;;  %5469 = vmatprep.mubr.msk.f32.mxu1 %vm8202_vm1, %v12384_v6 }
 0xa0e   :  { %7701 = vmatpush3.bf16.msra.mxu0 %v12385_v62 }
 0xa0f   :  { %7703 = vmatprep.subr.bf16.mxu0 %v12386_v4  ;;  %7747 = vmatpush3.bf16.msra.mxu1 %v12387_v20  ;;  %v4936_v20 = vld [vmem:[%s11146_s0 + $0xe] sm:$0x3] }
 0xa10   :  { %7748 = vmatprep.subr.bf16.mxu1 %v12380_v23 }
 0xa12   :  { %7705 = vmatpush3.bf16.msra.mxu0 %v12388_v37 }
 0xa13   :  { %7707 = vmatprep.subr.bf16.mxu0 %v12389_v44  ;;  %7750 = vmatpush3.bf16.msra.mxu1 %v12390_v40  ;;  %v12397_v40 = vld [vmem:[#allocation25_spill] sm:$0xff]  ;;  %v12406_v44 = vld [vmem:[#allocation30_spill] sm:$0xff] }
 0xa14   :  { %7751 = vmatprep.subr.bf16.mxu1 %v12380_v23  ;;  %v12398_v23 = vld [vmem:[#allocation26_spill] sm:$0xff] }
 0xa16   :  { %7709 = vmatpush3.bf16.msra.mxu0 %v12391_v47  ;;  %v12403_v47 = vld [vmem:[#allocation160_spill] sm:$0xff] }
 0xa17   :  { %7711 = vmatprep.subr.bf16.mxu0 %v12392_v63  ;;  %7753 = vmatpush3.bf16.msra.mxu1 %v12393_v27  ;;  %v12400_v63 = vld [vmem:[#allocation159_spill] sm:$0xff] }
 0xa18   :  { %7755 = vmatprep.subr.bf16.mxu1 %v12394_v2  ;;  %v12401_v27 = vld [vmem:[#allocation27_spill] sm:$0xff]  ;;  %v12402_v2 = vld [vmem:[#allocation28_spill] sm:$0xff] }
 0xa1a   :  { %7713 = vmatpush3.bf16.msra.mxu0 %v12395_v60  ;;  %5470 = vmatmul.mubr.msk.f32.vlgmr.msra.gmra.mrb[44].mxu1 %vm85_vm0, %v4936_v20  ;;  %v12405_v60 = vld [vmem:[#allocation29_spill] sm:$0xff] }
 0xa1b   :  { %7715 = vmatprep.subr.bf16.mxu0 %v12396_v38  ;;  %7757 = vmatpush1.bf16.msra.mxu1 %v12397_v40  ;;  %v12407_v38 = vld [vmem:[#allocation162_spill] sm:$0xff]  ;;  %v12408_v40 = vld [vmem:[#allocation3_spill] sm:$0xff] }
 0xa1c   :  { %7759 = vmatprep.subr.bf16.mxu1 %v12398_v23  ;;  %v12409_v23 = vld [vmem:[#allocation31_spill] sm:$0xff] }
 0xa1e   :  { %7717 = vmatpush3.bf16.msra.mxu0 %v12399_v9  ;;  %v12410_v9 = vld [vmem:[#allocation32_spill] sm:$0xff] }
 0xa1f   :  { %7719 = vmatprep.subr.bf16.mxu0 %v12400_v63  ;;  %7761 = vmatpush1.bf16.msra.mxu1 %v12401_v27  ;;  %v12411_v27 = vld [vmem:[#allocation4_spill] sm:$0xff] }
 0xa20   :  { %7763 = vmatprep.subr.bf16.mxu1 %v12402_v2  ;;  %v12412_v2 = vld [vmem:[#allocation5_spill] sm:$0xff] }
 0xa22   :  { %7721 = vmatpush3.bf16.msra.mxu0 %v12403_v47  ;;  %v12420_v47 = vld [vmem:[#allocation9_spill] sm:$0xff] }
 0xa23   :  { %7723 = vmatprep.subr.bf16.mxu0 %v12404_v15  ;;  %7765 = vmatpush1.bf16.msra.mxu1 %v12405_v60  ;;  %v12413_v15 = vld [vmem:[#allocation34_spill] sm:$0xff]  ;;  %v12414_v60 = vld [vmem:[#allocation36_spill] sm:$0xff] }
 0xa24   :  { %7767 = vmatprep.subr.bf16.mxu1 %v12406_v44  ;;  %v12415_v44 = vld [vmem:[#allocation6_spill] sm:$0xff] }
 0xa26   :  { %7725 = vmatpush3.bf16.msra.mxu0 %v12407_v38  ;;  %v12416_v38 = vld [vmem:[#allocation7_spill] sm:$0xff] }
 0xa27   :  { %7727 = vmatprep.subr.bf16.mxu0 %v12408_v40  ;;  %7769 = vmatpush1.bf16.msra.mxu1 %v12409_v23  ;;  %v12417_v40 = vld [vmem:[#allocation38_spill] sm:$0xff]  ;;  %v12418_v23 = vld [vmem:[#allocation40_spill] sm:$0xff] }
 0xa28   :  { %7771 = vmatprep.subr.bf16.mxu1 %v12410_v9  ;;  %v12419_v9 = vld [vmem:[#allocation8_spill] sm:$0xff] }
 0xa29   :  { %4199 = vmatmul.mubr.f32.vlgmr.msra.gmra.mrb[40].mxu0 %v10818_v52 }
 0xa2a   :  { %7729 = vmatpush1.bf16.msra.mxu0 %v12411_v27  ;;  %4276 = vmatprep.mubr.f32.mxu0 %v12384_v6  ;;  %v12421_v27 = vld [vmem:[#allocation42_spill] sm:$0xff]  ;;  %v12422_v6 = vld [vmem:[#allocation44_spill] sm:$0xff] }
 0xa2b   :  { %7731 = vmatprep.subr.bf16.mxu0 %v12412_v2  ;;  %7773 = vmatpush1.bf16.msra.mxu1 %v12413_v15  ;;  %v12423_v2 = vld [vmem:[#allocation12_spill] sm:$0xff]  ;;  %v12424_v15 = vld [vmem:[#allocation79_spill] sm:$0xff] }
 0xa2c   :  { %7775 = vmatprep.subr.bf16.mxu1 %v12414_v60  ;;  %v12425_v60 = vld [vmem:[#allocation46_spill] sm:$0xff] }
 0xa2e   :  { %7733 = vmatpush1.bf16.msra.mxu0 %v12415_v44  ;;  %v12426_v44 = vld [vmem:[#allocation48_spill] sm:$0xff] }
 0xa2f   :  { %7735 = vmatprep.subr.bf16.mxu0 %v12416_v38  ;;  %7777 = vmatpush1.bf16.msra.mxu1 %v12417_v40  ;;  %v12427_v38 = vld [vmem:[#allocation50_spill] sm:$0xff]  ;;  %v12430_v40 = vld [vmem:[#allocation56_spill] sm:$0xff] }
 0xa30   :  { %7779 = vmatprep.subr.bf16.mxu1 %v12418_v23 }
 0xa32   :  { %7737 = vmatpush1.bf16.msra.mxu0 %v12419_v9  ;;  %v11001_v9 = vld [vmem:[%s11150_s6] ss:$0 sm:$0xff] }
 0xa33   :  { %7739 = vmatprep.subr.bf16.mxu0 %v12420_v47  ;;  %7781 = vmatpush1.bf16.msra.mxu1 %v12421_v27  ;;  %v12428_v47 = vld [vmem:[#allocation52_spill] sm:$0xff] }
 0xa34   :  { %7783 = vmatprep.subr.bf16.mxu1 %v12422_v6  ;;  %v12429_v6 = vld [vmem:[#allocation54_spill] sm:$0xff] }
 0xa36   :  { %7741 = vmatpush1.bf16.msra.mxu0 %v12423_v2 }
 0xa37   :  { %7819 = vmatprep.subr.bf16.mxu0 %v12424_v15  ;;  %7785 = vmatpush1.bf16.msra.mxu1 %v12425_v60 }
 0xa38   :  { %7787 = vmatprep.subr.bf16.mxu1 %v12426_v44 }
 0xa39   :  { %4937 = vmatmul.mubr.msk.f32.vlgmr.msra.gmra.mrb[36].mxu0 %vm85_vm0, %v4936_v20  ;;  %v12431_v20 = vld [vmem:[#allocation58_spill] sm:$0xff] }
 0xa3a   :  { %7821 = vmatpush1.bf16.msra.mxu0 %v9032_v3  ;;  %v12432_v3 = vld [vmem:[#allocation60_spill] sm:$0xff] }
 0xa3b   :  { %7823 = vmatprep.subr.bf16.mxu0 %v11737_v5  ;;  %7789 = vmatpush1.bf16.msra.mxu1 %v12427_v38  ;;  %v12433_v5 = vld [vmem:[#allocation62_spill] sm:$0xff] }
 0xa3c   :  { %7791 = vmatprep.subr.bf16.mxu1 %v12428_v47 }
 0xa3e   :  { %7825 = vmatpush1.bf16.msra.mxu0 %v11739_v50  ;;  %v12434_v50 = vld [vmem:[#allocation64_spill] sm:$0xff] }
 0xa3f   :  { %7827 = vmatprep.subr.bf16.mxu0 %v11741_v59  ;;  %7793 = vmatpush1.bf16.msra.mxu1 %v12429_v6  ;;  %v12435_v59 = vld [vmem:[#allocation66_spill] sm:$0xff] }
 0xa40   :  { %7795 = vmatprep.subr.bf16.mxu1 %v12430_v40 }
 0xa42   :  { %7829 = vmatpush1.bf16.msra.mxu0 %v11857_v18  ;;  %v12436_v18 = vld [vmem:[#allocation68_spill] sm:$0xff] }
 0xa43   :  { %7831 = vmatprep.subr.bf16.mxu0 %v11859_v11  ;;  %7797 = vmatpush1.bf16.msra.mxu1 %v12431_v20  ;;  %v12437_v11 = vld [vmem:[#allocation70_spill] sm:$0xff] }
 0xa44   :  { %7799 = vmatprep.subr.bf16.mxu1 %v12432_v3 }
 0xa46   :  { %7833 = vmatpush1.bf16.msra.mxu0 %v11861_v14  ;;  %v12438_v14 = vld [vmem:[#allocation72_spill] sm:$0xff] }
 0xa47   :  { %7835 = vmatprep.subr.bf16.mxu0 %v11863_v8  ;;  %7801 = vmatpush1.bf16.msra.mxu1 %v12433_v5  ;;  %v12439_v8 = vld [vmem:[#allocation74_spill] sm:$0xff] }
 0xa48   :  { %7803 = vmatprep.subr.bf16.mxu1 %v12434_v50 }
 0xa4a   :  { %7837 = vmatpush1.bf16.msra.mxu0 %v11980_v33  ;;  %v12440_v33 = vld [vmem:[#allocation76_spill] sm:$0xff] }
 0xa4b   :  { %7839 = vmatprep.subr.bf16.mxu0 %v11982_v57  ;;  %7805 = vmatpush1.bf16.msra.mxu1 %v12435_v59  ;;  %v12441_v57 = vld [vmem:[#allocation78_spill] sm:$0xff] }
 0xa4c   :  { %7807 = vmatprep.subr.bf16.mxu1 %v12436_v18 }
 0xa4e   :  { %7841 = vmatpush1.bf16.msra.mxu0 %v11984_v54  ;;  %v12442_v54 = vld [vmem:[#allocation80_spill] sm:$0xff] }
 0xa4f   :  { %7843 = vmatprep.subr.bf16.mxu0 %v11986_v43  ;;  %7809 = vmatpush1.bf16.msra.mxu1 %v12437_v11  ;;  %v12443_v43 = vld [vmem:[#allocation81_spill] sm:$0xff] }
 0xa50   :  { %7811 = vmatprep.subr.bf16.mxu1 %v12438_v14 }
 0xa52   :  { %7845 = vmatpush1.bf16.msra.mxu0 %v11988_v45 }
 0xa53   :  { %7847 = vmatprep.subr.bf16.mxu0 %v11990_v19  ;;  %7813 = vmatpush1.bf16.msra.mxu1 %v12439_v8 }
 0xa54   :  { %7815 = vmatprep.subr.bf16.mxu1 %v12440_v33 }
 0xa56   :  { %7849 = vmatpush1.bf16.msra.mxu0 %v11992_v0 }
 0xa57   :  { %7851 = vmatprep.subr.bf16.mxu0 %v11879_v56  ;;  %7817 = vmatpush1.bf16.msra.mxu1 %v12441_v57 }
 0xa58   :  { %7883 = vmatprep.subr.bf16.mxu1 %v12442_v54 }
 0xa5a   :  { %7853 = vmatpush1.bf16.msra.mxu0 %v11881_v1 }
 0xa5b   :  { %7855 = vmatprep.subr.bf16.mxu0 %v11995_v36 }
 0xa5e   :  { %7857 = vmatpush1.bf16.msra.mxu0 %v12353_v48 }
 0xa5f   :  { %7859 = vmatprep.subr.bf16.mxu0 %v12355_v31 }
 0xa62   :  { %7861 = vmatpush1.bf16.msra.mxu0 %v12357_v26 }
 0xa63   :  { %7863 = vmatprep.subr.bf16.mxu0 %v12359_v58 }
 0xa66   :  { %7865 = vmatpush1.bf16.msra.mxu0 %v12361_v17 }
 0xa67   :  { %7867 = vmatprep.subr.bf16.mxu0 %v12363_v10 }
 0xa6a   :  { %7869 = vmatpush1.bf16.msra.mxu0 %v12365_v35 }
 0xa6b   :  { %7871 = vmatprep.subr.bf16.mxu0 %v12367_v25 }
 0xa6e   :  { %7873 = vmatpush1.bf16.msra.mxu0 %v12369_v49 }
 0xa6f   :  { %7875 = vmatprep.subr.bf16.mxu0 %v12371_v39 }
 0xa72   :  { %7877 = vmatpush1.bf16.msra.mxu0 %v12373_v51 }
 0xa73   :  { %7879 = vmatprep.subr.bf16.mxu0 %v12375_v21 }
 0xa76   :  { %7881 = vmatpush1.bf16.msra.mxu0 %v12377_v29 }
 0xa77   :  { %7947 = vmatprep.subr.bf16.mxu0 %v12379_v41 }
 0xa9c   :  { %v3987_v56 = vpop.f32.mrb[40].mxu1 }
 0xa9d   :  { %v3989_v1 = vpop.f32.mrb[41].mxu1  ;;  %v4367_v54 = vadd.f32 %v10621_v32, %v3987_v56  ;;  %v12447_v32 = vld [vmem:[#allocation100_spill] sm:$0xff] }
 0xa9e   :  { %v4204_v45 = vadd.f32 %v3989_v1, %v12443_v43  ;;  %v12458_v56 = vld [vmem:[#allocation112_spill] sm:$0xff] }
 0xadc   :  { %v4058_v19 = vpop.f32.mrb[38].mxu0  ;;  %v4129_v0 = vpop.f32.mrb[42].mxu1 }
 0xadd   :  { %v4205_v36 = vadd.f32 %v4058_v19, %v11856_v61  ;;  %v4375_v48 = vadd.f32 %v4204_v45, %v4129_v0  ;;  %v4060_v31 = vpop.f32.mrb[39].mxu0  ;;  %v4131_v26 = vpop.f32.mrb[43].mxu1 }
 0xade   :  { %v4206_v15 = vadd.f32 %v4060_v31, %v9830_v24 }
 0xadf   :  { %v4376_v58 = vadd.f32 %v4205_v36, %v4131_v26  ;;  %v4941_v17 = vmul.f32 -1.442695, %v4375_v48 }
 0xae1   :  { %8166 = vpow2.f32 %v4941_v17  ;;  %v4942_v51 = vmul.f32 -1.442695, %v4376_v58  ;;  %v12459_v58 = vld [vmem:[#allocation161_spill] sm:$0xff]  ;;  %v12460_v17 = vld [vmem:[#allocation114_spill] sm:$0xff] }
 0xae3   :  { %8168 = vpow2.f32 %v4942_v51  ;;  %v12461_v51 = vld [vmem:[#allocation162_spill] sm:$0xff] }
 0xaeb   :  { %v8167_v35 = vpop.eup %8166 }
 0xaec   :  { %v4383_v29 = vadd.f32 1.0, %v8167_v35  ;;  %v12464_v35 = vld [vmem:[#allocation118_spill] sm:$0xff] }
 0xaed   :  { %v4349_v10 = vpop.f32.mrb[44].mxu1  ;;  %v8169_v25 = vpop.eup %8168 }
 0xaee   :  { %v5471_v21 = vpop.f32.mrb[45].mxu1  ;;  %8170 = vrcp.f32 %v4383_v29  ;;  %v4384_v39 = vadd.f32 1.0, %v8169_v25  ;;  %v12466_v29 = vld [vmem:[#allocation120_spill] sm:$0xff]  ;;  %v12467_v25 = vld [vmem:[#allocation122_spill] sm:$0xff] }
 0xaef   :  { %v12463_v21 = vmov 0.0|0.0  }
 0xaf0   :  { %8172 = vrcp.f32 %v4384_v39  ;;  %v12470_v39 = vld [vmem:[#allocation128_spill] sm:$0xff] }
 0xaf8   :  { %v8171_v2 = vpop.eup %8170 }
 0xafa   :  { %v8173_v38 = vpop.eup %8172 }
 0xafb   :  { %v4393_v20 = vsub.f32 1.0, %v8173_v38  ;;  %v4395_v18 = vmul.f32 %v8173_v38, %v10811_v12  ;;  %v12477_v38 = vld [vmem:[#allocation142_spill] sm:$0xff] }
 0xafc   :  { %v5253_v41 = vpop.f32.mrb[40].mxu0 }
 0xafd   :  { %v5254_v49 = vpop.f32.mrb[41].mxu0 }
 0xafe   :  { %v5255_v23 = vadd.f32 %v5254_v49, %v5253_v41  ;;  %v12468_v41 = vld [vmem:[#allocation124_spill] sm:$0xff]  ;;  %v12469_v49 = vld [vmem:[#allocation126_spill] sm:$0xff] }
 0xb00   :  { %v4389_v27 = vadd.f32 %v11001_v9, %v5255_v23  ;;  %v12471_v23 = vld [vmem:[#allocation130_spill] sm:$0xff] }
 0xb02   :  { %v4390_v60 = vmul.f32 %v8171_v2, %v4389_v27  ;;  %v12472_v27 = vld [vmem:[#allocation132_spill] sm:$0xff]  ;;  %v12473_v2 = vld [vmem:[#allocation134_spill] sm:$0xff] }
 0xb04   :  { %v4391_v44 = vadd.f32 %v4390_v60, %v4206_v15  ;;  %v12474_v15 = vld [vmem:[#allocation136_spill] sm:$0xff]  ;;  %v12475_v60 = vld [vmem:[#allocation138_spill] sm:$0xff] }
 0xb06   :  { %8174 = vtanh.f32 %v4391_v44  ;;  %v12476_v44 = vld [vmem:[#allocation140_spill] sm:$0xff] }
 0xb0c   :  { %v4278_v47 = vpop.f32.mrb[36].mxu0 }
 0xb0d   :  { %v4279_v6 = vadd.f32 %v4278_v47, %v11732_v34  ;;  %v4280_v40 = vpop.f32.mrb[37].mxu0  ;;  %v12478_v47 = vld [vmem:[#allocation144_spill] sm:$0xff] }
 0xb0e   :  { %v4281_v50 = vadd.f32 %v4280_v40, %v11733_v42  ;;  %v4350_v42 = vadd.f32 %v4349_v10, %v11735_v30  ;;  %v12444_v30 = vld [vmem:[#allocation153_spill] sm:$0xff]  ;;  %v12462_v10 = vld [vmem:[#allocation116_spill] sm:$0xff]  ;;  %v4705_v40 = vld [vmem:[%s11151_s7] sm:$0xff] }
 0xb0f   :  { %v4939_v3 = vmul.f32 -1.442695, %v4279_v6  ;;  %v12479_v6 = vld [vmem:[#allocation146_spill] sm:$0xff] }
 0xb10   :  { %v8175_v5 = vpop.eup %8174  ;;  %v4940_v14 = vmul.f32 -1.442695, %v4281_v50  ;;  %v4708_v50 = vld [vmem:[%s11151_s7 + $0x18] sm:$0xff] }
 0xb11   :  { %8176 = vpow2.f32 %v4939_v3  ;;  %v4394_v59 = vmul.f32 %v8175_v5, %v4393_v20  ;;  %v4706_v20 = vld [vmem:[%s11151_s7 + $0x8] sm:$0xff]  ;;  %v4707_v5 = vld [vmem:[%s11151_s7 + $0x10] sm:$0xff] }
 0xb12   :  { %8178 = vpow2.f32 %v4940_v14  ;;  %v7979_v3 = vpack.c.bf16 %v4706_v20, %v4705_v40  ;;  %v4710_v14 = vld [vmem:[%s11151_s7 + $0x28] sm:$0xff] }
 0xb13   :  { %v11008_v11 = vadd.f32 %v4395_v18, %v4394_v59  ;;  %v7982_v59 = vpack.c.bf16 %v4708_v50, %v4707_v5  ;;  %v4709_v18 = vld [vmem:[%s11151_s7 + $0x20] sm:$0xff] }
 0xb15   :  { %4461 = vmatprep.mubr.f32.mxu1 %v11008_v11  ;;  %4531 = vmatprep.mubr.f32.mxu0 %v11008_v11 }
 0xb1b   :  { %v8177_v8 = vpop.eup %8176 }
 0xb1c   :  { %v4361_v34 = vadd.f32 1.0, %v8177_v8  ;;  %v8179_v33 = vpop.eup %8178  ;;  %v7985_v8 = vpack.c.bf16 %v4710_v14, %v4709_v18 }
 0xb1d   :  { %v4362_v57 = vadd.f32 1.0, %v8179_v33  ;;  %v4712_v33 = vld [vmem:[%s11151_s7 + $0x38] sm:$0xff] }
 0xb1e   :  { %8180 = vrcp.f32 %v4361_v34  ;;  %v4711_v34 = vld [vmem:[%s11151_s7 + $0x30] sm:$0xff] }
 0xb1f   :  { %8182 = vrcp.f32 %v4362_v57  ;;  %v7988_v57 = vpack.c.bf16 %v4712_v33, %v4711_v34 }
 0xb28   :  { %v8181_v1 = vpop.eup %8180 }
 0xb29   :  { %v4368_v12 = vmul.f32 %v8181_v1, %v4367_v54  ;;  %v8183_v19 = vpop.eup %8182  ;;  %v4713_v54 = vld [vmem:[%s11151_s7 + $0x40] sm:$0xff] }
 0xb2a   :  { %v4371_v0 = vsub.f32 1.0, %v8183_v19  ;;  %v4373_v31 = vmul.f32 %v8183_v19, %v10818_v52  ;;  %v12449_v52 = vld [vmem:[#allocation102_spill] sm:$0xff] }
 0xb2b   :  { %v4369_v45 = vadd.f32 %v4368_v12, %v4350_v42  ;;  %v4714_v42 = vld [vmem:[%s11151_s7 + $0x48] sm:$0xff]  ;;  %v4715_v12 = vld [vmem:[%s11151_s7 + $0x50] sm:$0xff] }
 0xb2c   :  { %v7991_v1 = vpack.c.bf16 %v4714_v42, %v4713_v54 }
 0xb2d   :  { %8184 = vtanh.f32 %v4369_v45  ;;  %v4716_v45 = vld [vmem:[%s11151_s7 + $0x58] sm:$0xff] }
 0xb2e   :  { %v7994_v19 = vpack.c.bf16 %v4716_v45, %v4715_v12 }
 0xb37   :  { %v8185_v36 = vpop.eup %8184 }
 0xb38   :  { %v4372_v48 = vmul.f32 %v8185_v36, %v4371_v0  ;;  %v4717_v0 = vld [vmem:[%s11151_s7 + $0x60] sm:$0xff]  ;;  %v4718_v36 = vld [vmem:[%s11151_s7 + $0x68] sm:$0xff] }
 0xb3a   :  { %v4374_v26 = vadd.f32 %v4373_v31, %v4372_v48  ;;  %v7997_v48 = vpack.c.bf16 %v4718_v36, %v4717_v0  ;;  %v4719_v31 = vld [vmem:[%s11151_s7 + $0x70] sm:$0xff] }
 0xb3c   :  { %4462 = vmatmul.mubr.f32.vlgmr.msra.gmra.mrb[46].mxu1 %v4374_v26  ;;  %4532 = vmatmul.mubr.f32.vlgmr.msra.gmra.mrb[42].mxu0 %v4374_v26 }
 0xb3d   :  { %7885 = vmatpush1.bf16.msra.mxu1 %v11736_v16  ;;  %7949 = vmatpush3.bf16.msra.mxu0 %v12381_v55  ;;  %v12445_v16 = vld [vmem:[#allocation98_spill] sm:$0xff]  ;;  %v12457_v55 = vld [vmem:[#allocation160_spill] sm:$0xff] }
 0xb3e   :  { %4602 = vmatprep.mubr.f32.mxu1 %v11008_v11  ;;  %4673 = vmatprep.mubr.f32.mxu0 %v11008_v11 }
 0xb3f   :  { %7887 = vmatprep.subr.bf16.mxu1 %v11738_v53  ;;  %7951 = vmatprep.subr.bf16.mxu0 %v12382_v22  ;;  %v12446_v53 = vld [vmem:[#allocation154_spill] sm:$0xff] }
 0xb40   :  { %v12456_v22 = vld [vmem:[#allocation110_spill] sm:$0xff] }
 0xb41   :  { %7889 = vmatpush1.bf16.msra.mxu1 %v11740_v46  ;;  %7953 = vmatpush3.bf16.msra.mxu0 %v12385_v62  ;;  %v12448_v46 = vld [vmem:[#allocation155_spill] sm:$0xff]  ;;  %v12455_v62 = vld [vmem:[#allocation108_spill] sm:$0xff] }
 0xb42   :  { %7891 = vmatprep.subr.bf16.mxu1 %v11742_v13  ;;  %7955 = vmatprep.subr.bf16.mxu0 %v12386_v4  ;;  %v12450_v13 = vld [vmem:[#allocation156_spill] sm:$0xff] }
 0xb43   :  { %v12451_v4 = vld [vmem:[#allocation104_spill] sm:$0xff] }
 0xb45   :  { %7893 = vmatpush1.bf16.msra.mxu1 %v11858_v28  ;;  %7957 = vmatpush3.bf16.msra.mxu0 %v12388_v37  ;;  %v12452_v28 = vld [vmem:[#allocation157_spill] sm:$0xff]  ;;  %v12453_v37 = vld [vmem:[#allocation106_spill] sm:$0xff] }
 0xb46   :  { %7895 = vmatprep.subr.bf16.mxu1 %v11860_v7  ;;  %7959 = vmatprep.subr.bf16.mxu0 %v12444_v30  ;;  %v12454_v7 = vld [vmem:[#allocation158_spill] sm:$0xff] }
 0xb49   :  { %7897 = vmatpush1.bf16.msra.mxu1 %v12445_v16  ;;  %7961 = vmatpush3.bf16.msra.mxu0 %v12446_v53 }
 0xb4a   :  { %7899 = vmatprep.subr.bf16.mxu1 %v12447_v32  ;;  %7963 = vmatprep.subr.bf16.mxu0 %v12448_v46 }
 0xb4d   :  { %7901 = vmatpush1.bf16.msra.mxu1 %v12449_v52  ;;  %7965 = vmatpush3.bf16.msra.mxu0 %v12450_v13 }
 0xb4e   :  { %7903 = vmatprep.subr.bf16.mxu1 %v12451_v4  ;;  %7967 = vmatprep.subr.bf16.mxu0 %v12452_v28 }
 0xb51   :  { %7905 = vmatpush1.bf16.msra.mxu1 %v12453_v37  ;;  %7969 = vmatpush3.bf16.msra.mxu0 %v12454_v7 }
 0xb52   :  { %7907 = vmatprep.subr.bf16.mxu1 %v12455_v62  ;;  %7971 = vmatprep.subr.bf16.mxu0 %v12400_v63  ;;  %v12465_v63 = vmov 0.0  }
 0xb55   :  { %7909 = vmatpush1.bf16.msra.mxu1 %v12456_v22  ;;  %7973 = vmatpush3.bf16.msra.mxu0 %v12457_v55 }
 0xb56   :  { %7911 = vmatprep.subr.bf16.mxu1 %v12458_v56  ;;  %7975 = vmatprep.subr.bf16.mxu0 %v12459_v58 }
 0xb59   :  { %7913 = vmatpush1.bf16.msra.mxu1 %v12460_v17  ;;  %7977 = vmatpush3.bf16.msra.mxu0 %v12461_v51 }
 0xb5a   :  { %7915 = vmatprep.subr.bf16.mxu1 %v12462_v10  ;;  %7978 = vmatprep.subr.bf16.mxu0 %v12463_v21 }
 0xb5c   :  { %4674 = vmatmul.mubr.f32.vlgmr.msra.gmra.mrb[44].mxu0 %v4374_v26 }
 0xb5d   :  { %7917 = vmatpush1.bf16.msra.mxu1 %v12464_v35  ;;  %5504 = vmatprep.mubr.msk.f32.mxu0 %vm8202_vm1, %v12465_v63 }
 0xb5e   :  { %7919 = vmatprep.subr.bf16.mxu1 %v12466_v29  ;;  %7980 = vmatpush3.bf16.msra.mxu0 %v7979_v3 }
 0xb5f   :  { %7981 = vmatprep.subr.bf16.mxu0 %v12463_v21 }
 0xb61   :  { %7921 = vmatpush1.bf16.msra.mxu1 %v12467_v25 }
 0xb62   :  { %7923 = vmatprep.subr.bf16.mxu1 %v12468_v41  ;;  %7983 = vmatpush3.bf16.msra.mxu0 %v7982_v59 }
 0xb63   :  { %7984 = vmatprep.subr.bf16.mxu0 %v12463_v21 }
 0xb65   :  { %7925 = vmatpush1.bf16.msra.mxu1 %v12469_v49 }
 0xb66   :  { %7927 = vmatprep.subr.bf16.mxu1 %v12470_v39  ;;  %7986 = vmatpush3.bf16.msra.mxu0 %v7985_v8 }
 0xb67   :  { %7987 = vmatprep.subr.bf16.mxu0 %v12463_v21 }
 0xb69   :  { %7929 = vmatpush1.bf16.msra.mxu1 %v12471_v23 }
 0xb6a   :  { %7931 = vmatprep.subr.bf16.mxu1 %v12472_v27  ;;  %7989 = vmatpush3.bf16.msra.mxu0 %v7988_v57 }
 0xb6b   :  { %7990 = vmatprep.subr.bf16.mxu0 %v12463_v21 }
 0xb6d   :  { %7933 = vmatpush1.bf16.msra.mxu1 %v12473_v2 }
 0xb6e   :  { %7935 = vmatprep.subr.bf16.mxu1 %v12474_v15  ;;  %7992 = vmatpush3.bf16.msra.mxu0 %v7991_v1 }
 0xb6f   :  { %7993 = vmatprep.subr.bf16.mxu0 %v12463_v21 }
 0xb71   :  { %7937 = vmatpush1.bf16.msra.mxu1 %v12475_v60  ;;  %v16_v60 = vstv %s11153_s10 }
 0xb72   :  { %7939 = vmatprep.subr.bf16.mxu1 %v12476_v44  ;;  %7995 = vmatpush3.bf16.msra.mxu0 %v7994_v19  ;;  %17 = vst [vmem:[#allocation2] sm:$0x1] %v16_v60 }
 0xb73   :  { %7996 = vmatprep.subr.bf16.mxu0 %v12463_v21 }
 0xb75   :  { %7941 = vmatpush1.bf16.msra.mxu1 %v12477_v38 }
 0xb76   :  { %7943 = vmatprep.subr.bf16.mxu1 %v12478_v47  ;;  %7998 = vmatpush3.bf16.msra.mxu0 %v7997_v48 }
 0xb77   :  { %7999 = vmatprep.subr.bf16.mxu0 %v12463_v21 }
 0xb79   :  { %7945 = vmatpush1.bf16.msra.mxu1 %v12479_v6  ;;  %v4946_v40 = vld [vmem:[#allocation2] ss:$0 sm:$0xff] }
 0xb7a   :  { %8002 = vmatprep.subr.bf16.mxu1 %v12463_v21 }
 0xb7c   :  { %4603 = vmatmul.mubr.f32.vlgmr.msra.gmra.mrb[48].mxu1 %v4374_v26  ;;  %v4720_v26 = vld [vmem:[%s11151_s7 + $0x78] sm:$0xff] }
 0xb7d   :  { %5511 = vmatprep.mubr.msk.f32.mxu1 %vm8202_vm1, %v12465_v63  ;;  %v8000_v30 = vpack.c.bf16 %v4720_v26, %v4719_v31 }
 0xb7f   :  { %8001 = vmatpush3.bf16.msra.mxu0 %v8000_v30 }
 0xc0f   :  { %v4463_v16 = vpop.f32.mrb[46].mxu1  ;;  %v4533_v53 = vpop.f32.mrb[42].mxu0 }
 0xc10   :  { %v4464_v32 = vpop.f32.mrb[47].mxu1  ;;  %v4535_v46 = vpop.f32.mrb[43].mxu0  ;;  %v4680_v37 = vadd.f32 %v4533_v53, %v11856_v61 }
 0xc11   :  { %v4679_v28 = vadd.f32 %v4464_v32, %v12443_v43  ;;  %v4681_v43 = vadd.f32 %v4535_v46, %v9830_v24  ;;  %v4800_v24 = vld [vmem:[%s11152_s9 + $0x8] sm:$0xff] }
 0xc2f   :  { %v5297_v52 = vpop.f32.mrb[44].mxu0 }
 0xc30   :  { %v5298_v13 = vpop.f32.mrb[45].mxu0 }
 0xc31   :  { %v5299_v4 = vadd.f32 %v5298_v13, %v5297_v52 }
 0xc33   :  { %v4696_v35 = vadd.f32 %v11001_v9, %v5299_v4  ;;  %v4799_v9 = vld [vmem:[%s11152_s9] sm:$0xff] }
 0xc34   :  { %v8003_v15 = vpack.c.bf16 %v4800_v24, %v4799_v9 }
 0xc36   :  { %8004 = vmatpush3.bf16.msra.mxu1 %v8003_v15 }
 0xc4f   :  { %v4604_v7 = vpop.f32.mrb[48].mxu1 }
 0xc50   :  { %v4682_v62 = vadd.f32 %v4679_v28, %v4604_v7  ;;  %v4606_v22 = vpop.f32.mrb[49].mxu1 }
 0xc51   :  { %v4683_v55 = vadd.f32 %v4680_v37, %v4606_v22 }
 0xc52   :  { %v4943_v56 = vmul.f32 -1.442695, %v4682_v62 }
 0xc53   :  { %v4944_v58 = vmul.f32 -1.442695, %v4683_v55 }
 0xc54   :  { %8186 = vpow2.f32 %v4943_v56 }
 0xc55   :  { %8188 = vpow2.f32 %v4944_v58 }
 0xc5e   :  { %v8187_v17 = vpop.eup %8186 }
 0xc5f   :  { %v4690_v51 = vadd.f32 1.0, %v8187_v17  ;;  %v8189_v10 = vpop.eup %8188 }
 0xc60   :  { %v4691_v21 = vadd.f32 1.0, %v8189_v10 }
 0xc61   :  { %8190 = vrcp.f32 %v4690_v51 }
 0xc62   :  { %8192 = vrcp.f32 %v4691_v21 }
 0xc6b   :  { %v8191_v63 = vpop.eup %8190 }
 0xc6c   :  { %v4697_v29 = vmul.f32 %v8191_v63, %v4696_v35  ;;  %v8193_v25 = vpop.eup %8192 }
 0xc6d   :  { %v4700_v41 = vsub.f32 1.0, %v8193_v25  ;;  %v4702_v23 = vmul.f32 %v8193_v25, %v11008_v11  ;;  %v4945_v11 = vld [vmem:[%s11154_s8] ss:$0 sm:$0xff] }
 0xc6e   :  { %v4698_v61 = vadd.f32 %v4697_v29, %v4681_v43 }
 0xc70   :  { %8194 = vtanh.f32 %v4698_v61 }
 0xc7a   :  { %v8195_v49 = vpop.eup %8194 }
 0xc7b   :  { %v4701_v39 = vmul.f32 %v8195_v49, %v4700_v41 }
 0xc7d   :  { %v4703_v27 = vadd.f32 %v4702_v23, %v4701_v39 }
 0xc7f   :  { %v4704_v2 = vmax.f32 %v4703_v27, 0.0 }
 0xc81   :  { %5505 = vmatmul.mubr.f32.vlgmr.msra.gmra.mrb[46].mxu0 %v4704_v2 }
 0xd54   :  { %v4794_v44 = vpop.f32.mrb[46].mxu0 }
 0xd55   :  { %v4795_v38 = vadd.f32 %v4945_v11, %v4794_v44  ;;  %v5506_v47 = vpop.f32.mrb[47].mxu0 }
 0xd57   :  { %v4798_v6 = vmax.f32 %v4795_v38, 0.0 }
 0xd59   :  { %5512 = vmatmul.mubr.msk.f32.vlgmr.msra.gmra.mrb[50].mxu1 %vm4808_vm2, %v4798_v6 }
 0xe2c   :  { %v4878_v20 = vpop.f32.mrb[50].mxu1 }
 0xe2d   :  { %v4879_v3 = vadd.f32 %v4946_v40, %v4878_v20  ;;  %v5513_v5 = vpop.f32.mrb[51].mxu1 }
 0xe2f   :  { %4883 = vst.msk [vmem:[%s11155_s11] sm:$0x3] %vm4882_vm3, %v4879_v3 }

</bundles_post_ra>
